<compile_context>
chip_gen: v5e
topology: v5e:2x2
jax: 0.10.0
libtpu: 0.0.40
codegen_flags: <defaults>
</compile_context>

<pallas_src>
import math

import jax
import jax.numpy as jnp
from jax import lax
from jax.experimental import pallas as pl
from jax.experimental.pallas import tpu as pltpu

# ----------------------------- config (small) -------------------------------
HSIZE = 32          # cfg.HSIZE
HHEAD = 4           # cfg.HHEAD
HBASE = HSIZE // HHEAD
HFF = 64            # cfg.HFF
LAYER = 2           # cfg.LAYER
VOCAB = 100         # init_map['vocab_size']
VOCAB_PAD = 128     # vocab table padded to one full lane width (one-hot contraction)
IMGFEAT_DIM = 16    # visual feature dim
BBOX_DIM = 4        # bbox feature dim
MAX_POS = 64
WEIGHT_INIT = 0.02  # cfg.WEIGHT_INIT_FACTOR
LN_EPS = 1e-12
LANE = 128

# --------------------------- packed-slab layout ------------------------------
# Row indices inside the shared "gvec" (global 1-row vectors) block.
GV_TLN_G, GV_TLN_B, GV_VFB, GV_VBB, GV_VLN_G, GV_VLN_B, GV_POOL_B, GV_ITM_B = range(8)
# Row indices inside each per-layer "lvec" block.
LV_BQ, LV_BK, LV_BV, LV_BO, LV_LN1G, LV_LN1B, LV_BI, LV_BF, LV_LN2G, LV_LN2B = range(10)


def _make_layout():
    layout = {}
    off = 0

    def alloc(name, rows):
        nonlocal off
        layout[name] = off
        off += ((rows + 7) // 8) * 8   # keep every block 8-row (sublane) aligned

    alloc("word", VOCAB_PAD)          # vocab table, zero-padded to 128 rows
    alloc("pos", MAX_POS)             # position emb (+ token-type-0 folded in)
    alloc("vfw", IMGFEAT_DIM)
    alloc("vbw", BBOX_DIM)
    alloc("gvec", 8)
    alloc("pool_w", HSIZE)
    alloc("itm_w", HSIZE)
    for l in range(LAYER):
        alloc(f"wq{l}", HSIZE)
        alloc(f"wk{l}", HSIZE)
        alloc(f"wv{l}", HSIZE)
        alloc(f"wo{l}", HSIZE)
        alloc(f"wi{l}", HSIZE)
        alloc(f"wf{l}", HFF)
        alloc(f"lvec{l}", 10)
    return layout, off


LAYOUT, SLAB_ROWS = _make_layout()


# --------------------------- fused forward kernel ----------------------------
def _fused_forward_kernel(slab_ref, ids_ref, tmask_ref, imgfeat_ref, imask_ref,
                          bbox_ref,
                          pooled_ref, text_out_ref, img_out_ref, pred_ref,
                          xbuf_ref):
    f32 = jnp.float32
    B = ids_ref.shape[0]
    Lt = ids_ref.shape[1]
    Li = imgfeat_ref.shape[1]
    S = Lt + Li
    H = HSIZE
    d = HBASE

    # ---- slab accessors (static row offsets -> cheap VMEM loads) ----
    def mat(name, rows, cols, row=0):
        return slab_ref[pl.ds(LAYOUT[name] + row, rows), :][:, 0:cols]

    def vec(name, row, cols=HSIZE):
        return slab_ref[pl.ds(LAYOUT[name] + row, 1), :][:, 0:cols]

    def layer_norm(x, g, b):
        mu = jnp.mean(x, axis=-1, keepdims=True)
        var = jnp.mean(jnp.square(x - mu), axis=-1, keepdims=True)
        return (x - mu) * lax.rsqrt(var + LN_EPS) * g + b

    def gelu(y):
        # TODO(synk): tanh-approximation GELU; swap for exact erf if the rosita
        # backbone uses torch.nn.GELU (erf) instead of BERT's gelu.
        return 0.5 * y * (1.0 + jnp.tanh(
            0.7978845608028654 * (y + 0.044715 * y * y * y)))

    def tree_sum(parts):
        while len(parts) > 1:
            nxt = [parts[i] + parts[i + 1] for i in range(0, len(parts) - 1, 2)]
            if len(parts) % 2:
                nxt.append(parts[-1])
            parts = nxt
        return parts[0]

    # ---- embeddings: assemble x (B*S, H) directly in VMEM scratch ----
    word_w = mat("word", VOCAB_PAD, H)          # (128, H) zero-padded vocab table
    pos_pt = mat("pos", Lt, H)                  # position + token-type-0 (folded)
    tln_g, tln_b = vec("gvec", GV_TLN_G), vec("gvec", GV_TLN_B)
    vfw = mat("vfw", IMGFEAT_DIM, H)
    vbw = mat("vbw", BBOX_DIM, H)
    vfb, vbb = vec("gvec", GV_VFB), vec("gvec", GV_VBB)
    vln_g, vln_b = vec("gvec", GV_VLN_G), vec("gvec", GV_VLN_B)

    for b in range(B):  # static, unrolled (B tiny)
        # word-embedding "gather" as a one-hot matmul against the resident table
        ids_b = ids_ref[b]                                           # (Lt, 1) int32
        onehot = (lax.broadcasted_iota(jnp.int32, (Lt, VOCAB_PAD), 1)
                  == ids_b).astype(f32)                              # (Lt, 128)
        t = jnp.dot(onehot, word_w, preferred_element_type=f32) + pos_pt
        t = layer_norm(t, tln_g, tln_b)                              # (Lt, H)
        xbuf_ref[pl.ds(b * S, Lt), :] = t

        # TODO(synk): visual stream assumed feat-linear + bbox-linear + LN only
        # (no token-type/position emb), matching the original VisualEmbeddings.
        ve = (jnp.dot(imgfeat_ref[b].astype(f32), vfw,
                      preferred_element_type=f32) + vfb
              + jnp.dot(bbox_ref[b].astype(f32), vbw,
                        preferred_element_type=f32) + vbb)           # (Li, H)
        xbuf_ref[pl.ds(b * S + Lt, Li), :] = layer_norm(ve, vln_g, vln_b)

    x = xbuf_ref[...]                                                # (B*S, H)

    # additive attention mask: (1 - [text_mask ++ img_mask]) * -10000
    m = jnp.concatenate([tmask_ref[...], imask_ref[...]], axis=1).astype(f32)
    amask = (1.0 - m) * -10000.0                                     # (B, S)

    # per-head lane masks (avoid sub-128-lane slices in the head loop)
    lane = lax.broadcasted_iota(jnp.int32, (1, H), 1)
    head_masks = [((lane >= h * d) & (lane < (h + 1) * d)).astype(f32)
                  for h in range(HHEAD)]

    # ---- encoder layers (dense path fully flattened over B*S) ----
    for l in range(LAYER):  # static, unrolled
        wq = mat(f"wq{l}", H, H)      # 1/sqrt(d) folded in at pack time
        wk = mat(f"wk{l}", H, H)
        wv = mat(f"wv{l}", H, H)
        wo = mat(f"wo{l}", H, H)
        wi = mat(f"wi{l}", H, HFF)
        wf = mat(f"wf{l}", HFF, H)
        bq = vec(f"lvec{l}", LV_BQ)
        bk = vec(f"lvec{l}", LV_BK)
        bv = vec(f"lvec{l}", LV_BV)
        bo = vec(f"lvec{l}", LV_BO)
        ln1_g, ln1_b = vec(f"lvec{l}", LV_LN1G), vec(f"lvec{l}", LV_LN1B)
        bi = vec(f"lvec{l}", LV_BI, HFF)
        bf = vec(f"lvec{l}", LV_BF)
        ln2_g, ln2_b = vec(f"lvec{l}", LV_LN2G), vec(f"lvec{l}", LV_LN2B)

        q = jnp.dot(x, wq, preferred_element_type=f32) + bq          # (B*S, H)
        k = jnp.dot(x, wk, preferred_element_type=f32) + bk
        v = jnp.dot(x, wv, preferred_element_type=f32) + bv

        ctx_parts = []
        for b in range(B):  # attention needs per-batch handling
            qb = q[b * S:(b + 1) * S, :]
            kb = k[b * S:(b + 1) * S, :]
            vb = v[b * S:(b + 1) * S, :]
            ab = amask[b:b + 1, :]                                   # (1, S)
            head_ctx = []
            for hm in head_masks:
                # masked full-width contraction == per-head q_h @ k_h^T
                s = lax.dot_general(qb * hm, kb, (((1,), (1,)), ((), ())),
                                    preferred_element_type=f32) + ab  # (S, S)
                s = s - jnp.max(s, axis=-1, keepdims=True)
                p = jnp.exp(s)
                p = p / jnp.sum(p, axis=-1, keepdims=True)
                # p @ (v masked to head lanes) -> already-merged head slot
                head_ctx.append(jnp.dot(p, vb * hm,
                                        preferred_element_type=f32))  # (S, H)
            ctx_parts.append(tree_sum(head_ctx))   # independent partials, tree-summed
        ctx = jnp.concatenate(ctx_parts, axis=0)                      # (B*S, H)

        attn = jnp.dot(ctx, wo, preferred_element_type=f32) + bo
        x = layer_norm(attn + x, ln1_g, ln1_b)

        inter = gelu(jnp.dot(x, wi, preferred_element_type=f32) + bi)
        ffn = jnp.dot(inter, wf, preferred_element_type=f32) + bf
        x = layer_norm(ffn + x, ln2_g, ln2_b)

    # ---- outputs: text/img split done in-kernel; pooler + ITM head epilogue --
    for b in range(B):
        text_out_ref[b] = x[b * S: b * S + Lt, :].astype(text_out_ref.dtype)
        img_out_ref[b] = x[b * S + Lt: (b + 1) * S, :].astype(img_out_ref.dtype)

    first_rows = jnp.concatenate([x[b * S: b * S + 1, :] for b in range(B)],
                                 axis=0)                              # (B, H)
    pooled = jnp.tanh(jnp.dot(first_rows, mat("pool_w", H, H),
                              preferred_element_type=f32)
                      + vec("gvec", GV_POOL_B))
    pooled_ref[...] = pooled.astype(pooled_ref.dtype)

    pred = (jnp.dot(pooled, mat("itm_w", H, 2), preferred_element_type=f32)
            + vec("gvec", GV_ITM_B, 2))
    pred_ref[...] = pred.astype(pred_ref.dtype)


# ----------------------------- parameter init --------------------------------
def init_params(key):
    """PyTorch-layout params, initialized exactly like Net.init_weights."""
    keys = iter(jax.random.split(key, 64))

    def lin(k_in, k_out):
        return {
            "w": jax.random.normal(next(keys), (k_out, k_in), jnp.float32) * WEIGHT_INIT,
            "b": jnp.zeros((k_out,), jnp.float32),
        }

    def ln():
        return {"g": jnp.ones((HSIZE,), jnp.float32),
                "b": jnp.zeros((HSIZE,), jnp.float32)}

    layers = []
    for _ in range(LAYER):
        layers.append({
            "q": lin(HSIZE, HSIZE),
            "k": lin(HSIZE, HSIZE),
            "v": lin(HSIZE, HSIZE),
            "attn_out": lin(HSIZE, HSIZE),
            "ln1": ln(),
            "inter": lin(HSIZE, HFF),
            "ffn_out": lin(HFF, HSIZE),
            "ln2": ln(),
        })

    return {
        "word_emb": jax.random.normal(next(keys), (VOCAB, HSIZE), jnp.float32) * WEIGHT_INIT,
        "pos_emb": jax.random.normal(next(keys), (MAX_POS, HSIZE), jnp.float32) * WEIGHT_INIT,
        "tok_emb": jax.random.normal(next(keys), (2, HSIZE), jnp.float32) * WEIGHT_INIT,
        "text_ln": ln(),
        "vis_feat": lin(IMGFEAT_DIM, HSIZE),
        "vis_box": lin(BBOX_DIM, HSIZE),
        "vis_ln": ln(),
        "layers": layers,
        "pooler": lin(HSIZE, HSIZE),
        "itm": lin(HSIZE, 2),
    }


def pack_params(params):
    """One-time packing of every tensor into a single lane-padded f32 slab.

    Weights are pre-transposed to (K, N); 1/sqrt(HBASE) is folded into the Q
    weights/bias; token-type-0 embedding is folded into the position table
    (token_type_ids are all zero in this forward)."""
    scale = 1.0 / math.sqrt(HBASE)
    slab = jnp.zeros((SLAB_ROWS, LANE), jnp.float32)

    def put(s, name, arr, row=0):
        arr = jnp.asarray(arr, jnp.float32)
        if arr.ndim == 1:
            arr = arr[None, :]
        r, c = arr.shape
        return s.at[LAYOUT[name] + row: LAYOUT[name] + row + r, 0:c].set(arr)

    slab = put(slab, "word", params["word_emb"])
    slab = put(slab, "pos", params["pos_emb"] + params["tok_emb"][0][None, :])
    slab = put(slab, "vfw", params["vis_feat"]["w"].T)
    slab = put(slab, "vbw", params["vis_box"]["w"].T)
    slab = put(slab, "gvec", params["text_ln"]["g"], GV_TLN_G)
    slab = put(slab, "gvec", params["text_ln"]["b"], GV_TLN_B)
    slab = put(slab, "gvec", params["vis_feat"]["b"], GV_VFB)
    slab = put(slab, "gvec", params["vis_box"]["b"], GV_VBB)
    slab = put(slab, "gvec", params["vis_ln"]["g"], GV_VLN_G)
    slab = put(slab, "gvec", params["vis_ln"]["b"], GV_VLN_B)
    slab = put(slab, "gvec", params["pooler"]["b"], GV_POOL_B)
    slab = put(slab, "gvec", params["itm"]["b"], GV_ITM_B)
    slab = put(slab, "pool_w", params["pooler"]["w"].T)
    slab = put(slab, "itm_w", params["itm"]["w"].T)

    for l, lp in enumerate(params["layers"]):
        slab = put(slab, f"wq{l}", lp["q"]["w"].T * scale)
        slab = put(slab, f"wk{l}", lp["k"]["w"].T)
        slab = put(slab, f"wv{l}", lp["v"]["w"].T)
        slab = put(slab, f"wo{l}", lp["attn_out"]["w"].T)
        slab = put(slab, f"wi{l}", lp["inter"]["w"].T)
        slab = put(slab, f"wf{l}", lp["ffn_out"]["w"].T)
        slab = put(slab, f"lvec{l}", lp["q"]["b"] * scale, LV_BQ)
        slab = put(slab, f"lvec{l}", lp["k"]["b"], LV_BK)
        slab = put(slab, f"lvec{l}", lp["v"]["b"], LV_BV)
        slab = put(slab, f"lvec{l}", lp["attn_out"]["b"], LV_BO)
        slab = put(slab, f"lvec{l}", lp["ln1"]["g"], LV_LN1G)
        slab = put(slab, f"lvec{l}", lp["ln1"]["b"], LV_LN1B)
        slab = put(slab, f"lvec{l}", lp["inter"]["b"], LV_BI)
        slab = put(slab, f"lvec{l}", lp["ffn_out"]["b"], LV_BF)
        slab = put(slab, f"lvec{l}", lp["ln2"]["g"], LV_LN2G)
        slab = put(slab, f"lvec{l}", lp["ln2"]["b"], LV_LN2B)
    return slab


# ------------------------------- forward pass --------------------------------
def net_forward(slab, net_input):
    text_ids, text_mask, imgfeat_input, imgfeat_mask, imgfeat_bbox = net_input
    B, text_len = text_ids.shape
    img_len = imgfeat_input.shape[1]
    S = text_len + img_len

    ids3 = text_ids.astype(jnp.int32)[:, :, None]        # (B, Lt, 1)

    pooled, text_output, imgfeat_output, pred = pl.pallas_call(
        _fused_forward_kernel,
        out_shape=(
            jax.ShapeDtypeStruct((B, HSIZE), jnp.float32),            # pooled
            jax.ShapeDtypeStruct((B, text_len, HSIZE), jnp.float32),  # text
            jax.ShapeDtypeStruct((B, img_len, HSIZE), jnp.float32),   # image
            jax.ShapeDtypeStruct((B, 2), jnp.float32),                # itm pred
        ),
        scratch_shapes=[pltpu.VMEM((B * S, HSIZE), jnp.float32)],
    )(
        slab, ids3, text_mask.astype(jnp.float32),
        imgfeat_input.astype(jnp.float32), imgfeat_mask.astype(jnp.float32),
        imgfeat_bbox.astype(jnp.float32),
    )
    return pooled, text_output, imgfeat_output, pred


# ----------------------------------- main -------------------------------------
if __name__ == "__main__":
    key = jax.random.PRNGKey(0)
    k_param, k_ids, k_feat, k_bbox = jax.random.split(key, 4)

    B, TEXT_LEN, IMG_LEN = 2, 8, 8
    params = init_params(k_param)
    slab = pack_params(params)

    text_ids = jax.random.randint(k_ids, (B, TEXT_LEN), 0, VOCAB, dtype=jnp.int32)
    text_mask = jnp.concatenate(
        [jnp.ones((B, TEXT_LEN - 2), jnp.float32), jnp.zeros((B, 2), jnp.float32)], axis=1)
    imgfeat_input = jax.random.normal(k_feat, (B, IMG_LEN, IMGFEAT_DIM), jnp.float32)
    imgfeat_mask = jnp.concatenate(
        [jnp.ones((B, IMG_LEN - 1), jnp.float32), jnp.zeros((B, 1), jnp.float32)], axis=1)
    imgfeat_bbox = jax.random.uniform(k_bbox, (B, IMG_LEN, BBOX_DIM), jnp.float32)

    net_input = (text_ids, text_mask, imgfeat_input, imgfeat_mask, imgfeat_bbox)

    pooled, text_out, img_out, pred = jax.block_until_ready(
        jax.jit(net_forward)(slab, net_input))

    assert pooled.shape == (B, HSIZE)
    assert text_out.shape == (B, TEXT_LEN, HSIZE)
    assert img_out.shape == (B, IMG_LEN, HSIZE)
    assert pred.shape == (B, 2)
    assert all(bool(jnp.all(jnp.isfinite(t))) for t in (pooled, text_out, img_out, pred))

    print("KERNEL_OK")
</pallas_src>

<mosaic_0001>
module attributes {stable_mosaic.version = 11 : i64} {
  func.func @_fused_forward_kernel(%arg0: memref<768x128xf32, #tpu.memory_space<vmem>>, %arg1: memref<2x8x1xi32, #tpu.memory_space<vmem>>, %arg2: memref<2x8xf32, #tpu.memory_space<vmem>>, %arg3: memref<2x8x16xf32, #tpu.memory_space<vmem>>, %arg4: memref<2x8xf32, #tpu.memory_space<vmem>>, %arg5: memref<2x8x4xf32, #tpu.memory_space<vmem>>, %arg6: memref<2x32xf32, #tpu.memory_space<vmem>>, %arg7: memref<2x8x32xf32, #tpu.memory_space<vmem>>, %arg8: memref<2x8x32xf32, #tpu.memory_space<vmem>>, %arg9: memref<2x2xf32, #tpu.memory_space<vmem>>, %arg10: memref<32x32xf32, #tpu.memory_space<vmem>>) attributes {dimension_semantics = [], scalar_prefetch = 0 : i64, scratch_operands = 1 : i64, tpu.core_type = #tpu.core_type<tc>} {
    %c0 = arith.constant 0 : index
    %c0_0 = arith.constant 0 : index
    %0 = vector.load %arg0[%c0, %c0_0] : memref<768x128xf32, #tpu.memory_space<vmem>>, vector<128x128xf32>
    %1 = vector.extract_strided_slice %0 {offsets = [0, 0], sizes = [128, 32], strides = [1, 1]} : vector<128x128xf32> to vector<128x32xf32>
    %c128 = arith.constant 128 : index
    %c0_1 = arith.constant 0 : index
    %2 = vector.load %arg0[%c128, %c0_1] : memref<768x128xf32, #tpu.memory_space<vmem>>, vector<8x128xf32>
    %3 = vector.extract_strided_slice %2 {offsets = [0, 0], sizes = [8, 32], strides = [1, 1]} : vector<8x128xf32> to vector<8x32xf32>
    %c216 = arith.constant 216 : index
    %c0_2 = arith.constant 0 : index
    %4 = vector.load %arg0[%c216, %c0_2] : memref<768x128xf32, #tpu.memory_space<vmem>>, vector<1x128xf32>
    %5 = vector.extract_strided_slice %4 {offsets = [0, 0], sizes = [1, 32], strides = [1, 1]} : vector<1x128xf32> to vector<1x32xf32>
    %c217 = arith.constant 217 : index
    %c0_3 = arith.constant 0 : index
    %6 = vector.load %arg0[%c217, %c0_3] : memref<768x128xf32, #tpu.memory_space<vmem>>, vector<1x128xf32>
    %7 = vector.extract_strided_slice %6 {offsets = [0, 0], sizes = [1, 32], strides = [1, 1]} : vector<1x128xf32> to vector<1x32xf32>
    %c192 = arith.constant 192 : index
    %c0_4 = arith.constant 0 : index
    %8 = vector.load %arg0[%c192, %c0_4] : memref<768x128xf32, #tpu.memory_space<vmem>>, vector<16x128xf32>
    %9 = vector.extract_strided_slice %8 {offsets = [0, 0], sizes = [16, 32], strides = [1, 1]} : vector<16x128xf32> to vector<16x32xf32>
    %c208 = arith.constant 208 : index
    %c0_5 = arith.constant 0 : index
    %10 = vector.load %arg0[%c208, %c0_5] : memref<768x128xf32, #tpu.memory_space<vmem>>, vector<4x128xf32>
    %11 = vector.extract_strided_slice %10 {offsets = [0, 0], sizes = [4, 32], strides = [1, 1]} : vector<4x128xf32> to vector<4x32xf32>
    %c218 = arith.constant 218 : index
    %c0_6 = arith.constant 0 : index
    %12 = vector.load %arg0[%c218, %c0_6] : memref<768x128xf32, #tpu.memory_space<vmem>>, vector<1x128xf32>
    %13 = vector.extract_strided_slice %12 {offsets = [0, 0], sizes = [1, 32], strides = [1, 1]} : vector<1x128xf32> to vector<1x32xf32>
    %c219 = arith.constant 219 : index
    %c0_7 = arith.constant 0 : index
    %14 = vector.load %arg0[%c219, %c0_7] : memref<768x128xf32, #tpu.memory_space<vmem>>, vector<1x128xf32>
    %15 = vector.extract_strided_slice %14 {offsets = [0, 0], sizes = [1, 32], strides = [1, 1]} : vector<1x128xf32> to vector<1x32xf32>
    %c220 = arith.constant 220 : index
    %c0_8 = arith.constant 0 : index
    %16 = vector.load %arg0[%c220, %c0_8] : memref<768x128xf32, #tpu.memory_space<vmem>>, vector<1x128xf32>
    %17 = vector.extract_strided_slice %16 {offsets = [0, 0], sizes = [1, 32], strides = [1, 1]} : vector<1x128xf32> to vector<1x32xf32>
    %c221 = arith.constant 221 : index
    %c0_9 = arith.constant 0 : index
    %18 = vector.load %arg0[%c221, %c0_9] : memref<768x128xf32, #tpu.memory_space<vmem>>, vector<1x128xf32>
    %19 = vector.extract_strided_slice %18 {offsets = [0, 0], sizes = [1, 32], strides = [1, 1]} : vector<1x128xf32> to vector<1x32xf32>
    %c0_10 = arith.constant 0 : index
    %c0_11 = arith.constant 0 : index
    %c0_12 = arith.constant 0 : index
    %20 = vector.load %arg1[%c0_10, %c0_11, %c0_12] : memref<2x8x1xi32, #tpu.memory_space<vmem>>, vector<1x8x1xi32>
    %21 = vector.shape_cast %20 : vector<1x8x1xi32> to vector<8x1xi32>
    %22 = tpu.iota {dimensions = array<i32: 1>} : vector<8x128xi32>
    %23 = vector.broadcast %21 : vector<8x1xi32> to vector<8x128xi32>
    %24 = arith.cmpi eq, %22, %23 : vector<8x128xi32>
    %25 = arith.extui %24 : vector<8x128xi1> to vector<8x128xi32>
    %26 = arith.sitofp %25 : vector<8x128xi32> to vector<8x128xf32>
    %cst = arith.constant dense<0.000000e+00> : vector<8x32xf32>
    %27 = tpu.matmul %26, %1, %cst {dimension_numbers = #tpu.dot_dimension_numbers<[1], [0], [0], [1], [0, 0, 1, 1], [], []>} : vector<8x128xf32>, vector<128x32xf32>, vector<8x32xf32> -> vector<8x32xf32>
    %28 = arith.addf %27, %3 : vector<8x32xf32>
    %cst_13 = arith.constant dense<0.000000e+00> : vector<8xf32>
    %29 = vector.multi_reduction <add>, %28, %cst_13 [1] : vector<8x32xf32> to vector<8xf32>
    %30 = vector.shape_cast %29 : vector<8xf32> to vector<8x1xf32>
    %cst_14 = arith.constant 3.200000e+01 : f32
    %31 = vector.broadcast %cst_14 : f32 to vector<8x1xf32>
    %32 = arith.divf %30, %31 : vector<8x1xf32>
    %33 = vector.broadcast %32 : vector<8x1xf32> to vector<8x32xf32>
    %34 = arith.subf %28, %33 : vector<8x32xf32>
    %35 = arith.mulf %34, %34 : vector<8x32xf32>
    %cst_15 = arith.constant dense<0.000000e+00> : vector<8xf32>
    %36 = vector.multi_reduction <add>, %35, %cst_15 [1] : vector<8x32xf32> to vector<8xf32>
    %37 = vector.shape_cast %36 : vector<8xf32> to vector<8x1xf32>
    %cst_16 = arith.constant 3.200000e+01 : f32
    %38 = vector.broadcast %cst_16 : f32 to vector<8x1xf32>
    %39 = arith.divf %37, %38 : vector<8x1xf32>
    %40 = vector.broadcast %32 : vector<8x1xf32> to vector<8x32xf32>
    %41 = arith.subf %28, %40 : vector<8x32xf32>
    %cst_17 = arith.constant 9.99999996E-13 : f32
    %42 = vector.broadcast %cst_17 : f32 to vector<8x1xf32>
    %43 = arith.addf %39, %42 : vector<8x1xf32>
    %44 = math.rsqrt %43 : vector<8x1xf32>
    %45 = vector.broadcast %44 : vector<8x1xf32> to vector<8x32xf32>
    %46 = arith.mulf %41, %45 : vector<8x32xf32>
    %47 = vector.broadcast %5 : vector<1x32xf32> to vector<8x32xf32>
    %48 = arith.mulf %46, %47 : vector<8x32xf32>
    %49 = vector.broadcast %7 : vector<1x32xf32> to vector<8x32xf32>
    %50 = arith.addf %48, %49 : vector<8x32xf32>
    %c0_18 = arith.constant 0 : index
    %c0_19 = arith.constant 0 : index
    %51 = vector.load %arg10[%c0_18, %c0_19] : memref<32x32xf32, #tpu.memory_space<vmem>>, vector<8x32xf32>
    tpu.vector_store %arg10[%c0_18, %c0_19], %50 {strides = array<i32>} : memref<32x32xf32, #tpu.memory_space<vmem>>, vector<8x32xf32>,
    %c0_20 = arith.constant 0 : index
    %c0_21 = arith.constant 0 : index
    %c0_22 = arith.constant 0 : index
    %52 = vector.load %arg3[%c0_20, %c0_21, %c0_22] : memref<2x8x16xf32, #tpu.memory_space<vmem>>, vector<1x8x16xf32>
    %53 = vector.shape_cast %52 : vector<1x8x16xf32> to vector<8x16xf32>
    %cst_23 = arith.constant dense<0.000000e+00> : vector<8x32xf32>
    %54 = tpu.matmul %53, %9, %cst_23 {dimension_numbers = #tpu.dot_dimension_numbers<[1], [0], [0], [1], [0, 0, 1, 1], [], []>} : vector<8x16xf32>, vector<16x32xf32>, vector<8x32xf32> -> vector<8x32xf32>
    %55 = vector.broadcast %13 : vector<1x32xf32> to vector<8x32xf32>
    %56 = arith.addf %54, %55 : vector<8x32xf32>
    %c0_24 = arith.constant 0 : index
    %c0_25 = arith.constant 0 : index
    %c0_26 = arith.constant 0 : index
    %57 = vector.load %arg5[%c0_24, %c0_25, %c0_26] : memref<2x8x4xf32, #tpu.memory_space<vmem>>, vector<1x8x4xf32>
    %58 = vector.shape_cast %57 : vector<1x8x4xf32> to vector<8x4xf32>
    %cst_27 = arith.constant dense<0.000000e+00> : vector<8x32xf32>
    %59 = tpu.matmul %58, %11, %cst_27 {dimension_numbers = #tpu.dot_dimension_numbers<[1], [0], [0], [1], [0, 0, 1, 1], [], []>} : vector<8x4xf32>, vector<4x32xf32>, vector<8x32xf32> -> vector<8x32xf32>
    %60 = arith.addf %56, %59 : vector<8x32xf32>
    %61 = vector.broadcast %15 : vector<1x32xf32> to vector<8x32xf32>
    %62 = arith.addf %60, %61 : vector<8x32xf32>
    %cst_28 = arith.constant dense<0.000000e+00> : vector<8xf32>
    %63 = vector.multi_reduction <add>, %62, %cst_28 [1] : vector<8x32xf32> to vector<8xf32>
    %64 = vector.shape_cast %63 : vector<8xf32> to vector<8x1xf32>
    %cst_29 = arith.constant 3.200000e+01 : f32
    %65 = vector.broadcast %cst_29 : f32 to vector<8x1xf32>
    %66 = arith.divf %64, %65 : vector<8x1xf32>
    %67 = vector.broadcast %66 : vector<8x1xf32> to vector<8x32xf32>
    %68 = arith.subf %62, %67 : vector<8x32xf32>
    %69 = arith.mulf %68, %68 : vector<8x32xf32>
    %cst_30 = arith.constant dense<0.000000e+00> : vector<8xf32>
    %70 = vector.multi_reduction <add>, %69, %cst_30 [1] : vector<8x32xf32> to vector<8xf32>
    %71 = vector.shape_cast %70 : vector<8xf32> to vector<8x1xf32>
    %cst_31 = arith.constant 3.200000e+01 : f32
    %72 = vector.broadcast %cst_31 : f32 to vector<8x1xf32>
    %73 = arith.divf %71, %72 : vector<8x1xf32>
    %74 = vector.broadcast %66 : vector<8x1xf32> to vector<8x32xf32>
    %75 = arith.subf %62, %74 : vector<8x32xf32>
    %cst_32 = arith.constant 9.99999996E-13 : f32
    %76 = vector.broadcast %cst_32 : f32 to vector<8x1xf32>
    %77 = arith.addf %73, %76 : vector<8x1xf32>
    %78 = math.rsqrt %77 : vector<8x1xf32>
    %79 = vector.broadcast %78 : vector<8x1xf32> to vector<8x32xf32>
    %80 = arith.mulf %75, %79 : vector<8x32xf32>
    %81 = vector.broadcast %17 : vector<1x32xf32> to vector<8x32xf32>
    %82 = arith.mulf %80, %81 : vector<8x32xf32>
    %83 = vector.broadcast %19 : vector<1x32xf32> to vector<8x32xf32>
    %84 = arith.addf %82, %83 : vector<8x32xf32>
    %c8 = arith.constant 8 : index
    %c0_33 = arith.constant 0 : index
    %85 = vector.load %arg10[%c8, %c0_33] : memref<32x32xf32, #tpu.memory_space<vmem>>, vector<8x32xf32>
    tpu.vector_store %arg10[%c8, %c0_33], %84 {strides = array<i32>} : memref<32x32xf32, #tpu.memory_space<vmem>>, vector<8x32xf32>,
    %c1 = arith.constant 1 : index
    %c0_34 = arith.constant 0 : index
    %c0_35 = arith.constant 0 : index
    %86 = vector.load %arg1[%c1, %c0_34, %c0_35] : memref<2x8x1xi32, #tpu.memory_space<vmem>>, vector<1x8x1xi32>
    %87 = vector.shape_cast %86 : vector<1x8x1xi32> to vector<8x1xi32>
    %88 = tpu.iota {dimensions = array<i32: 1>} : vector<8x128xi32>
    %89 = vector.broadcast %87 : vector<8x1xi32> to vector<8x128xi32>
    %90 = arith.cmpi eq, %88, %89 : vector<8x128xi32>
    %91 = arith.extui %90 : vector<8x128xi1> to vector<8x128xi32>
    %92 = arith.sitofp %91 : vector<8x128xi32> to vector<8x128xf32>
    %cst_36 = arith.constant dense<0.000000e+00> : vector<8x32xf32>
    %93 = tpu.matmul %92, %1, %cst_36 {dimension_numbers = #tpu.dot_dimension_numbers<[1], [0], [0], [1], [0, 0, 1, 1], [], []>} : vector<8x128xf32>, vector<128x32xf32>, vector<8x32xf32> -> vector<8x32xf32>
    %94 = arith.addf %93, %3 : vector<8x32xf32>
    %cst_37 = arith.constant dense<0.000000e+00> : vector<8xf32>
    %95 = vector.multi_reduction <add>, %94, %cst_37 [1] : vector<8x32xf32> to vector<8xf32>
    %96 = vector.shape_cast %95 : vector<8xf32> to vector<8x1xf32>
    %cst_38 = arith.constant 3.200000e+01 : f32
    %97 = vector.broadcast %cst_38 : f32 to vector<8x1xf32>
    %98 = arith.divf %96, %97 : vector<8x1xf32>
    %99 = vector.broadcast %98 : vector<8x1xf32> to vector<8x32xf32>
    %100 = arith.subf %94, %99 : vector<8x32xf32>
    %101 = arith.mulf %100, %100 : vector<8x32xf32>
    %cst_39 = arith.constant dense<0.000000e+00> : vector<8xf32>
    %102 = vector.multi_reduction <add>, %101, %cst_39 [1] : vector<8x32xf32> to vector<8xf32>
    %103 = vector.shape_cast %102 : vector<8xf32> to vector<8x1xf32>
    %cst_40 = arith.constant 3.200000e+01 : f32
    %104 = vector.broadcast %cst_40 : f32 to vector<8x1xf32>
    %105 = arith.divf %103, %104 : vector<8x1xf32>
    %106 = vector.broadcast %98 : vector<8x1xf32> to vector<8x32xf32>
    %107 = arith.subf %94, %106 : vector<8x32xf32>
    %cst_41 = arith.constant 9.99999996E-13 : f32
    %108 = vector.broadcast %cst_41 : f32 to vector<8x1xf32>
    %109 = arith.addf %105, %108 : vector<8x1xf32>
    %110 = math.rsqrt %109 : vector<8x1xf32>
    %111 = vector.broadcast %110 : vector<8x1xf32> to vector<8x32xf32>
    %112 = arith.mulf %107, %111 : vector<8x32xf32>
    %113 = vector.broadcast %5 : vector<1x32xf32> to vector<8x32xf32>
    %114 = arith.mulf %112, %113 : vector<8x32xf32>
    %115 = vector.broadcast %7 : vector<1x32xf32> to vector<8x32xf32>
    %116 = arith.addf %114, %115 : vector<8x32xf32>
    %c16 = arith.constant 16 : index
    %c0_42 = arith.constant 0 : index
    %117 = vector.load %arg10[%c16, %c0_42] : memref<32x32xf32, #tpu.memory_space<vmem>>, vector<8x32xf32>
    tpu.vector_store %arg10[%c16, %c0_42], %116 {strides = array<i32>} : memref<32x32xf32, #tpu.memory_space<vmem>>, vector<8x32xf32>,
    %c1_43 = arith.constant 1 : index
    %c0_44 = arith.constant 0 : index
    %c0_45 = arith.constant 0 : index
    %118 = vector.load %arg3[%c1_43, %c0_44, %c0_45] : memref<2x8x16xf32, #tpu.memory_space<vmem>>, vector<1x8x16xf32>
    %119 = vector.shape_cast %118 : vector<1x8x16xf32> to vector<8x16xf32>
    %cst_46 = arith.constant dense<0.000000e+00> : vector<8x32xf32>
    %120 = tpu.matmul %119, %9, %cst_46 {dimension_numbers = #tpu.dot_dimension_numbers<[1], [0], [0], [1], [0, 0, 1, 1], [], []>} : vector<8x16xf32>, vector<16x32xf32>, vector<8x32xf32> -> vector<8x32xf32>
    %121 = vector.broadcast %13 : vector<1x32xf32> to vector<8x32xf32>
    %122 = arith.addf %120, %121 : vector<8x32xf32>
    %c1_47 = arith.constant 1 : index
    %c0_48 = arith.constant 0 : index
    %c0_49 = arith.constant 0 : index
    %123 = vector.load %arg5[%c1_47, %c0_48, %c0_49] : memref<2x8x4xf32, #tpu.memory_space<vmem>>, vector<1x8x4xf32>
    %124 = vector.shape_cast %123 : vector<1x8x4xf32> to vector<8x4xf32>
    %cst_50 = arith.constant dense<0.000000e+00> : vector<8x32xf32>
    %125 = tpu.matmul %124, %11, %cst_50 {dimension_numbers = #tpu.dot_dimension_numbers<[1], [0], [0], [1], [0, 0, 1, 1], [], []>} : vector<8x4xf32>, vector<4x32xf32>, vector<8x32xf32> -> vector<8x32xf32>
    %126 = arith.addf %122, %125 : vector<8x32xf32>
    %127 = vector.broadcast %15 : vector<1x32xf32> to vector<8x32xf32>
    %128 = arith.addf %126, %127 : vector<8x32xf32>
    %cst_51 = arith.constant dense<0.000000e+00> : vector<8xf32>
    %129 = vector.multi_reduction <add>, %128, %cst_51 [1] : vector<8x32xf32> to vector<8xf32>
    %130 = vector.shape_cast %129 : vector<8xf32> to vector<8x1xf32>
    %cst_52 = arith.constant 3.200000e+01 : f32
    %131 = vector.broadcast %cst_52 : f32 to vector<8x1xf32>
    %132 = arith.divf %130, %131 : vector<8x1xf32>
    %133 = vector.broadcast %132 : vector<8x1xf32> to vector<8x32xf32>
    %134 = arith.subf %128, %133 : vector<8x32xf32>
    %135 = arith.mulf %134, %134 : vector<8x32xf32>
    %cst_53 = arith.constant dense<0.000000e+00> : vector<8xf32>
    %136 = vector.multi_reduction <add>, %135, %cst_53 [1] : vector<8x32xf32> to vector<8xf32>
    %137 = vector.shape_cast %136 : vector<8xf32> to vector<8x1xf32>
    %cst_54 = arith.constant 3.200000e+01 : f32
    %138 = vector.broadcast %cst_54 : f32 to vector<8x1xf32>
    %139 = arith.divf %137, %138 : vector<8x1xf32>
    %140 = vector.broadcast %132 : vector<8x1xf32> to vector<8x32xf32>
    %141 = arith.subf %128, %140 : vector<8x32xf32>
    %cst_55 = arith.constant 9.99999996E-13 : f32
    %142 = vector.broadcast %cst_55 : f32 to vector<8x1xf32>
    %143 = arith.addf %139, %142 : vector<8x1xf32>
    %144 = math.rsqrt %143 : vector<8x1xf32>
    %145 = vector.broadcast %144 : vector<8x1xf32> to vector<8x32xf32>
    %146 = arith.mulf %141, %145 : vector<8x32xf32>
    %147 = vector.broadcast %17 : vector<1x32xf32> to vector<8x32xf32>
    %148 = arith.mulf %146, %147 : vector<8x32xf32>
    %149 = vector.broadcast %19 : vector<1x32xf32> to vector<8x32xf32>
    %150 = arith.addf %148, %149 : vector<8x32xf32>
    %c24 = arith.constant 24 : index
    %c0_56 = arith.constant 0 : index
    %151 = vector.load %arg10[%c24, %c0_56] : memref<32x32xf32, #tpu.memory_space<vmem>>, vector<8x32xf32>
    tpu.vector_store %arg10[%c24, %c0_56], %150 {strides = array<i32>} : memref<32x32xf32, #tpu.memory_space<vmem>>, vector<8x32xf32>,
    %c0_57 = arith.constant 0 : index
    %c0_58 = arith.constant 0 : index
    %152 = vector.load %arg10[%c0_57, %c0_58] : memref<32x32xf32, #tpu.memory_space<vmem>>, vector<32x32xf32>
    %c0_59 = arith.constant 0 : index
    %c0_60 = arith.constant 0 : index
    %153 = vector.load %arg2[%c0_59, %c0_60] : memref<2x8xf32, #tpu.memory_space<vmem>>, vector<2x8xf32>
    %c0_61 = arith.constant 0 : index
    %c0_62 = arith.constant 0 : index
    %154 = vector.load %arg4[%c0_61, %c0_62] : memref<2x8xf32, #tpu.memory_space<vmem>>, vector<2x8xf32>
    %155 = tpu.concatenate %153, %154 in 1 : vector<2x8xf32>, vector<2x8xf32> -> vector<2x16xf32>
    %cst_63 = arith.constant 1.000000e+00 : f32
    %156 = vector.broadcast %cst_63 : f32 to vector<2x16xf32>
    %157 = arith.subf %156, %155 : vector<2x16xf32>
    %cst_64 = arith.constant -1.000000e+04 : f32
    %158 = vector.broadcast %cst_64 : f32 to vector<2x16xf32>
    %159 = arith.mulf %157, %158 : vector<2x16xf32>
    %160 = tpu.iota {dimensions = array<i32: 1>} : vector<1x32xi32>
    %c0_i32 = arith.constant 0 : i32
    %161 = vector.broadcast %c0_i32 : i32 to vector<1x32xi32>
    %162 = arith.cmpi sge, %160, %161 : vector<1x32xi32>
    %c8_i32 = arith.constant 8 : i32
    %163 = vector.broadcast %c8_i32 : i32 to vector<1x32xi32>
    %164 = arith.cmpi slt, %160, %163 : vector<1x32xi32>
    %165 = arith.andi %162, %164 : vector<1x32xi1>
    %166 = arith.extui %165 : vector<1x32xi1> to vector<1x32xi32>
    %167 = arith.sitofp %166 : vector<1x32xi32> to vector<1x32xf32>
    %c8_i32_65 = arith.constant 8 : i32
    %168 = vector.broadcast %c8_i32_65 : i32 to vector<1x32xi32>
    %169 = arith.cmpi sge, %160, %168 : vector<1x32xi32>
    %c16_i32 = arith.constant 16 : i32
    %170 = vector.broadcast %c16_i32 : i32 to vector<1x32xi32>
    %171 = arith.cmpi slt, %160, %170 : vector<1x32xi32>
    %172 = arith.andi %169, %171 : vector<1x32xi1>
    %173 = arith.extui %172 : vector<1x32xi1> to vector<1x32xi32>
    %174 = arith.sitofp %173 : vector<1x32xi32> to vector<1x32xf32>
    %c16_i32_66 = arith.constant 16 : i32
    %175 = vector.broadcast %c16_i32_66 : i32 to vector<1x32xi32>
    %176 = arith.cmpi sge, %160, %175 : vector<1x32xi32>
    %c24_i32 = arith.constant 24 : i32
    %177 = vector.broadcast %c24_i32 : i32 to vector<1x32xi32>
    %178 = arith.cmpi slt, %160, %177 : vector<1x32xi32>
    %179 = arith.andi %176, %178 : vector<1x32xi1>
    %180 = arith.extui %179 : vector<1x32xi1> to vector<1x32xi32>
    %181 = arith.sitofp %180 : vector<1x32xi32> to vector<1x32xf32>
    %c24_i32_67 = arith.constant 24 : i32
    %182 = vector.broadcast %c24_i32_67 : i32 to vector<1x32xi32>
    %183 = arith.cmpi sge, %160, %182 : vector<1x32xi32>
    %c32_i32 = arith.constant 32 : i32
    %184 = vector.broadcast %c32_i32 : i32 to vector<1x32xi32>
    %185 = arith.cmpi slt, %160, %184 : vector<1x32xi32>
    %186 = arith.andi %183, %185 : vector<1x32xi1>
    %187 = arith.extui %186 : vector<1x32xi1> to vector<1x32xi32>
    %188 = arith.sitofp %187 : vector<1x32xi32> to vector<1x32xf32>
    %c288 = arith.constant 288 : index
    %c0_68 = arith.constant 0 : index
    %189 = vector.load %arg0[%c288, %c0_68] : memref<768x128xf32, #tpu.memory_space<vmem>>, vector<32x128xf32>
    %190 = vector.extract_strided_slice %189 {offsets = [0, 0], sizes = [32, 32], strides = [1, 1]} : vector<32x128xf32> to vector<32x32xf32>
    %c320 = arith.constant 320 : index
    %c0_69 = arith.constant 0 : index
    %191 = vector.load %arg0[%c320, %c0_69] : memref<768x128xf32, #tpu.memory_space<vmem>>, vector<32x128xf32>
    %192 = vector.extract_strided_slice %191 {offsets = [0, 0], sizes = [32, 32], strides = [1, 1]} : vector<32x128xf32> to vector<32x32xf32>
    %c352 = arith.constant 352 : index
    %c0_70 = arith.constant 0 : index
    %193 = vector.load %arg0[%c352, %c0_70] : memref<768x128xf32, #tpu.memory_space<vmem>>, vector<32x128xf32>
    %194 = vector.extract_strided_slice %193 {offsets = [0, 0], sizes = [32, 32], strides = [1, 1]} : vector<32x128xf32> to vector<32x32xf32>
    %c384 = arith.constant 384 : index
    %c0_71 = arith.constant 0 : index
    %195 = vector.load %arg0[%c384, %c0_71] : memref<768x128xf32, #tpu.memory_space<vmem>>, vector<32x128xf32>
    %196 = vector.extract_strided_slice %195 {offsets = [0, 0], sizes = [32, 32], strides = [1, 1]} : vector<32x128xf32> to vector<32x32xf32>
    %c416 = arith.constant 416 : index
    %c0_72 = arith.constant 0 : index
    %197 = vector.load %arg0[%c416, %c0_72] : memref<768x128xf32, #tpu.memory_space<vmem>>, vector<32x128xf32>
    %198 = vector.extract_strided_slice %197 {offsets = [0, 0], sizes = [32, 64], strides = [1, 1]} : vector<32x128xf32> to vector<32x64xf32>
    %c448 = arith.constant 448 : index
    %c0_73 = arith.constant 0 : index
    %199 = vector.load %arg0[%c448, %c0_73] : memref<768x128xf32, #tpu.memory_space<vmem>>, vector<64x128xf32>
    %200 = vector.extract_strided_slice %199 {offsets = [0, 0], sizes = [64, 32], strides = [1, 1]} : vector<64x128xf32> to vector<64x32xf32>
    %c512 = arith.constant 512 : index
    %c0_74 = arith.constant 0 : index
    %201 = vector.load %arg0[%c512, %c0_74] : memref<768x128xf32, #tpu.memory_space<vmem>>, vector<1x128xf32>
    %202 = vector.extract_strided_slice %201 {offsets = [0, 0], sizes = [1, 32], strides = [1, 1]} : vector<1x128xf32> to vector<1x32xf32>
    %c513 = arith.constant 513 : index
    %c0_75 = arith.constant 0 : index
    %203 = vector.load %arg0[%c513, %c0_75] : memref<768x128xf32, #tpu.memory_space<vmem>>, vector<1x128xf32>
    %204 = vector.extract_strided_slice %203 {offsets = [0, 0], sizes = [1, 32], strides = [1, 1]} : vector<1x128xf32> to vector<1x32xf32>
    %c514 = arith.constant 514 : index
    %c0_76 = arith.constant 0 : index
    %205 = vector.load %arg0[%c514, %c0_76] : memref<768x128xf32, #tpu.memory_space<vmem>>, vector<1x128xf32>
    %206 = vector.extract_strided_slice %205 {offsets = [0, 0], sizes = [1, 32], strides = [1, 1]} : vector<1x128xf32> to vector<1x32xf32>
    %c515 = arith.constant 515 : index
    %c0_77 = arith.constant 0 : index
    %207 = vector.load %arg0[%c515, %c0_77] : memref<768x128xf32, #tpu.memory_space<vmem>>, vector<1x128xf32>
    %208 = vector.extract_strided_slice %207 {offsets = [0, 0], sizes = [1, 32], strides = [1, 1]} : vector<1x128xf32> to vector<1x32xf32>
    %c516 = arith.constant 516 : index
    %c0_78 = arith.constant 0 : index
    %209 = vector.load %arg0[%c516, %c0_78] : memref<768x128xf32, #tpu.memory_space<vmem>>, vector<1x128xf32>
    %210 = vector.extract_strided_slice %209 {offsets = [0, 0], sizes = [1, 32], strides = [1, 1]} : vector<1x128xf32> to vector<1x32xf32>
    %c517 = arith.constant 517 : index
    %c0_79 = arith.constant 0 : index
    %211 = vector.load %arg0[%c517, %c0_79] : memref<768x128xf32, #tpu.memory_space<vmem>>, vector<1x128xf32>
    %212 = vector.extract_strided_slice %211 {offsets = [0, 0], sizes = [1, 32], strides = [1, 1]} : vector<1x128xf32> to vector<1x32xf32>
    %c518 = arith.constant 518 : index
    %c0_80 = arith.constant 0 : index
    %213 = vector.load %arg0[%c518, %c0_80] : memref<768x128xf32, #tpu.memory_space<vmem>>, vector<1x128xf32>
    %214 = vector.extract_strided_slice %213 {offsets = [0, 0], sizes = [1, 64], strides = [1, 1]} : vector<1x128xf32> to vector<1x64xf32>
    %c519 = arith.constant 519 : index
    %c0_81 = arith.constant 0 : index
    %215 = vector.load %arg0[%c519, %c0_81] : memref<768x128xf32, #tpu.memory_space<vmem>>, vector<1x128xf32>
    %216 = vector.extract_strided_slice %215 {offsets = [0, 0], sizes = [1, 32], strides = [1, 1]} : vector<1x128xf32> to vector<1x32xf32>
    %c520 = arith.constant 520 : index
    %c0_82 = arith.constant 0 : index
    %217 = vector.load %arg0[%c520, %c0_82] : memref<768x128xf32, #tpu.memory_space<vmem>>, vector<1x128xf32>
    %218 = vector.extract_strided_slice %217 {offsets = [0, 0], sizes = [1, 32], strides = [1, 1]} : vector<1x128xf32> to vector<1x32xf32>
    %c521 = arith.constant 521 : index
    %c0_83 = arith.constant 0 : index
    %219 = vector.load %arg0[%c521, %c0_83] : memref<768x128xf32, #tpu.memory_space<vmem>>, vector<1x128xf32>
    %220 = vector.extract_strided_slice %219 {offsets = [0, 0], sizes = [1, 32], strides = [1, 1]} : vector<1x128xf32> to vector<1x32xf32>
    %cst_84 = arith.constant dense<0.000000e+00> : vector<32x32xf32>
    %221 = tpu.matmul %152, %190, %cst_84 {dimension_numbers = #tpu.dot_dimension_numbers<[1], [0], [0], [1], [0, 0, 1, 1], [], []>} : vector<32x32xf32>, vector<32x32xf32>, vector<32x32xf32> -> vector<32x32xf32>
    %222 = vector.broadcast %202 : vector<1x32xf32> to vector<32x32xf32>
    %223 = arith.addf %221, %222 : vector<32x32xf32>
    %cst_85 = arith.constant dense<0.000000e+00> : vector<32x32xf32>
    %224 = tpu.matmul %152, %192, %cst_85 {dimension_numbers = #tpu.dot_dimension_numbers<[1], [0], [0], [1], [0, 0, 1, 1], [], []>} : vector<32x32xf32>, vector<32x32xf32>, vector<32x32xf32> -> vector<32x32xf32>
    %225 = vector.broadcast %204 : vector<1x32xf32> to vector<32x32xf32>
    %226 = arith.addf %224, %225 : vector<32x32xf32>
    %cst_86 = arith.constant dense<0.000000e+00> : vector<32x32xf32>
    %227 = tpu.matmul %152, %194, %cst_86 {dimension_numbers = #tpu.dot_dimension_numbers<[1], [0], [0], [1], [0, 0, 1, 1], [], []>} : vector<32x32xf32>, vector<32x32xf32>, vector<32x32xf32> -> vector<32x32xf32>
    %228 = vector.broadcast %206 : vector<1x32xf32> to vector<32x32xf32>
    %229 = arith.addf %227, %228 : vector<32x32xf32>
    %230 = vector.extract_strided_slice %223 {offsets = [0, 0], sizes = [16, 32], strides = [1, 1]} : vector<32x32xf32> to vector<16x32xf32>
    %231 = vector.extract_strided_slice %226 {offsets = [0, 0], sizes = [16, 32], strides = [1, 1]} : vector<32x32xf32> to vector<16x32xf32>
    %232 = vector.extract_strided_slice %229 {offsets = [0, 0], sizes = [16, 32], strides = [1, 1]} : vector<32x32xf32> to vector<16x32xf32>
    %233 = vector.extract_strided_slice %159 {offsets = [0, 0], sizes = [1, 16], strides = [1, 1]} : vector<2x16xf32> to vector<1x16xf32>
    %234 = vector.broadcast %167 : vector<1x32xf32> to vector<16x32xf32>
    %235 = arith.mulf %230, %234 : vector<16x32xf32>
    %cst_87 = arith.constant dense<0.000000e+00> : vector<16x16xf32>
    %236 = tpu.matmul %235, %231, %cst_87 {dimension_numbers = #tpu.dot_dimension_numbers<[1], [1], [0], [0], [0, 0, 1, 0], [], []>} : vector<16x32xf32>, vector<16x32xf32>, vector<16x16xf32> -> vector<16x16xf32>
    %237 = vector.broadcast %233 : vector<1x16xf32> to vector<16x16xf32>
    %238 = arith.addf %236, %237 : vector<16x16xf32>
    %cst_88 = arith.constant dense<0xFF800000> : vector<16xf32>
    %239 = vector.multi_reduction <maximumf>, %238, %cst_88 [1] : vector<16x16xf32> to vector<16xf32>
    %240 = vector.shape_cast %239 : vector<16xf32> to vector<16x1xf32>
    %241 = vector.broadcast %240 : vector<16x1xf32> to vector<16x16xf32>
    %242 = arith.subf %238, %241 : vector<16x16xf32>
    %243 = math.exp %242 : vector<16x16xf32>
    %cst_89 = arith.constant dense<0.000000e+00> : vector<16xf32>
    %244 = vector.multi_reduction <add>, %243, %cst_89 [1] : vector<16x16xf32> to vector<16xf32>
    %245 = vector.shape_cast %244 : vector<16xf32> to vector<16x1xf32>
    %246 = vector.broadcast %245 : vector<16x1xf32> to vector<16x16xf32>
    %247 = arith.divf %243, %246 : vector<16x16xf32>
    %248 = vector.broadcast %167 : vector<1x32xf32> to vector<16x32xf32>
    %249 = arith.mulf %232, %248 : vector<16x32xf32>
    %cst_90 = arith.constant dense<0.000000e+00> : vector<16x32xf32>
    %250 = tpu.matmul %247, %249, %cst_90 {dimension_numbers = #tpu.dot_dimension_numbers<[1], [0], [0], [1], [0, 0, 1, 1], [], []>} : vector<16x16xf32>, vector<16x32xf32>, vector<16x32xf32> -> vector<16x32xf32>
    %251 = vector.broadcast %174 : vector<1x32xf32> to vector<16x32xf32>
    %252 = arith.mulf %230, %251 : vector<16x32xf32>
    %cst_91 = arith.constant dense<0.000000e+00> : vector<16x16xf32>
    %253 = tpu.matmul %252, %231, %cst_91 {dimension_numbers = #tpu.dot_dimension_numbers<[1], [1], [0], [0], [0, 0, 1, 0], [], []>} : vector<16x32xf32>, vector<16x32xf32>, vector<16x16xf32> -> vector<16x16xf32>
    %254 = vector.broadcast %233 : vector<1x16xf32> to vector<16x16xf32>
    %255 = arith.addf %253, %254 : vector<16x16xf32>
    %cst_92 = arith.constant dense<0xFF800000> : vector<16xf32>
    %256 = vector.multi_reduction <maximumf>, %255, %cst_92 [1] : vector<16x16xf32> to vector<16xf32>
    %257 = vector.shape_cast %256 : vector<16xf32> to vector<16x1xf32>
    %258 = vector.broadcast %257 : vector<16x1xf32> to vector<16x16xf32>
    %259 = arith.subf %255, %258 : vector<16x16xf32>
    %260 = math.exp %259 : vector<16x16xf32>
    %cst_93 = arith.constant dense<0.000000e+00> : vector<16xf32>
    %261 = vector.multi_reduction <add>, %260, %cst_93 [1] : vector<16x16xf32> to vector<16xf32>
    %262 = vector.shape_cast %261 : vector<16xf32> to vector<16x1xf32>
    %263 = vector.broadcast %262 : vector<16x1xf32> to vector<16x16xf32>
    %264 = arith.divf %260, %263 : vector<16x16xf32>
    %265 = vector.broadcast %174 : vector<1x32xf32> to vector<16x32xf32>
    %266 = arith.mulf %232, %265 : vector<16x32xf32>
    %cst_94 = arith.constant dense<0.000000e+00> : vector<16x32xf32>
    %267 = tpu.matmul %264, %266, %cst_94 {dimension_numbers = #tpu.dot_dimension_numbers<[1], [0], [0], [1], [0, 0, 1, 1], [], []>} : vector<16x16xf32>, vector<16x32xf32>, vector<16x32xf32> -> vector<16x32xf32>
    %268 = vector.broadcast %181 : vector<1x32xf32> to vector<16x32xf32>
    %269 = arith.mulf %230, %268 : vector<16x32xf32>
    %cst_95 = arith.constant dense<0.000000e+00> : vector<16x16xf32>
    %270 = tpu.matmul %269, %231, %cst_95 {dimension_numbers = #tpu.dot_dimension_numbers<[1], [1], [0], [0], [0, 0, 1, 0], [], []>} : vector<16x32xf32>, vector<16x32xf32>, vector<16x16xf32> -> vector<16x16xf32>
    %271 = vector.broadcast %233 : vector<1x16xf32> to vector<16x16xf32>
    %272 = arith.addf %270, %271 : vector<16x16xf32>
    %cst_96 = arith.constant dense<0xFF800000> : vector<16xf32>
    %273 = vector.multi_reduction <maximumf>, %272, %cst_96 [1] : vector<16x16xf32> to vector<16xf32>
    %274 = vector.shape_cast %273 : vector<16xf32> to vector<16x1xf32>
    %275 = vector.broadcast %274 : vector<16x1xf32> to vector<16x16xf32>
    %276 = arith.subf %272, %275 : vector<16x16xf32>
    %277 = math.exp %276 : vector<16x16xf32>
    %cst_97 = arith.constant dense<0.000000e+00> : vector<16xf32>
    %278 = vector.multi_reduction <add>, %277, %cst_97 [1] : vector<16x16xf32> to vector<16xf32>
    %279 = vector.shape_cast %278 : vector<16xf32> to vector<16x1xf32>
    %280 = vector.broadcast %279 : vector<16x1xf32> to vector<16x16xf32>
    %281 = arith.divf %277, %280 : vector<16x16xf32>
    %282 = vector.broadcast %181 : vector<1x32xf32> to vector<16x32xf32>
    %283 = arith.mulf %232, %282 : vector<16x32xf32>
    %cst_98 = arith.constant dense<0.000000e+00> : vector<16x32xf32>
    %284 = tpu.matmul %281, %283, %cst_98 {dimension_numbers = #tpu.dot_dimension_numbers<[1], [0], [0], [1], [0, 0, 1, 1], [], []>} : vector<16x16xf32>, vector<16x32xf32>, vector<16x32xf32> -> vector<16x32xf32>
    %285 = vector.broadcast %188 : vector<1x32xf32> to vector<16x32xf32>
    %286 = arith.mulf %230, %285 : vector<16x32xf32>
    %cst_99 = arith.constant dense<0.000000e+00> : vector<16x16xf32>
    %287 = tpu.matmul %286, %231, %cst_99 {dimension_numbers = #tpu.dot_dimension_numbers<[1], [1], [0], [0], [0, 0, 1, 0], [], []>} : vector<16x32xf32>, vector<16x32xf32>, vector<16x16xf32> -> vector<16x16xf32>
    %288 = vector.broadcast %233 : vector<1x16xf32> to vector<16x16xf32>
    %289 = arith.addf %287, %288 : vector<16x16xf32>
    %cst_100 = arith.constant dense<0xFF800000> : vector<16xf32>
    %290 = vector.multi_reduction <maximumf>, %289, %cst_100 [1] : vector<16x16xf32> to vector<16xf32>
    %291 = vector.shape_cast %290 : vector<16xf32> to vector<16x1xf32>
    %292 = vector.broadcast %291 : vector<16x1xf32> to vector<16x16xf32>
    %293 = arith.subf %289, %292 : vector<16x16xf32>
    %294 = math.exp %293 : vector<16x16xf32>
    %cst_101 = arith.constant dense<0.000000e+00> : vector<16xf32>
    %295 = vector.multi_reduction <add>, %294, %cst_101 [1] : vector<16x16xf32> to vector<16xf32>
    %296 = vector.shape_cast %295 : vector<16xf32> to vector<16x1xf32>
    %297 = vector.broadcast %296 : vector<16x1xf32> to vector<16x16xf32>
    %298 = arith.divf %294, %297 : vector<16x16xf32>
    %299 = vector.broadcast %188 : vector<1x32xf32> to vector<16x32xf32>
    %300 = arith.mulf %232, %299 : vector<16x32xf32>
    %cst_102 = arith.constant dense<0.000000e+00> : vector<16x32xf32>
    %301 = tpu.matmul %298, %300, %cst_102 {dimension_numbers = #tpu.dot_dimension_numbers<[1], [0], [0], [1], [0, 0, 1, 1], [], []>} : vector<16x16xf32>, vector<16x32xf32>, vector<16x32xf32> -> vector<16x32xf32>
    %302 = arith.addf %250, %267 : vector<16x32xf32>
    %303 = arith.addf %284, %301 : vector<16x32xf32>
    %304 = arith.addf %302, %303 : vector<16x32xf32>
    %305 = vector.extract_strided_slice %223 {offsets = [16, 0], sizes = [16, 32], strides = [1, 1]} : vector<32x32xf32> to vector<16x32xf32>
    %306 = vector.extract_strided_slice %226 {offsets = [16, 0], sizes = [16, 32], strides = [1, 1]} : vector<32x32xf32> to vector<16x32xf32>
    %307 = vector.extract_strided_slice %229 {offsets = [16, 0], sizes = [16, 32], strides = [1, 1]} : vector<32x32xf32> to vector<16x32xf32>
    %308 = vector.extract_strided_slice %159 {offsets = [1, 0], sizes = [1, 16], strides = [1, 1]} : vector<2x16xf32> to vector<1x16xf32>
    %309 = vector.broadcast %167 : vector<1x32xf32> to vector<16x32xf32>
    %310 = arith.mulf %305, %309 : vector<16x32xf32>
    %cst_103 = arith.constant dense<0.000000e+00> : vector<16x16xf32>
    %311 = tpu.matmul %310, %306, %cst_103 {dimension_numbers = #tpu.dot_dimension_numbers<[1], [1], [0], [0], [0, 0, 1, 0], [], []>} : vector<16x32xf32>, vector<16x32xf32>, vector<16x16xf32> -> vector<16x16xf32>
    %312 = vector.broadcast %308 : vector<1x16xf32> to vector<16x16xf32>
    %313 = arith.addf %311, %312 : vector<16x16xf32>
    %cst_104 = arith.constant dense<0xFF800000> : vector<16xf32>
    %314 = vector.multi_reduction <maximumf>, %313, %cst_104 [1] : vector<16x16xf32> to vector<16xf32>
    %315 = vector.shape_cast %314 : vector<16xf32> to vector<16x1xf32>
    %316 = vector.broadcast %315 : vector<16x1xf32> to vector<16x16xf32>
    %317 = arith.subf %313, %316 : vector<16x16xf32>
    %318 = math.exp %317 : vector<16x16xf32>
    %cst_105 = arith.constant dense<0.000000e+00> : vector<16xf32>
    %319 = vector.multi_reduction <add>, %318, %cst_105 [1] : vector<16x16xf32> to vector<16xf32>
    %320 = vector.shape_cast %319 : vector<16xf32> to vector<16x1xf32>
    %321 = vector.broadcast %320 : vector<16x1xf32> to vector<16x16xf32>
    %322 = arith.divf %318, %321 : vector<16x16xf32>
    %323 = vector.broadcast %167 : vector<1x32xf32> to vector<16x32xf32>
    %324 = arith.mulf %307, %323 : vector<16x32xf32>
    %cst_106 = arith.constant dense<0.000000e+00> : vector<16x32xf32>
    %325 = tpu.matmul %322, %324, %cst_106 {dimension_numbers = #tpu.dot_dimension_numbers<[1], [0], [0], [1], [0, 0, 1, 1], [], []>} : vector<16x16xf32>, vector<16x32xf32>, vector<16x32xf32> -> vector<16x32xf32>
    %326 = vector.broadcast %174 : vector<1x32xf32> to vector<16x32xf32>
    %327 = arith.mulf %305, %326 : vector<16x32xf32>
    %cst_107 = arith.constant dense<0.000000e+00> : vector<16x16xf32>
    %328 = tpu.matmul %327, %306, %cst_107 {dimension_numbers = #tpu.dot_dimension_numbers<[1], [1], [0], [0], [0, 0, 1, 0], [], []>} : vector<16x32xf32>, vector<16x32xf32>, vector<16x16xf32> -> vector<16x16xf32>
    %329 = vector.broadcast %308 : vector<1x16xf32> to vector<16x16xf32>
    %330 = arith.addf %328, %329 : vector<16x16xf32>
    %cst_108 = arith.constant dense<0xFF800000> : vector<16xf32>
    %331 = vector.multi_reduction <maximumf>, %330, %cst_108 [1] : vector<16x16xf32> to vector<16xf32>
    %332 = vector.shape_cast %331 : vector<16xf32> to vector<16x1xf32>
    %333 = vector.broadcast %332 : vector<16x1xf32> to vector<16x16xf32>
    %334 = arith.subf %330, %333 : vector<16x16xf32>
    %335 = math.exp %334 : vector<16x16xf32>
    %cst_109 = arith.constant dense<0.000000e+00> : vector<16xf32>
    %336 = vector.multi_reduction <add>, %335, %cst_109 [1] : vector<16x16xf32> to vector<16xf32>
    %337 = vector.shape_cast %336 : vector<16xf32> to vector<16x1xf32>
    %338 = vector.broadcast %337 : vector<16x1xf32> to vector<16x16xf32>
    %339 = arith.divf %335, %338 : vector<16x16xf32>
    %340 = vector.broadcast %174 : vector<1x32xf32> to vector<16x32xf32>
    %341 = arith.mulf %307, %340 : vector<16x32xf32>
    %cst_110 = arith.constant dense<0.000000e+00> : vector<16x32xf32>
    %342 = tpu.matmul %339, %341, %cst_110 {dimension_numbers = #tpu.dot_dimension_numbers<[1], [0], [0], [1], [0, 0, 1, 1], [], []>} : vector<16x16xf32>, vector<16x32xf32>, vector<16x32xf32> -> vector<16x32xf32>
    %343 = vector.broadcast %181 : vector<1x32xf32> to vector<16x32xf32>
    %344 = arith.mulf %305, %343 : vector<16x32xf32>
    %cst_111 = arith.constant dense<0.000000e+00> : vector<16x16xf32>
    %345 = tpu.matmul %344, %306, %cst_111 {dimension_numbers = #tpu.dot_dimension_numbers<[1], [1], [0], [0], [0, 0, 1, 0], [], []>} : vector<16x32xf32>, vector<16x32xf32>, vector<16x16xf32> -> vector<16x16xf32>
    %346 = vector.broadcast %308 : vector<1x16xf32> to vector<16x16xf32>
    %347 = arith.addf %345, %346 : vector<16x16xf32>
    %cst_112 = arith.constant dense<0xFF800000> : vector<16xf32>
    %348 = vector.multi_reduction <maximumf>, %347, %cst_112 [1] : vector<16x16xf32> to vector<16xf32>
    %349 = vector.shape_cast %348 : vector<16xf32> to vector<16x1xf32>
    %350 = vector.broadcast %349 : vector<16x1xf32> to vector<16x16xf32>
    %351 = arith.subf %347, %350 : vector<16x16xf32>
    %352 = math.exp %351 : vector<16x16xf32>
    %cst_113 = arith.constant dense<0.000000e+00> : vector<16xf32>
    %353 = vector.multi_reduction <add>, %352, %cst_113 [1] : vector<16x16xf32> to vector<16xf32>
    %354 = vector.shape_cast %353 : vector<16xf32> to vector<16x1xf32>
    %355 = vector.broadcast %354 : vector<16x1xf32> to vector<16x16xf32>
    %356 = arith.divf %352, %355 : vector<16x16xf32>
    %357 = vector.broadcast %181 : vector<1x32xf32> to vector<16x32xf32>
    %358 = arith.mulf %307, %357 : vector<16x32xf32>
    %cst_114 = arith.constant dense<0.000000e+00> : vector<16x32xf32>
    %359 = tpu.matmul %356, %358, %cst_114 {dimension_numbers = #tpu.dot_dimension_numbers<[1], [0], [0], [1], [0, 0, 1, 1], [], []>} : vector<16x16xf32>, vector<16x32xf32>, vector<16x32xf32> -> vector<16x32xf32>
    %360 = vector.broadcast %188 : vector<1x32xf32> to vector<16x32xf32>
    %361 = arith.mulf %305, %360 : vector<16x32xf32>
    %cst_115 = arith.constant dense<0.000000e+00> : vector<16x16xf32>
    %362 = tpu.matmul %361, %306, %cst_115 {dimension_numbers = #tpu.dot_dimension_numbers<[1], [1], [0], [0], [0, 0, 1, 0], [], []>} : vector<16x32xf32>, vector<16x32xf32>, vector<16x16xf32> -> vector<16x16xf32>
    %363 = vector.broadcast %308 : vector<1x16xf32> to vector<16x16xf32>
    %364 = arith.addf %362, %363 : vector<16x16xf32>
    %cst_116 = arith.constant dense<0xFF800000> : vector<16xf32>
    %365 = vector.multi_reduction <maximumf>, %364, %cst_116 [1] : vector<16x16xf32> to vector<16xf32>
    %366 = vector.shape_cast %365 : vector<16xf32> to vector<16x1xf32>
    %367 = vector.broadcast %366 : vector<16x1xf32> to vector<16x16xf32>
    %368 = arith.subf %364, %367 : vector<16x16xf32>
    %369 = math.exp %368 : vector<16x16xf32>
    %cst_117 = arith.constant dense<0.000000e+00> : vector<16xf32>
    %370 = vector.multi_reduction <add>, %369, %cst_117 [1] : vector<16x16xf32> to vector<16xf32>
    %371 = vector.shape_cast %370 : vector<16xf32> to vector<16x1xf32>
    %372 = vector.broadcast %371 : vector<16x1xf32> to vector<16x16xf32>
    %373 = arith.divf %369, %372 : vector<16x16xf32>
    %374 = vector.broadcast %188 : vector<1x32xf32> to vector<16x32xf32>
    %375 = arith.mulf %307, %374 : vector<16x32xf32>
    %cst_118 = arith.constant dense<0.000000e+00> : vector<16x32xf32>
    %376 = tpu.matmul %373, %375, %cst_118 {dimension_numbers = #tpu.dot_dimension_numbers<[1], [0], [0], [1], [0, 0, 1, 1], [], []>} : vector<16x16xf32>, vector<16x32xf32>, vector<16x32xf32> -> vector<16x32xf32>
    %377 = arith.addf %325, %342 : vector<16x32xf32>
    %378 = arith.addf %359, %376 : vector<16x32xf32>
    %379 = arith.addf %377, %378 : vector<16x32xf32>
    %380 = tpu.concatenate %304, %379 in 0 : vector<16x32xf32>, vector<16x32xf32> -> vector<32x32xf32>
    %cst_119 = arith.constant dense<0.000000e+00> : vector<32x32xf32>
    %381 = tpu.matmul %380, %196, %cst_119 {dimension_numbers = #tpu.dot_dimension_numbers<[1], [0], [0], [1], [0, 0, 1, 1], [], []>} : vector<32x32xf32>, vector<32x32xf32>, vector<32x32xf32> -> vector<32x32xf32>
    %382 = vector.broadcast %208 : vector<1x32xf32> to vector<32x32xf32>
    %383 = arith.addf %381, %382 : vector<32x32xf32>
    %384 = arith.addf %383, %152 : vector<32x32xf32>
    %cst_120 = arith.constant dense<0.000000e+00> : vector<32xf32>
    %385 = vector.multi_reduction <add>, %384, %cst_120 [1] : vector<32x32xf32> to vector<32xf32>
    %386 = vector.shape_cast %385 : vector<32xf32> to vector<32x1xf32>
    %cst_121 = arith.constant 3.200000e+01 : f32
    %387 = vector.broadcast %cst_121 : f32 to vector<32x1xf32>
    %388 = arith.divf %386, %387 : vector<32x1xf32>
    %389 = vector.broadcast %388 : vector<32x1xf32> to vector<32x32xf32>
    %390 = arith.subf %384, %389 : vector<32x32xf32>
    %391 = arith.mulf %390, %390 : vector<32x32xf32>
    %cst_122 = arith.constant dense<0.000000e+00> : vector<32xf32>
    %392 = vector.multi_reduction <add>, %391, %cst_122 [1] : vector<32x32xf32> to vector<32xf32>
    %393 = vector.shape_cast %392 : vector<32xf32> to vector<32x1xf32>
    %cst_123 = arith.constant 3.200000e+01 : f32
    %394 = vector.broadcast %cst_123 : f32 to vector<32x1xf32>
    %395 = arith.divf %393, %394 : vector<32x1xf32>
    %396 = vector.broadcast %388 : vector<32x1xf32> to vector<32x32xf32>
    %397 = arith.subf %384, %396 : vector<32x32xf32>
    %cst_124 = arith.constant 9.99999996E-13 : f32
    %398 = vector.broadcast %cst_124 : f32 to vector<32x1xf32>
    %399 = arith.addf %395, %398 : vector<32x1xf32>
    %400 = math.rsqrt %399 : vector<32x1xf32>
    %401 = vector.broadcast %400 : vector<32x1xf32> to vector<32x32xf32>
    %402 = arith.mulf %397, %401 : vector<32x32xf32>
    %403 = vector.broadcast %210 : vector<1x32xf32> to vector<32x32xf32>
    %404 = arith.mulf %402, %403 : vector<32x32xf32>
    %405 = vector.broadcast %212 : vector<1x32xf32> to vector<32x32xf32>
    %406 = arith.addf %404, %405 : vector<32x32xf32>
    %cst_125 = arith.constant dense<0.000000e+00> : vector<32x64xf32>
    %407 = tpu.matmul %406, %198, %cst_125 {dimension_numbers = #tpu.dot_dimension_numbers<[1], [0], [0], [1], [0, 0, 1, 1], [], []>} : vector<32x32xf32>, vector<32x64xf32>, vector<32x64xf32> -> vector<32x64xf32>
    %408 = vector.broadcast %214 : vector<1x64xf32> to vector<32x64xf32>
    %409 = arith.addf %407, %408 : vector<32x64xf32>
    %cst_126 = arith.constant 5.000000e-01 : f32
    %410 = vector.broadcast %cst_126 : f32 to vector<32x64xf32>
    %411 = arith.mulf %410, %409 : vector<32x64xf32>
    %cst_127 = arith.constant 4.471500e-02 : f32
    %412 = vector.broadcast %cst_127 : f32 to vector<32x64xf32>
    %413 = arith.mulf %412, %409 : vector<32x64xf32>
    %414 = arith.mulf %413, %409 : vector<32x64xf32>
    %415 = arith.mulf %414, %409 : vector<32x64xf32>
    %416 = arith.addf %409, %415 : vector<32x64xf32>
    %cst_128 = arith.constant 0.797884583 : f32
    %417 = vector.broadcast %cst_128 : f32 to vector<32x64xf32>
    %418 = arith.mulf %417, %416 : vector<32x64xf32>
    %419 = math.tanh %418 : vector<32x64xf32>
    %cst_129 = arith.constant 1.000000e+00 : f32
    %420 = vector.broadcast %cst_129 : f32 to vector<32x64xf32>
    %421 = arith.addf %420, %419 : vector<32x64xf32>
    %422 = arith.mulf %411, %421 : vector<32x64xf32>
    %cst_130 = arith.constant dense<0.000000e+00> : vector<32x32xf32>
    %423 = tpu.matmul %422, %200, %cst_130 {dimension_numbers = #tpu.dot_dimension_numbers<[1], [0], [0], [1], [0, 0, 1, 1], [], []>} : vector<32x64xf32>, vector<64x32xf32>, vector<32x32xf32> -> vector<32x32xf32>
    %424 = vector.broadcast %216 : vector<1x32xf32> to vector<32x32xf32>
    %425 = arith.addf %423, %424 : vector<32x32xf32>
    %426 = arith.addf %425, %406 : vector<32x32xf32>
    %cst_131 = arith.constant dense<0.000000e+00> : vector<32xf32>
    %427 = vector.multi_reduction <add>, %426, %cst_131 [1] : vector<32x32xf32> to vector<32xf32>
    %428 = vector.shape_cast %427 : vector<32xf32> to vector<32x1xf32>
    %cst_132 = arith.constant 3.200000e+01 : f32
    %429 = vector.broadcast %cst_132 : f32 to vector<32x1xf32>
    %430 = arith.divf %428, %429 : vector<32x1xf32>
    %431 = vector.broadcast %430 : vector<32x1xf32> to vector<32x32xf32>
    %432 = arith.subf %426, %431 : vector<32x32xf32>
    %433 = arith.mulf %432, %432 : vector<32x32xf32>
    %cst_133 = arith.constant dense<0.000000e+00> : vector<32xf32>
    %434 = vector.multi_reduction <add>, %433, %cst_133 [1] : vector<32x32xf32> to vector<32xf32>
    %435 = vector.shape_cast %434 : vector<32xf32> to vector<32x1xf32>
    %cst_134 = arith.constant 3.200000e+01 : f32
    %436 = vector.broadcast %cst_134 : f32 to vector<32x1xf32>
    %437 = arith.divf %435, %436 : vector<32x1xf32>
    %438 = vector.broadcast %430 : vector<32x1xf32> to vector<32x32xf32>
    %439 = arith.subf %426, %438 : vector<32x32xf32>
    %cst_135 = arith.constant 9.99999996E-13 : f32
    %440 = vector.broadcast %cst_135 : f32 to vector<32x1xf32>
    %441 = arith.addf %437, %440 : vector<32x1xf32>
    %442 = math.rsqrt %441 : vector<32x1xf32>
    %443 = vector.broadcast %442 : vector<32x1xf32> to vector<32x32xf32>
    %444 = arith.mulf %439, %443 : vector<32x32xf32>
    %445 = vector.broadcast %218 : vector<1x32xf32> to vector<32x32xf32>
    %446 = arith.mulf %444, %445 : vector<32x32xf32>
    %447 = vector.broadcast %220 : vector<1x32xf32> to vector<32x32xf32>
    %448 = arith.addf %446, %447 : vector<32x32xf32>
    %c528 = arith.constant 528 : index
    %c0_136 = arith.constant 0 : index
    %449 = vector.load %arg0[%c528, %c0_136] : memref<768x128xf32, #tpu.memory_space<vmem>>, vector<32x128xf32>
    %450 = vector.extract_strided_slice %449 {offsets = [0, 0], sizes = [32, 32], strides = [1, 1]} : vector<32x128xf32> to vector<32x32xf32>
    %c560 = arith.constant 560 : index
    %c0_137 = arith.constant 0 : index
    %451 = vector.load %arg0[%c560, %c0_137] : memref<768x128xf32, #tpu.memory_space<vmem>>, vector<32x128xf32>
    %452 = vector.extract_strided_slice %451 {offsets = [0, 0], sizes = [32, 32], strides = [1, 1]} : vector<32x128xf32> to vector<32x32xf32>
    %c592 = arith.constant 592 : index
    %c0_138 = arith.constant 0 : index
    %453 = vector.load %arg0[%c592, %c0_138] : memref<768x128xf32, #tpu.memory_space<vmem>>, vector<32x128xf32>
    %454 = vector.extract_strided_slice %453 {offsets = [0, 0], sizes = [32, 32], strides = [1, 1]} : vector<32x128xf32> to vector<32x32xf32>
    %c624 = arith.constant 624 : index
    %c0_139 = arith.constant 0 : index
    %455 = vector.load %arg0[%c624, %c0_139] : memref<768x128xf32, #tpu.memory_space<vmem>>, vector<32x128xf32>
    %456 = vector.extract_strided_slice %455 {offsets = [0, 0], sizes = [32, 32], strides = [1, 1]} : vector<32x128xf32> to vector<32x32xf32>
    %c656 = arith.constant 656 : index
    %c0_140 = arith.constant 0 : index
    %457 = vector.load %arg0[%c656, %c0_140] : memref<768x128xf32, #tpu.memory_space<vmem>>, vector<32x128xf32>
    %458 = vector.extract_strided_slice %457 {offsets = [0, 0], sizes = [32, 64], strides = [1, 1]} : vector<32x128xf32> to vector<32x64xf32>
    %c688 = arith.constant 688 : index
    %c0_141 = arith.constant 0 : index
    %459 = vector.load %arg0[%c688, %c0_141] : memref<768x128xf32, #tpu.memory_space<vmem>>, vector<64x128xf32>
    %460 = vector.extract_strided_slice %459 {offsets = [0, 0], sizes = [64, 32], strides = [1, 1]} : vector<64x128xf32> to vector<64x32xf32>
    %c752 = arith.constant 752 : index
    %c0_142 = arith.constant 0 : index
    %461 = vector.load %arg0[%c752, %c0_142] : memref<768x128xf32, #tpu.memory_space<vmem>>, vector<1x128xf32>
    %462 = vector.extract_strided_slice %461 {offsets = [0, 0], sizes = [1, 32], strides = [1, 1]} : vector<1x128xf32> to vector<1x32xf32>
    %c753 = arith.constant 753 : index
    %c0_143 = arith.constant 0 : index
    %463 = vector.load %arg0[%c753, %c0_143] : memref<768x128xf32, #tpu.memory_space<vmem>>, vector<1x128xf32>
    %464 = vector.extract_strided_slice %463 {offsets = [0, 0], sizes = [1, 32], strides = [1, 1]} : vector<1x128xf32> to vector<1x32xf32>
    %c754 = arith.constant 754 : index
    %c0_144 = arith.constant 0 : index
    %465 = vector.load %arg0[%c754, %c0_144] : memref<768x128xf32, #tpu.memory_space<vmem>>, vector<1x128xf32>
    %466 = vector.extract_strided_slice %465 {offsets = [0, 0], sizes = [1, 32], strides = [1, 1]} : vector<1x128xf32> to vector<1x32xf32>
    %c755 = arith.constant 755 : index
    %c0_145 = arith.constant 0 : index
    %467 = vector.load %arg0[%c755, %c0_145] : memref<768x128xf32, #tpu.memory_space<vmem>>, vector<1x128xf32>
    %468 = vector.extract_strided_slice %467 {offsets = [0, 0], sizes = [1, 32], strides = [1, 1]} : vector<1x128xf32> to vector<1x32xf32>
    %c756 = arith.constant 756 : index
    %c0_146 = arith.constant 0 : index
    %469 = vector.load %arg0[%c756, %c0_146] : memref<768x128xf32, #tpu.memory_space<vmem>>, vector<1x128xf32>
    %470 = vector.extract_strided_slice %469 {offsets = [0, 0], sizes = [1, 32], strides = [1, 1]} : vector<1x128xf32> to vector<1x32xf32>
    %c757 = arith.constant 757 : index
    %c0_147 = arith.constant 0 : index
    %471 = vector.load %arg0[%c757, %c0_147] : memref<768x128xf32, #tpu.memory_space<vmem>>, vector<1x128xf32>
    %472 = vector.extract_strided_slice %471 {offsets = [0, 0], sizes = [1, 32], strides = [1, 1]} : vector<1x128xf32> to vector<1x32xf32>
    %c758 = arith.constant 758 : index
    %c0_148 = arith.constant 0 : index
    %473 = vector.load %arg0[%c758, %c0_148] : memref<768x128xf32, #tpu.memory_space<vmem>>, vector<1x128xf32>
    %474 = vector.extract_strided_slice %473 {offsets = [0, 0], sizes = [1, 64], strides = [1, 1]} : vector<1x128xf32> to vector<1x64xf32>
    %c759 = arith.constant 759 : index
    %c0_149 = arith.constant 0 : index
    %475 = vector.load %arg0[%c759, %c0_149] : memref<768x128xf32, #tpu.memory_space<vmem>>, vector<1x128xf32>
    %476 = vector.extract_strided_slice %475 {offsets = [0, 0], sizes = [1, 32], strides = [1, 1]} : vector<1x128xf32> to vector<1x32xf32>
    %c760 = arith.constant 760 : index
    %c0_150 = arith.constant 0 : index
    %477 = vector.load %arg0[%c760, %c0_150] : memref<768x128xf32, #tpu.memory_space<vmem>>, vector<1x128xf32>
    %478 = vector.extract_strided_slice %477 {offsets = [0, 0], sizes = [1, 32], strides = [1, 1]} : vector<1x128xf32> to vector<1x32xf32>
    %c761 = arith.constant 761 : index
    %c0_151 = arith.constant 0 : index
    %479 = vector.load %arg0[%c761, %c0_151] : memref<768x128xf32, #tpu.memory_space<vmem>>, vector<1x128xf32>
    %480 = vector.extract_strided_slice %479 {offsets = [0, 0], sizes = [1, 32], strides = [1, 1]} : vector<1x128xf32> to vector<1x32xf32>
    %cst_152 = arith.constant dense<0.000000e+00> : vector<32x32xf32>
    %481 = tpu.matmul %448, %450, %cst_152 {dimension_numbers = #tpu.dot_dimension_numbers<[1], [0], [0], [1], [0, 0, 1, 1], [], []>} : vector<32x32xf32>, vector<32x32xf32>, vector<32x32xf32> -> vector<32x32xf32>
    %482 = vector.broadcast %462 : vector<1x32xf32> to vector<32x32xf32>
    %483 = arith.addf %481, %482 : vector<32x32xf32>
    %cst_153 = arith.constant dense<0.000000e+00> : vector<32x32xf32>
    %484 = tpu.matmul %448, %452, %cst_153 {dimension_numbers = #tpu.dot_dimension_numbers<[1], [0], [0], [1], [0, 0, 1, 1], [], []>} : vector<32x32xf32>, vector<32x32xf32>, vector<32x32xf32> -> vector<32x32xf32>
    %485 = vector.broadcast %464 : vector<1x32xf32> to vector<32x32xf32>
    %486 = arith.addf %484, %485 : vector<32x32xf32>
    %cst_154 = arith.constant dense<0.000000e+00> : vector<32x32xf32>
    %487 = tpu.matmul %448, %454, %cst_154 {dimension_numbers = #tpu.dot_dimension_numbers<[1], [0], [0], [1], [0, 0, 1, 1], [], []>} : vector<32x32xf32>, vector<32x32xf32>, vector<32x32xf32> -> vector<32x32xf32>
    %488 = vector.broadcast %466 : vector<1x32xf32> to vector<32x32xf32>
    %489 = arith.addf %487, %488 : vector<32x32xf32>
    %490 = vector.extract_strided_slice %483 {offsets = [0, 0], sizes = [16, 32], strides = [1, 1]} : vector<32x32xf32> to vector<16x32xf32>
    %491 = vector.extract_strided_slice %486 {offsets = [0, 0], sizes = [16, 32], strides = [1, 1]} : vector<32x32xf32> to vector<16x32xf32>
    %492 = vector.extract_strided_slice %489 {offsets = [0, 0], sizes = [16, 32], strides = [1, 1]} : vector<32x32xf32> to vector<16x32xf32>
    %493 = vector.extract_strided_slice %159 {offsets = [0, 0], sizes = [1, 16], strides = [1, 1]} : vector<2x16xf32> to vector<1x16xf32>
    %494 = vector.broadcast %167 : vector<1x32xf32> to vector<16x32xf32>
    %495 = arith.mulf %490, %494 : vector<16x32xf32>
    %cst_155 = arith.constant dense<0.000000e+00> : vector<16x16xf32>
    %496 = tpu.matmul %495, %491, %cst_155 {dimension_numbers = #tpu.dot_dimension_numbers<[1], [1], [0], [0], [0, 0, 1, 0], [], []>} : vector<16x32xf32>, vector<16x32xf32>, vector<16x16xf32> -> vector<16x16xf32>
    %497 = vector.broadcast %493 : vector<1x16xf32> to vector<16x16xf32>
    %498 = arith.addf %496, %497 : vector<16x16xf32>
    %cst_156 = arith.constant dense<0xFF800000> : vector<16xf32>
    %499 = vector.multi_reduction <maximumf>, %498, %cst_156 [1] : vector<16x16xf32> to vector<16xf32>
    %500 = vector.shape_cast %499 : vector<16xf32> to vector<16x1xf32>
    %501 = vector.broadcast %500 : vector<16x1xf32> to vector<16x16xf32>
    %502 = arith.subf %498, %501 : vector<16x16xf32>
    %503 = math.exp %502 : vector<16x16xf32>
    %cst_157 = arith.constant dense<0.000000e+00> : vector<16xf32>
    %504 = vector.multi_reduction <add>, %503, %cst_157 [1] : vector<16x16xf32> to vector<16xf32>
    %505 = vector.shape_cast %504 : vector<16xf32> to vector<16x1xf32>
    %506 = vector.broadcast %505 : vector<16x1xf32> to vector<16x16xf32>
    %507 = arith.divf %503, %506 : vector<16x16xf32>
    %508 = vector.broadcast %167 : vector<1x32xf32> to vector<16x32xf32>
    %509 = arith.mulf %492, %508 : vector<16x32xf32>
    %cst_158 = arith.constant dense<0.000000e+00> : vector<16x32xf32>
    %510 = tpu.matmul %507, %509, %cst_158 {dimension_numbers = #tpu.dot_dimension_numbers<[1], [0], [0], [1], [0, 0, 1, 1], [], []>} : vector<16x16xf32>, vector<16x32xf32>, vector<16x32xf32> -> vector<16x32xf32>
    %511 = vector.broadcast %174 : vector<1x32xf32> to vector<16x32xf32>
    %512 = arith.mulf %490, %511 : vector<16x32xf32>
    %cst_159 = arith.constant dense<0.000000e+00> : vector<16x16xf32>
    %513 = tpu.matmul %512, %491, %cst_159 {dimension_numbers = #tpu.dot_dimension_numbers<[1], [1], [0], [0], [0, 0, 1, 0], [], []>} : vector<16x32xf32>, vector<16x32xf32>, vector<16x16xf32> -> vector<16x16xf32>
    %514 = vector.broadcast %493 : vector<1x16xf32> to vector<16x16xf32>
    %515 = arith.addf %513, %514 : vector<16x16xf32>
    %cst_160 = arith.constant dense<0xFF800000> : vector<16xf32>
    %516 = vector.multi_reduction <maximumf>, %515, %cst_160 [1] : vector<16x16xf32> to vector<16xf32>
    %517 = vector.shape_cast %516 : vector<16xf32> to vector<16x1xf32>
    %518 = vector.broadcast %517 : vector<16x1xf32> to vector<16x16xf32>
    %519 = arith.subf %515, %518 : vector<16x16xf32>
    %520 = math.exp %519 : vector<16x16xf32>
    %cst_161 = arith.constant dense<0.000000e+00> : vector<16xf32>
    %521 = vector.multi_reduction <add>, %520, %cst_161 [1] : vector<16x16xf32> to vector<16xf32>
    %522 = vector.shape_cast %521 : vector<16xf32> to vector<16x1xf32>
    %523 = vector.broadcast %522 : vector<16x1xf32> to vector<16x16xf32>
    %524 = arith.divf %520, %523 : vector<16x16xf32>
    %525 = vector.broadcast %174 : vector<1x32xf32> to vector<16x32xf32>
    %526 = arith.mulf %492, %525 : vector<16x32xf32>
    %cst_162 = arith.constant dense<0.000000e+00> : vector<16x32xf32>
    %527 = tpu.matmul %524, %526, %cst_162 {dimension_numbers = #tpu.dot_dimension_numbers<[1], [0], [0], [1], [0, 0, 1, 1], [], []>} : vector<16x16xf32>, vector<16x32xf32>, vector<16x32xf32> -> vector<16x32xf32>
    %528 = vector.broadcast %181 : vector<1x32xf32> to vector<16x32xf32>
    %529 = arith.mulf %490, %528 : vector<16x32xf32>
    %cst_163 = arith.constant dense<0.000000e+00> : vector<16x16xf32>
    %530 = tpu.matmul %529, %491, %cst_163 {dimension_numbers = #tpu.dot_dimension_numbers<[1], [1], [0], [0], [0, 0, 1, 0], [], []>} : vector<16x32xf32>, vector<16x32xf32>, vector<16x16xf32> -> vector<16x16xf32>
    %531 = vector.broadcast %493 : vector<1x16xf32> to vector<16x16xf32>
    %532 = arith.addf %530, %531 : vector<16x16xf32>
    %cst_164 = arith.constant dense<0xFF800000> : vector<16xf32>
    %533 = vector.multi_reduction <maximumf>, %532, %cst_164 [1] : vector<16x16xf32> to vector<16xf32>
    %534 = vector.shape_cast %533 : vector<16xf32> to vector<16x1xf32>
    %535 = vector.broadcast %534 : vector<16x1xf32> to vector<16x16xf32>
    %536 = arith.subf %532, %535 : vector<16x16xf32>
    %537 = math.exp %536 : vector<16x16xf32>
    %cst_165 = arith.constant dense<0.000000e+00> : vector<16xf32>
    %538 = vector.multi_reduction <add>, %537, %cst_165 [1] : vector<16x16xf32> to vector<16xf32>
    %539 = vector.shape_cast %538 : vector<16xf32> to vector<16x1xf32>
    %540 = vector.broadcast %539 : vector<16x1xf32> to vector<16x16xf32>
    %541 = arith.divf %537, %540 : vector<16x16xf32>
    %542 = vector.broadcast %181 : vector<1x32xf32> to vector<16x32xf32>
    %543 = arith.mulf %492, %542 : vector<16x32xf32>
    %cst_166 = arith.constant dense<0.000000e+00> : vector<16x32xf32>
    %544 = tpu.matmul %541, %543, %cst_166 {dimension_numbers = #tpu.dot_dimension_numbers<[1], [0], [0], [1], [0, 0, 1, 1], [], []>} : vector<16x16xf32>, vector<16x32xf32>, vector<16x32xf32> -> vector<16x32xf32>
    %545 = vector.broadcast %188 : vector<1x32xf32> to vector<16x32xf32>
    %546 = arith.mulf %490, %545 : vector<16x32xf32>
    %cst_167 = arith.constant dense<0.000000e+00> : vector<16x16xf32>
    %547 = tpu.matmul %546, %491, %cst_167 {dimension_numbers = #tpu.dot_dimension_numbers<[1], [1], [0], [0], [0, 0, 1, 0], [], []>} : vector<16x32xf32>, vector<16x32xf32>, vector<16x16xf32> -> vector<16x16xf32>
    %548 = vector.broadcast %493 : vector<1x16xf32> to vector<16x16xf32>
    %549 = arith.addf %547, %548 : vector<16x16xf32>
    %cst_168 = arith.constant dense<0xFF800000> : vector<16xf32>
    %550 = vector.multi_reduction <maximumf>, %549, %cst_168 [1] : vector<16x16xf32> to vector<16xf32>
    %551 = vector.shape_cast %550 : vector<16xf32> to vector<16x1xf32>
    %552 = vector.broadcast %551 : vector<16x1xf32> to vector<16x16xf32>
    %553 = arith.subf %549, %552 : vector<16x16xf32>
    %554 = math.exp %553 : vector<16x16xf32>
    %cst_169 = arith.constant dense<0.000000e+00> : vector<16xf32>
    %555 = vector.multi_reduction <add>, %554, %cst_169 [1] : vector<16x16xf32> to vector<16xf32>
    %556 = vector.shape_cast %555 : vector<16xf32> to vector<16x1xf32>
    %557 = vector.broadcast %556 : vector<16x1xf32> to vector<16x16xf32>
    %558 = arith.divf %554, %557 : vector<16x16xf32>
    %559 = vector.broadcast %188 : vector<1x32xf32> to vector<16x32xf32>
    %560 = arith.mulf %492, %559 : vector<16x32xf32>
    %cst_170 = arith.constant dense<0.000000e+00> : vector<16x32xf32>
    %561 = tpu.matmul %558, %560, %cst_170 {dimension_numbers = #tpu.dot_dimension_numbers<[1], [0], [0], [1], [0, 0, 1, 1], [], []>} : vector<16x16xf32>, vector<16x32xf32>, vector<16x32xf32> -> vector<16x32xf32>
    %562 = arith.addf %510, %527 : vector<16x32xf32>
    %563 = arith.addf %544, %561 : vector<16x32xf32>
    %564 = arith.addf %562, %563 : vector<16x32xf32>
    %565 = vector.extract_strided_slice %483 {offsets = [16, 0], sizes = [16, 32], strides = [1, 1]} : vector<32x32xf32> to vector<16x32xf32>
    %566 = vector.extract_strided_slice %486 {offsets = [16, 0], sizes = [16, 32], strides = [1, 1]} : vector<32x32xf32> to vector<16x32xf32>
    %567 = vector.extract_strided_slice %489 {offsets = [16, 0], sizes = [16, 32], strides = [1, 1]} : vector<32x32xf32> to vector<16x32xf32>
    %568 = vector.extract_strided_slice %159 {offsets = [1, 0], sizes = [1, 16], strides = [1, 1]} : vector<2x16xf32> to vector<1x16xf32>
    %569 = vector.broadcast %167 : vector<1x32xf32> to vector<16x32xf32>
    %570 = arith.mulf %565, %569 : vector<16x32xf32>
    %cst_171 = arith.constant dense<0.000000e+00> : vector<16x16xf32>
    %571 = tpu.matmul %570, %566, %cst_171 {dimension_numbers = #tpu.dot_dimension_numbers<[1], [1], [0], [0], [0, 0, 1, 0], [], []>} : vector<16x32xf32>, vector<16x32xf32>, vector<16x16xf32> -> vector<16x16xf32>
    %572 = vector.broadcast %568 : vector<1x16xf32> to vector<16x16xf32>
    %573 = arith.addf %571, %572 : vector<16x16xf32>
    %cst_172 = arith.constant dense<0xFF800000> : vector<16xf32>
    %574 = vector.multi_reduction <maximumf>, %573, %cst_172 [1] : vector<16x16xf32> to vector<16xf32>
    %575 = vector.shape_cast %574 : vector<16xf32> to vector<16x1xf32>
    %576 = vector.broadcast %575 : vector<16x1xf32> to vector<16x16xf32>
    %577 = arith.subf %573, %576 : vector<16x16xf32>
    %578 = math.exp %577 : vector<16x16xf32>
    %cst_173 = arith.constant dense<0.000000e+00> : vector<16xf32>
    %579 = vector.multi_reduction <add>, %578, %cst_173 [1] : vector<16x16xf32> to vector<16xf32>
    %580 = vector.shape_cast %579 : vector<16xf32> to vector<16x1xf32>
    %581 = vector.broadcast %580 : vector<16x1xf32> to vector<16x16xf32>
    %582 = arith.divf %578, %581 : vector<16x16xf32>
    %583 = vector.broadcast %167 : vector<1x32xf32> to vector<16x32xf32>
    %584 = arith.mulf %567, %583 : vector<16x32xf32>
    %cst_174 = arith.constant dense<0.000000e+00> : vector<16x32xf32>
    %585 = tpu.matmul %582, %584, %cst_174 {dimension_numbers = #tpu.dot_dimension_numbers<[1], [0], [0], [1], [0, 0, 1, 1], [], []>} : vector<16x16xf32>, vector<16x32xf32>, vector<16x32xf32> -> vector<16x32xf32>
    %586 = vector.broadcast %174 : vector<1x32xf32> to vector<16x32xf32>
    %587 = arith.mulf %565, %586 : vector<16x32xf32>
    %cst_175 = arith.constant dense<0.000000e+00> : vector<16x16xf32>
    %588 = tpu.matmul %587, %566, %cst_175 {dimension_numbers = #tpu.dot_dimension_numbers<[1], [1], [0], [0], [0, 0, 1, 0], [], []>} : vector<16x32xf32>, vector<16x32xf32>, vector<16x16xf32> -> vector<16x16xf32>
    %589 = vector.broadcast %568 : vector<1x16xf32> to vector<16x16xf32>
    %590 = arith.addf %588, %589 : vector<16x16xf32>
    %cst_176 = arith.constant dense<0xFF800000> : vector<16xf32>
    %591 = vector.multi_reduction <maximumf>, %590, %cst_176 [1] : vector<16x16xf32> to vector<16xf32>
    %592 = vector.shape_cast %591 : vector<16xf32> to vector<16x1xf32>
    %593 = vector.broadcast %592 : vector<16x1xf32> to vector<16x16xf32>
    %594 = arith.subf %590, %593 : vector<16x16xf32>
    %595 = math.exp %594 : vector<16x16xf32>
    %cst_177 = arith.constant dense<0.000000e+00> : vector<16xf32>
    %596 = vector.multi_reduction <add>, %595, %cst_177 [1] : vector<16x16xf32> to vector<16xf32>
    %597 = vector.shape_cast %596 : vector<16xf32> to vector<16x1xf32>
    %598 = vector.broadcast %597 : vector<16x1xf32> to vector<16x16xf32>
    %599 = arith.divf %595, %598 : vector<16x16xf32>
    %600 = vector.broadcast %174 : vector<1x32xf32> to vector<16x32xf32>
    %601 = arith.mulf %567, %600 : vector<16x32xf32>
    %cst_178 = arith.constant dense<0.000000e+00> : vector<16x32xf32>
    %602 = tpu.matmul %599, %601, %cst_178 {dimension_numbers = #tpu.dot_dimension_numbers<[1], [0], [0], [1], [0, 0, 1, 1], [], []>} : vector<16x16xf32>, vector<16x32xf32>, vector<16x32xf32> -> vector<16x32xf32>
    %603 = vector.broadcast %181 : vector<1x32xf32> to vector<16x32xf32>
    %604 = arith.mulf %565, %603 : vector<16x32xf32>
    %cst_179 = arith.constant dense<0.000000e+00> : vector<16x16xf32>
    %605 = tpu.matmul %604, %566, %cst_179 {dimension_numbers = #tpu.dot_dimension_numbers<[1], [1], [0], [0], [0, 0, 1, 0], [], []>} : vector<16x32xf32>, vector<16x32xf32>, vector<16x16xf32> -> vector<16x16xf32>
    %606 = vector.broadcast %568 : vector<1x16xf32> to vector<16x16xf32>
    %607 = arith.addf %605, %606 : vector<16x16xf32>
    %cst_180 = arith.constant dense<0xFF800000> : vector<16xf32>
    %608 = vector.multi_reduction <maximumf>, %607, %cst_180 [1] : vector<16x16xf32> to vector<16xf32>
    %609 = vector.shape_cast %608 : vector<16xf32> to vector<16x1xf32>
    %610 = vector.broadcast %609 : vector<16x1xf32> to vector<16x16xf32>
    %611 = arith.subf %607, %610 : vector<16x16xf32>
    %612 = math.exp %611 : vector<16x16xf32>
    %cst_181 = arith.constant dense<0.000000e+00> : vector<16xf32>
    %613 = vector.multi_reduction <add>, %612, %cst_181 [1] : vector<16x16xf32> to vector<16xf32>
    %614 = vector.shape_cast %613 : vector<16xf32> to vector<16x1xf32>
    %615 = vector.broadcast %614 : vector<16x1xf32> to vector<16x16xf32>
    %616 = arith.divf %612, %615 : vector<16x16xf32>
    %617 = vector.broadcast %181 : vector<1x32xf32> to vector<16x32xf32>
    %618 = arith.mulf %567, %617 : vector<16x32xf32>
    %cst_182 = arith.constant dense<0.000000e+00> : vector<16x32xf32>
    %619 = tpu.matmul %616, %618, %cst_182 {dimension_numbers = #tpu.dot_dimension_numbers<[1], [0], [0], [1], [0, 0, 1, 1], [], []>} : vector<16x16xf32>, vector<16x32xf32>, vector<16x32xf32> -> vector<16x32xf32>
    %620 = vector.broadcast %188 : vector<1x32xf32> to vector<16x32xf32>
    %621 = arith.mulf %565, %620 : vector<16x32xf32>
    %cst_183 = arith.constant dense<0.000000e+00> : vector<16x16xf32>
    %622 = tpu.matmul %621, %566, %cst_183 {dimension_numbers = #tpu.dot_dimension_numbers<[1], [1], [0], [0], [0, 0, 1, 0], [], []>} : vector<16x32xf32>, vector<16x32xf32>, vector<16x16xf32> -> vector<16x16xf32>
    %623 = vector.broadcast %568 : vector<1x16xf32> to vector<16x16xf32>
    %624 = arith.addf %622, %623 : vector<16x16xf32>
    %cst_184 = arith.constant dense<0xFF800000> : vector<16xf32>
    %625 = vector.multi_reduction <maximumf>, %624, %cst_184 [1] : vector<16x16xf32> to vector<16xf32>
    %626 = vector.shape_cast %625 : vector<16xf32> to vector<16x1xf32>
    %627 = vector.broadcast %626 : vector<16x1xf32> to vector<16x16xf32>
    %628 = arith.subf %624, %627 : vector<16x16xf32>
    %629 = math.exp %628 : vector<16x16xf32>
    %cst_185 = arith.constant dense<0.000000e+00> : vector<16xf32>
    %630 = vector.multi_reduction <add>, %629, %cst_185 [1] : vector<16x16xf32> to vector<16xf32>
    %631 = vector.shape_cast %630 : vector<16xf32> to vector<16x1xf32>
    %632 = vector.broadcast %631 : vector<16x1xf32> to vector<16x16xf32>
    %633 = arith.divf %629, %632 : vector<16x16xf32>
    %634 = vector.broadcast %188 : vector<1x32xf32> to vector<16x32xf32>
    %635 = arith.mulf %567, %634 : vector<16x32xf32>
    %cst_186 = arith.constant dense<0.000000e+00> : vector<16x32xf32>
    %636 = tpu.matmul %633, %635, %cst_186 {dimension_numbers = #tpu.dot_dimension_numbers<[1], [0], [0], [1], [0, 0, 1, 1], [], []>} : vector<16x16xf32>, vector<16x32xf32>, vector<16x32xf32> -> vector<16x32xf32>
    %637 = arith.addf %585, %602 : vector<16x32xf32>
    %638 = arith.addf %619, %636 : vector<16x32xf32>
    %639 = arith.addf %637, %638 : vector<16x32xf32>
    %640 = tpu.concatenate %564, %639 in 0 : vector<16x32xf32>, vector<16x32xf32> -> vector<32x32xf32>
    %cst_187 = arith.constant dense<0.000000e+00> : vector<32x32xf32>
    %641 = tpu.matmul %640, %456, %cst_187 {dimension_numbers = #tpu.dot_dimension_numbers<[1], [0], [0], [1], [0, 0, 1, 1], [], []>} : vector<32x32xf32>, vector<32x32xf32>, vector<32x32xf32> -> vector<32x32xf32>
    %642 = vector.broadcast %468 : vector<1x32xf32> to vector<32x32xf32>
    %643 = arith.addf %641, %642 : vector<32x32xf32>
    %644 = arith.addf %643, %448 : vector<32x32xf32>
    %cst_188 = arith.constant dense<0.000000e+00> : vector<32xf32>
    %645 = vector.multi_reduction <add>, %644, %cst_188 [1] : vector<32x32xf32> to vector<32xf32>
    %646 = vector.shape_cast %645 : vector<32xf32> to vector<32x1xf32>
    %cst_189 = arith.constant 3.200000e+01 : f32
    %647 = vector.broadcast %cst_189 : f32 to vector<32x1xf32>
    %648 = arith.divf %646, %647 : vector<32x1xf32>
    %649 = vector.broadcast %648 : vector<32x1xf32> to vector<32x32xf32>
    %650 = arith.subf %644, %649 : vector<32x32xf32>
    %651 = arith.mulf %650, %650 : vector<32x32xf32>
    %cst_190 = arith.constant dense<0.000000e+00> : vector<32xf32>
    %652 = vector.multi_reduction <add>, %651, %cst_190 [1] : vector<32x32xf32> to vector<32xf32>
    %653 = vector.shape_cast %652 : vector<32xf32> to vector<32x1xf32>
    %cst_191 = arith.constant 3.200000e+01 : f32
    %654 = vector.broadcast %cst_191 : f32 to vector<32x1xf32>
    %655 = arith.divf %653, %654 : vector<32x1xf32>
    %656 = vector.broadcast %648 : vector<32x1xf32> to vector<32x32xf32>
    %657 = arith.subf %644, %656 : vector<32x32xf32>
    %cst_192 = arith.constant 9.99999996E-13 : f32
    %658 = vector.broadcast %cst_192 : f32 to vector<32x1xf32>
    %659 = arith.addf %655, %658 : vector<32x1xf32>
    %660 = math.rsqrt %659 : vector<32x1xf32>
    %661 = vector.broadcast %660 : vector<32x1xf32> to vector<32x32xf32>
    %662 = arith.mulf %657, %661 : vector<32x32xf32>
    %663 = vector.broadcast %470 : vector<1x32xf32> to vector<32x32xf32>
    %664 = arith.mulf %662, %663 : vector<32x32xf32>
    %665 = vector.broadcast %472 : vector<1x32xf32> to vector<32x32xf32>
    %666 = arith.addf %664, %665 : vector<32x32xf32>
    %cst_193 = arith.constant dense<0.000000e+00> : vector<32x64xf32>
    %667 = tpu.matmul %666, %458, %cst_193 {dimension_numbers = #tpu.dot_dimension_numbers<[1], [0], [0], [1], [0, 0, 1, 1], [], []>} : vector<32x32xf32>, vector<32x64xf32>, vector<32x64xf32> -> vector<32x64xf32>
    %668 = vector.broadcast %474 : vector<1x64xf32> to vector<32x64xf32>
    %669 = arith.addf %667, %668 : vector<32x64xf32>
    %cst_194 = arith.constant 5.000000e-01 : f32
    %670 = vector.broadcast %cst_194 : f32 to vector<32x64xf32>
    %671 = arith.mulf %670, %669 : vector<32x64xf32>
    %cst_195 = arith.constant 4.471500e-02 : f32
    %672 = vector.broadcast %cst_195 : f32 to vector<32x64xf32>
    %673 = arith.mulf %672, %669 : vector<32x64xf32>
    %674 = arith.mulf %673, %669 : vector<32x64xf32>
    %675 = arith.mulf %674, %669 : vector<32x64xf32>
    %676 = arith.addf %669, %675 : vector<32x64xf32>
    %cst_196 = arith.constant 0.797884583 : f32
    %677 = vector.broadcast %cst_196 : f32 to vector<32x64xf32>
    %678 = arith.mulf %677, %676 : vector<32x64xf32>
    %679 = math.tanh %678 : vector<32x64xf32>
    %cst_197 = arith.constant 1.000000e+00 : f32
    %680 = vector.broadcast %cst_197 : f32 to vector<32x64xf32>
    %681 = arith.addf %680, %679 : vector<32x64xf32>
    %682 = arith.mulf %671, %681 : vector<32x64xf32>
    %cst_198 = arith.constant dense<0.000000e+00> : vector<32x32xf32>
    %683 = tpu.matmul %682, %460, %cst_198 {dimension_numbers = #tpu.dot_dimension_numbers<[1], [0], [0], [1], [0, 0, 1, 1], [], []>} : vector<32x64xf32>, vector<64x32xf32>, vector<32x32xf32> -> vector<32x32xf32>
    %684 = vector.broadcast %476 : vector<1x32xf32> to vector<32x32xf32>
    %685 = arith.addf %683, %684 : vector<32x32xf32>
    %686 = arith.addf %685, %666 : vector<32x32xf32>
    %cst_199 = arith.constant dense<0.000000e+00> : vector<32xf32>
    %687 = vector.multi_reduction <add>, %686, %cst_199 [1] : vector<32x32xf32> to vector<32xf32>
    %688 = vector.shape_cast %687 : vector<32xf32> to vector<32x1xf32>
    %cst_200 = arith.constant 3.200000e+01 : f32
    %689 = vector.broadcast %cst_200 : f32 to vector<32x1xf32>
    %690 = arith.divf %688, %689 : vector<32x1xf32>
    %691 = vector.broadcast %690 : vector<32x1xf32> to vector<32x32xf32>
    %692 = arith.subf %686, %691 : vector<32x32xf32>
    %693 = arith.mulf %692, %692 : vector<32x32xf32>
    %cst_201 = arith.constant dense<0.000000e+00> : vector<32xf32>
    %694 = vector.multi_reduction <add>, %693, %cst_201 [1] : vector<32x32xf32> to vector<32xf32>
    %695 = vector.shape_cast %694 : vector<32xf32> to vector<32x1xf32>
    %cst_202 = arith.constant 3.200000e+01 : f32
    %696 = vector.broadcast %cst_202 : f32 to vector<32x1xf32>
    %697 = arith.divf %695, %696 : vector<32x1xf32>
    %698 = vector.broadcast %690 : vector<32x1xf32> to vector<32x32xf32>
    %699 = arith.subf %686, %698 : vector<32x32xf32>
    %cst_203 = arith.constant 9.99999996E-13 : f32
    %700 = vector.broadcast %cst_203 : f32 to vector<32x1xf32>
    %701 = arith.addf %697, %700 : vector<32x1xf32>
    %702 = math.rsqrt %701 : vector<32x1xf32>
    %703 = vector.broadcast %702 : vector<32x1xf32> to vector<32x32xf32>
    %704 = arith.mulf %699, %703 : vector<32x32xf32>
    %705 = vector.broadcast %478 : vector<1x32xf32> to vector<32x32xf32>
    %706 = arith.mulf %704, %705 : vector<32x32xf32>
    %707 = vector.broadcast %480 : vector<1x32xf32> to vector<32x32xf32>
    %708 = arith.addf %706, %707 : vector<32x32xf32>
    %709 = vector.extract_strided_slice %708 {offsets = [0, 0], sizes = [8, 32], strides = [1, 1]} : vector<32x32xf32> to vector<8x32xf32>
    %c0_204 = arith.constant 0 : index
    %c0_205 = arith.constant 0 : index
    %c0_206 = arith.constant 0 : index
    %710 = vector.load %arg7[%c0_204, %c0_205, %c0_206] : memref<2x8x32xf32, #tpu.memory_space<vmem>>, vector<1x8x32xf32>
    %711 = vector.shape_cast %710 : vector<1x8x32xf32> to vector<8x32xf32>
    %712 = vector.shape_cast %709 : vector<8x32xf32> to vector<1x8x32xf32>
    tpu.vector_store %arg7[%c0_204, %c0_205, %c0_206], %712 {strides = array<i32>} : memref<2x8x32xf32, #tpu.memory_space<vmem>>, vector<1x8x32xf32>,
    %713 = vector.extract_strided_slice %708 {offsets = [8, 0], sizes = [8, 32], strides = [1, 1]} : vector<32x32xf32> to vector<8x32xf32>
    %c0_207 = arith.constant 0 : index
    %c0_208 = arith.constant 0 : index
    %c0_209 = arith.constant 0 : index
    %714 = vector.load %arg8[%c0_207, %c0_208, %c0_209] : memref<2x8x32xf32, #tpu.memory_space<vmem>>, vector<1x8x32xf32>
    %715 = vector.shape_cast %714 : vector<1x8x32xf32> to vector<8x32xf32>
    %716 = vector.shape_cast %713 : vector<8x32xf32> to vector<1x8x32xf32>
    tpu.vector_store %arg8[%c0_207, %c0_208, %c0_209], %716 {strides = array<i32>} : memref<2x8x32xf32, #tpu.memory_space<vmem>>, vector<1x8x32xf32>,
    %717 = vector.extract_strided_slice %708 {offsets = [16, 0], sizes = [8, 32], strides = [1, 1]} : vector<32x32xf32> to vector<8x32xf32>
    %c1_210 = arith.constant 1 : index
    %c0_211 = arith.constant 0 : index
    %c0_212 = arith.constant 0 : index
    %718 = vector.load %arg7[%c1_210, %c0_211, %c0_212] : memref<2x8x32xf32, #tpu.memory_space<vmem>>, vector<1x8x32xf32>
    %719 = vector.shape_cast %718 : vector<1x8x32xf32> to vector<8x32xf32>
    %720 = vector.shape_cast %717 : vector<8x32xf32> to vector<1x8x32xf32>
    tpu.vector_store %arg7[%c1_210, %c0_211, %c0_212], %720 {strides = array<i32>} : memref<2x8x32xf32, #tpu.memory_space<vmem>>, vector<1x8x32xf32>,
    %721 = vector.extract_strided_slice %708 {offsets = [24, 0], sizes = [8, 32], strides = [1, 1]} : vector<32x32xf32> to vector<8x32xf32>
    %c1_213 = arith.constant 1 : index
    %c0_214 = arith.constant 0 : index
    %c0_215 = arith.constant 0 : index
    %722 = vector.load %arg8[%c1_213, %c0_214, %c0_215] : memref<2x8x32xf32, #tpu.memory_space<vmem>>, vector<1x8x32xf32>
    %723 = vector.shape_cast %722 : vector<1x8x32xf32> to vector<8x32xf32>
    %724 = vector.shape_cast %721 : vector<8x32xf32> to vector<1x8x32xf32>
    tpu.vector_store %arg8[%c1_213, %c0_214, %c0_215], %724 {strides = array<i32>} : memref<2x8x32xf32, #tpu.memory_space<vmem>>, vector<1x8x32xf32>,
    %725 = vector.extract_strided_slice %708 {offsets = [0, 0], sizes = [1, 32], strides = [1, 1]} : vector<32x32xf32> to vector<1x32xf32>
    %726 = vector.extract_strided_slice %708 {offsets = [16, 0], sizes = [1, 32], strides = [1, 1]} : vector<32x32xf32> to vector<1x32xf32>
    %727 = tpu.concatenate %725, %726 in 0 : vector<1x32xf32>, vector<1x32xf32> -> vector<2x32xf32>
    %c224 = arith.constant 224 : index
    %c0_216 = arith.constant 0 : index
    %728 = vector.load %arg0[%c224, %c0_216] : memref<768x128xf32, #tpu.memory_space<vmem>>, vector<32x128xf32>
    %729 = vector.extract_strided_slice %728 {offsets = [0, 0], sizes = [32, 32], strides = [1, 1]} : vector<32x128xf32> to vector<32x32xf32>
    %cst_217 = arith.constant dense<0.000000e+00> : vector<2x32xf32>
    %730 = tpu.matmul %727, %729, %cst_217 {dimension_numbers = #tpu.dot_dimension_numbers<[1], [0], [0], [1], [0, 0, 1, 1], [], []>} : vector<2x32xf32>, vector<32x32xf32>, vector<2x32xf32> -> vector<2x32xf32>
    %c222 = arith.constant 222 : index
    %c0_218 = arith.constant 0 : index
    %731 = vector.load %arg0[%c222, %c0_218] : memref<768x128xf32, #tpu.memory_space<vmem>>, vector<1x128xf32>
    %732 = vector.extract_strided_slice %731 {offsets = [0, 0], sizes = [1, 32], strides = [1, 1]} : vector<1x128xf32> to vector<1x32xf32>
    %733 = vector.broadcast %732 : vector<1x32xf32> to vector<2x32xf32>
    %734 = arith.addf %730, %733 : vector<2x32xf32>
    %735 = math.tanh %734 : vector<2x32xf32>
    %c0_219 = arith.constant 0 : index
    %c0_220 = arith.constant 0 : index
    %736 = vector.load %arg6[%c0_219, %c0_220] : memref<2x32xf32, #tpu.memory_space<vmem>>, vector<2x32xf32>
    tpu.vector_store %arg6[%c0_219, %c0_220], %735 {strides = array<i32>} : memref<2x32xf32, #tpu.memory_space<vmem>>, vector<2x32xf32>,
    %c256 = arith.constant 256 : index
    %c0_221 = arith.constant 0 : index
    %737 = vector.load %arg0[%c256, %c0_221] : memref<768x128xf32, #tpu.memory_space<vmem>>, vector<32x128xf32>
    %738 = vector.extract_strided_slice %737 {offsets = [0, 0], sizes = [32, 2], strides = [1, 1]} : vector<32x128xf32> to vector<32x2xf32>
    %cst_222 = arith.constant dense<0.000000e+00> : vector<2x2xf32>
    %739 = tpu.matmul %735, %738, %cst_222 {dimension_numbers = #tpu.dot_dimension_numbers<[1], [0], [0], [1], [0, 0, 1, 1], [], []>} : vector<2x32xf32>, vector<32x2xf32>, vector<2x2xf32> -> vector<2x2xf32>
    %c223 = arith.constant 223 : index
    %c0_223 = arith.constant 0 : index
    %740 = vector.load %arg0[%c223, %c0_223] : memref<768x128xf32, #tpu.memory_space<vmem>>, vector<1x128xf32>
    %741 = vector.extract_strided_slice %740 {offsets = [0, 0], sizes = [1, 2], strides = [1, 1]} : vector<1x128xf32> to vector<1x2xf32>
    %742 = vector.broadcast %741 : vector<1x2xf32> to vector<2x2xf32>
    %743 = arith.addf %739, %742 : vector<2x2xf32>
    %c0_224 = arith.constant 0 : index
    %c0_225 = arith.constant 0 : index
    %744 = vector.load %arg9[%c0_224, %c0_225] : memref<2x2xf32, #tpu.memory_space<vmem>>, vector<2x2xf32>
    tpu.vector_store %arg9[%c0_224, %c0_225], %743 {strides = array<i32>} : memref<2x2xf32, #tpu.memory_space<vmem>>, vector<2x2xf32>,
    return
  }
}

</mosaic_0001>

<bundles_post_ra>
// kernel: net_forward.1
= control target key start
LH: loop header
LB: loop body
LE: loop exit
PB: predicated region body
PF: predicated region fallthrough
CT: control target
= control target key end

     0   :  { %15 = vsyncpa [#allocation4], 0  ;;  %s5075_s0 = inlined_call_operand.hbm [shape: f32[768,128], index: 0, kind: input, shape index: {}]   ;;  %s5076_s1 = inlined_call_operand.vmem [shape: s32[2,8,1], index: 1, kind: input, shape index: {}]   ;;  %s5077_s2 = inlined_call_operand.vmem [shape: f32[2,8], index: 2, kind: input, shape index: {}]   ;;  %s5078_s3 = inlined_call_operand.vmem [shape: f32[2,8,16], index: 3, kind: input, shape index: {}]   ;;  %s5079_s4 = inlined_call_operand.vmem [shape: f32[2,8], index: 4, kind: input, shape index: {}]   ;;  %s5080_s5 = inlined_call_operand.vmem [shape: f32[2,8,4], index: 5, kind: input, shape index: {}]   ;;  %s5081_s6 = inlined_call_operand.hbm [shape: f32[2,32], index: 6, kind: output, shape index: {0}]   ;;  %s5082_s7 = inlined_call_operand.hbm [shape: f32[2,8,32], index: 7, kind: output, shape index: {1}]   ;;  %s5083_s8 = inlined_call_operand.hbm [shape: f32[2,8,32], index: 8, kind: output, shape index: {2}]   ;;  %s5084_s9 = inlined_call_operand.hbm [shape: f32[2,2], index: 9, kind: output, shape index: {3}]  }
   0x1   :  { %16 = vsyncpa [#allocation5], 0 }
   0x2   :  { %17 = vsyncpa [#allocation8], 0 }
   0x3   :  { %18 = vsyncpa [#allocation11], 0  ;;  %s23_s11 = sshll.u32 %s5075_s0, 4  ;;  %s3859_s12 = smov [#allocation3]   ;;  %s24_s11 = int_to_ptr.hbm [resolvable:$true] %s23_s11 }
   0x4   :  { %s25_s13 = sshll.u32 %s3859_s12, 4  ;;  %s3860_s14 = smov 128   ;;  %s26_s13 = int_to_ptr.vmem [resolvable:$true] %s25_s13 }
   0x5   :  { %s3861_s15 = smov 8  }
   0x6   :  { %31 = dma.hbm_to_vmem [thread:$0]  %s24_s11, 12288, %s26_s13, [#allocation4], %s3860_s14, %s3860_s14, %s3861_s15  }
   0x7   :  { %3851 = dma.done.wait [#allocation4], 12288  }
   0x8   :  { %3852 = vsyncadd [#allocation4], 4294955008  ;;  %v3862_v0 = vmov 0   ;;  %v72_v1 = vld [vmem:[%s5076_s1] sm:$0xff]  ;;  %v61_v2 = vld [vmem:[#allocation3 + $0x78] sm:$0xff]  ;;  %vm167_vm0 = vcmask 1043456   ;;  %v73_v26 = vlaneseq }
   0x9   :  { %3510 = vset.pattern.permute.xlu0 %v3862_v0  ;;  %81 = vmatpush.msra.mxu0 %v61_v2  ;;  %v60_v3 = vld [vmem:[#allocation3 + $0x70] sm:$0xff]  ;;  %v59_v4 = vld [vmem:[#allocation3 + $0x68] sm:$0xff]  ;;  %v58_v5 = vld [vmem:[#allocation3 + $0x60] sm:$0xff]  ;;  %vm163_vm1 = vcmask 31744   ;;  %vm138_vm2 = vcmask 130048   ;;  %v3863_v29 = vmov 1.0  }
   0xa   :  { %76 = vperm.xlu0 %3510, %v72_v1   ;;  %229 = vmatpush.msra.mxu3 %v61_v2  ;;  %v3339_v6 = vld [vmem:[%s5076_s1 + $0x8] sm:$0xff]  ;;  %v57_v7 = vld [vmem:[#allocation3 + $0x58] sm:$0xff]  ;;  %v67_v8 = vld [vmem:[#allocation3 + $0xd0] sm:$0xf]  ;;  %v3950_v27 = vand.u32 127, %v73_v26  ;;  %vm101_vm5 = vcmask 261120  }
   0xb   :  { %82 = vmatpush.msra.mxu0 %v60_v3  ;;  %v56_v9 = vld [vmem:[#allocation3 + $0x50] sm:$0xff]  ;;  %3337 = vmatpush.msk.msra.mxu2 %vm167_vm0, %v67_v8  ;;  %v55_v10 = vld [vmem:[#allocation3 + $0x48] sm:$0xff]  ;;  %v54_v11 = vld [vmem:[#allocation3 + $0x40] sm:$0xff]  ;;  %v3864_v52 = vmov 32.0   ;;  %s3283_s28 = sshll.u32 %s5082_s7, 4  ;;  %s3866_s29 = smov [#allocation7]   ;;  %s3284_s28 = int_to_ptr.hbm [resolvable:$true] %s3283_s28 }
   0xc   :  { %230 = vmatpush.msra.mxu3 %v60_v3  ;;  %v53_v12 = vld [vmem:[#allocation3 + $0x38] sm:$0xff]  ;;  %v52_v13 = vld [vmem:[#allocation3 + $0x30] sm:$0xff]  ;;  %v51_v14 = vld [vmem:[#allocation3 + $0x28] sm:$0xff]  ;;  %3539 = vrcp.f32 %v3864_v52  ;;  %s3281_s30 = sshll.u32 %s3866_s29, 4  ;;  %s3867_s10 = smov [#allocation6]   ;;  %s3282_s30 = int_to_ptr.vmem [resolvable:$true] %s3281_s30 }
   0xd   :  { %83 = vmatpush.msra.mxu0 %v59_v4  ;;  %v50_v15 = vld [vmem:[#allocation3 + $0x20] sm:$0xff]  ;;  %v49_v16 = vld [vmem:[#allocation3 + $0x18] sm:$0xff]  ;;  %v48_v17 = vld [vmem:[#allocation3 + $0x10] sm:$0xff]  ;;  %s3271_s11 = sshll.u32 %s3867_s10, 4  ;;  %s3273_s16 = sshll.u32 %s5081_s6, 4  ;;  %s3272_s11 = int_to_ptr.vmem [resolvable:$true] %s3271_s11  ;;  %s3274_s16 = int_to_ptr.hbm [resolvable:$true] %s3273_s16 }
   0xe   :  { %231 = vmatpush.msra.mxu3 %v59_v4  ;;  %v47_v18 = vld [vmem:[#allocation3 + $0x8] sm:$0xff]  ;;  %v162_v19 = vld [vmem:[%s5080_s5] sm:$0xff]  ;;  %v3511_v32 = vld [vmem:[#allocation3 + $0xda] ss:$0 sm:$0xff]  ;;  %s3296_s7 = sshll.u32 %s5083_s8, 4  ;;  %s3868_s18 = smov [#allocation9]   ;;  %s3297_s7 = int_to_ptr.hbm [resolvable:$true] %s3296_s7 }
   0xf   :  { %84 = vmatpush.msra.mxu0 %v58_v5  ;;  %3338 = vmatmul.msk.f32.vlgmr.msra.gmra.mxu2 %vm163_vm1, %v162_v19  ;;  %v46_v20 = vld [vmem:[#allocation3] sm:$0xff]  ;;  %v66_v21 = vld [vmem:[#allocation3 + $0xc8] sm:$0xff]  ;;  %v3512_v39 = vld [vmem:[#allocation3 + $0xdb] ss:$0 sm:$0xff]  ;;  %s3294_s1 = sshll.u32 %s3868_s18, 4  ;;  %s3869_s19 = smov [#allocation10]   ;;  %s3295_s1 = int_to_ptr.vmem [resolvable:$true] %s3294_s1 }
  0x10   :  { %232 = vmatpush.msra.mxu3 %v58_v5  ;;  %v65_v22 = vld [vmem:[#allocation3 + $0xc0] sm:$0xff]  ;;  %156 = vmatpush.msra.mxu1 %v66_v21  ;;  %v3342_v24 = vld [vmem:[%s5078_s3 + $0x8] sm:$0xff]  ;;  %v387_v19 = vld [vmem:[#allocation3 + $0x130] sm:$0xff]  ;;  %s3308_s20 = sshll.u32 %s3869_s19, 4  ;;  %s3310_s22 = sshll.u32 %s5084_s9, 4  ;;  %s3309_s20 = int_to_ptr.vmem [resolvable:$true] %s3308_s20  ;;  %s3311_s22 = int_to_ptr.hbm [resolvable:$true] %s3310_s22 }
  0x11   :  { %85 = vmatpush.msra.mxu0 %v57_v7  ;;  %293 = vmatpush.msrb.mxu2 %v66_v21  ;;  %v136_v23 = vld [vmem:[%s5078_s3] sm:$0xff]  ;;  %v3344_v25 = vld [vmem:[%s5080_s5 + $0x8] sm:$0xff]  ;;  %v395_v21 = vld [vmem:[#allocation3 + $0x170] sm:$0xff] }
  0x12   :  { %224 = vperm.xlu0 %3510, %v3339_v6   ;;  %233 = vmatpush.msra.mxu3 %v57_v7  ;;  %v62_v35 = vld [vmem:[#allocation3 + $0x80] sm:$0xff]  ;;  %v3540_v53 = vpop.eup %3539 }
  0x13   :  { %86 = vmatpush.msra.mxu0 %v56_v9  ;;  %157 = vmatpush.msra.mxu1 %v65_v22  ;;  %v106_v54 = vmul.f32 32.0, %v3540_v53  ;;  %vm110_vm6 = vweird.f32 %v3540_v53 }
  0x14   :  { %234 = vmatpush.msra.mxu3 %v56_v9  ;;  %294 = vmatpush.msrb.mxu2 %v65_v22 }
  0x15   :  { %87 = vmatpush.msra.mxu0 %v55_v10  ;;  %3336 = vmatmul.msk.f32.vlgmr.msra.gmra.mxu1 %vm138_vm2, %v136_v23  ;;  %v107_v55 = vsub.f32 1.0, %v106_v54  ;;  %v386_v23 = vld [vmem:[#allocation3 + $0x128] sm:$0xff] }
  0x16   :  { %235 = vmatpush.msra.mxu3 %v55_v10  ;;  %3345 = vmatpush.msk.msrb.mxu1 %vm167_vm0, %v67_v8 }
  0x17   :  { %88 = vmatpush.msra.mxu0 %v54_v11  ;;  %3343 = vmatmul.msk.f32.vlgmr.msrb.gmra.mxu2 %vm138_vm2, %v3342_v24  ;;  %v108_v56 = vmul.f32 %v3540_v53, %v107_v55  ;;  %v390_v24 = vld [vmem:[#allocation3 + $0x148] sm:$0xff] }
  0x18   :  { %236 = vmatpush.msra.mxu3 %v54_v11 }
  0x19   :  { %89 = vmatpush.msra.mxu0 %v53_v12  ;;  %v109_v57 = vadd.f32 %v3540_v53, %v108_v56 }
  0x1a   :  { %237 = vmatpush.msra.mxu3 %v53_v12 }
  0x1b   :  { %90 = vmatpush.msra.mxu0 %v52_v13  ;;  %v3958_v58 = vsel %vm110_vm6, %v3540_v53, %v109_v57  ;;  %vm371_vm6 = vcmp.lt.s32.totalorder %v3950_v27, 16 }
  0x1c   :  { %238 = vmatpush.msra.mxu3 %v52_v13 }
  0x1d   :  { %91 = vmatpush.msra.mxu0 %v51_v14  ;;  %3346 = vmatmul.msk.f32.vlgmr.msrb.gmra.mxu1 %vm163_vm1, %v3344_v25  ;;  %v394_v25 = vld [vmem:[#allocation3 + $0x168] sm:$0xff] }
  0x1e   :  { %239 = vmatpush.msra.mxu3 %v51_v14 }
  0x1f   :  { %92 = vmatpush.msra.mxu0 %v50_v15 }
  0x20   :  { %240 = vmatpush.msra.mxu3 %v50_v15  ;;  %v388_v15 = vld [vmem:[#allocation3 + $0x138] sm:$0xff] }
  0x21   :  { %93 = vmatpush.msra.mxu0 %v49_v16  ;;  %448 = vmatpush.msra.mxu2 %v388_v15 }
  0x22   :  { %241 = vmatpush.msra.mxu3 %v49_v16  ;;  %v392_v16 = vld [vmem:[#allocation3 + $0x158] sm:$0xff] }
  0x23   :  { %94 = vmatpush.msra.mxu0 %v48_v17  ;;  %478 = vmatpush.msra.mxu1 %v392_v16 }
  0x24   :  { %242 = vmatpush.msra.mxu3 %v48_v17  ;;  %v396_v17 = vld [vmem:[#allocation3 + $0x178] sm:$0xff]  ;;  %449 = vmatpush.msra.mxu2 %v387_v19 }
  0x25   :  { %95 = vmatpush.msra.mxu0 %v47_v18 }
  0x26   :  { %243 = vmatpush.msra.mxu3 %v47_v18  ;;  %450 = vmatpush.msra.mxu2 %v386_v23 }
  0x27   :  { %96 = vmatpush.msra.mxu0 %v46_v20 }
  0x28   :  { %244 = vmatpush.msra.mxu3 %v46_v20  ;;  %v391_v20 = vld [vmem:[#allocation3 + $0x150] sm:$0xff] }
  0x29   :  { %508 = vmatpush.msrb.mxu0 %v396_v17  ;;  %479 = vmatpush.msra.mxu1 %v391_v20 }
  0x2b   :  { %509 = vmatpush.msrb.mxu0 %v395_v21  ;;  %480 = vmatpush.msra.mxu1 %v390_v24 }
  0x2d   :  { %510 = vmatpush.msrb.mxu0 %v394_v25 }
  0x7c   :  { %v77_v28 = vpop.permute.xlu0 %76 }
  0x7d   :  { %vm78_vm3 = vcmp.eq.s32.totalorder %v3950_v27, %v77_v28  ;;  %v385_v28 = vld [vmem:[#allocation3 + $0x120] sm:$0xff] }
  0x7e   :  { %3335 = vmatmul.msk.f32.vlgmr.msra.gmra.mxu0 %vm78_vm3, %v3863_v29  ;;  %451 = vmatpush.msra.mxu2 %v385_v28  ;;  %v3518_v28 = vld [vmem:[#allocation3 + $0x202] ss:$0 sm:$0xff] }
  0x84   :  { %v225_v30 = vpop.permute.xlu0 %224 }
  0x85   :  { %vm226_vm4 = vcmp.eq.s32.totalorder %v3950_v27, %v225_v30  ;;  %v393_v30 = vld [vmem:[#allocation3 + $0x160] sm:$0xff] }
  0x86   :  { %3341 = vmatmul.msk.f32.vlgmr.msra.gmra.mxu3 %vm226_vm4, %v3863_v29  ;;  %v389_v29 = vld [vmem:[#allocation3 + $0x140] sm:$0xff]  ;;  %511 = vmatpush.msrb.mxu0 %v393_v30  ;;  %vm370_vm4 = vcmp.ge.s32.totalorder %v3950_v27, 8 }
  0x87   :  { %481 = vmatpush.msra.mxu1 %v389_v29  ;;  %v4010_v29 = vld [vmem:[#allocation3 + $0x201] ss:$0 sm:$0xff] }
  0x92   :  { %v188_v31 = vpop.f32.mrf.mxu2  ;;  %v159_v33 = vpop.f32.mrf.mxu1 }
  0x93   :  { %v160_v34 = vadd.f32 %v3511_v32, %v159_v33 }
  0x95   :  { %v191_v37 = vadd.f32 %v188_v31, %v160_v34 }
  0x97   :  { %v193_v43 = vadd.f32 %v3512_v39, %v191_v37 }
  0x99   :  { %v194_v45 = vsel %vm101_vm5, %v193_v43, 0.0 }
  0x9a   :  { %v296_v40 = vpop.f32.mrf.mxu2  ;;  %v321_v44 = vpop.f32.mrf.mxu1 }
  0x9b   :  { %v297_v42 = vadd.f32 %v3511_v32, %v296_v40 }
  0x9d   :  { %v324_v46 = vadd.f32 %v321_v44, %v297_v42 }
  0x9f   :  { %v325_v47 = vadd.f32 %v3512_v39, %v324_v46 }
  0xa1   :  { %v326_v51 = vsel %vm101_vm5, %v325_v47, 0.0 }
  0xfb   :  { %v98_v36 = vpop.f32.mrf.mxu0 }
  0xfc   :  { %v99_v38 = vadd.f32 %v98_v36, %v62_v35 }
  0xfe   :  { %v102_v41 = vsel %vm101_vm5, %v99_v38, 0.0 }
  0xff   :  { %103 = vadd.xlane.f32.xlu1 %v102_v41 }
 0x107   :  { %195 = vadd.xlane.f32.xlu1 %v194_v45 }
 0x109   :  { %v246_v48 = vpop.f32.mrf.mxu3 }
 0x10a   :  { %v247_v49 = vadd.f32 %v246_v48, %v62_v35  ;;  %v3513_v48 = vld [vmem:[#allocation3 + $0xd8] ss:$0 sm:$0xff] }
 0x10c   :  { %v249_v50 = vsel %vm101_vm5, %v247_v49, 0.0 }
 0x10d   :  { %250 = vadd.xlane.f32.xlu0 %v249_v50 }
 0x10f   :  { %327 = vadd.xlane.f32.xlu1 %v326_v51  ;;  %v3514_v51 = vld [vmem:[#allocation3 + $0xd9] ss:$0 sm:$0xff] }
 0x172   :  { %v104_v59 = vpop.xlane.xlu1 %103 }
 0x173   :  { %v112_v60 = vmul.f32 %v3958_v58, %v104_v59 }
 0x175   :  { %v3961_v61 = vsub.f32 %v99_v38, %v112_v60 }
 0x177   :  { %v114_v62 = vmul.f32 %v3961_v61, %v3961_v61 }
 0x179   :  { %v115_v63 = vsel %vm101_vm5, %v114_v62, 0.0 }
 0x17a   :  { %116 = vadd.xlane.f32.xlu2 %v115_v63  ;;  %v196_v0 = vpop.xlane.xlu1 %195  ;;  %v3515_v63 = vld [vmem:[#allocation3 + $0xdc] ss:$0 sm:$0xff] }
 0x17b   :  { %v197_v1 = vmul.f32 %v196_v0, %v3958_v58 }
 0x17d   :  { %v3967_v2 = vsub.f32 %v193_v43, %v197_v1 }
 0x17f   :  { %v199_v3 = vmul.f32 %v3967_v2, %v3967_v2 }
 0x180   :  { %v251_v4 = vpop.xlane.xlu0 %250 }
 0x181   :  { %v252_v5 = vmul.f32 %v251_v4, %v3958_v58  ;;  %v200_v6 = vsel %vm101_vm5, %v199_v3, 0.0  ;;  %v3516_v4 = vld [vmem:[#allocation3 + $0xdd] ss:$0 sm:$0xff] }
 0x182   :  { %201 = vadd.xlane.f32.xlu2 %v200_v6  ;;  %v328_v7 = vpop.xlane.xlu1 %327 }
 0x183   :  { %v3973_v8 = vsub.f32 %v247_v49, %v252_v5  ;;  %v329_v9 = vmul.f32 %v328_v7, %v3958_v58 }
 0x185   :  { %v3976_v10 = vsub.f32 %v325_v47, %v329_v9  ;;  %v254_v11 = vmul.f32 %v3973_v8, %v3973_v8 }
 0x187   :  { %v331_v12 = vmul.f32 %v3976_v10, %v3976_v10  ;;  %v255_v13 = vsel %vm101_vm5, %v254_v11, 0.0 }
 0x189   :  { %v332_v14 = vsel %vm101_vm5, %v331_v12, 0.0 }
 0x18a   :  { %256 = vadd.xlane.f32.xlu2 %v255_v13  ;;  %333 = vadd.xlane.f32.xlu1 %v332_v14 }
 0x1ed   :  { %v117_v18 = vpop.xlane.xlu2 %116 }
 0x1ee   :  { %v118_v22 = vmul.f32 %v117_v18, %v3958_v58 }
 0x1f0   :  { %v119_v26 = vadd.f32 1e-12, %v118_v22 }
 0x1f2   :  { %3541 = vrsqrt.f32 %v119_v26  ;;  %vm126_vm8 = vweird.f32 %v119_v26 }
 0x1f5   :  { %v202_v31 = vpop.xlane.xlu2 %201 }
 0x1f6   :  { %v203_v32 = vmul.f32 %v202_v31, %v3958_v58  ;;  %v4012_v31 = vld [vmem:[#allocation3 + $0x200] ss:$0 sm:$0xff] }
 0x1f8   :  { %v3542_v33 = vpop.eup %3541  ;;  %v204_v34 = vadd.f32 1e-12, %v203_v32 }
 0x1f9   :  { %v121_v35 = vmul.f32 %v3542_v33, %v119_v26  ;;  %vm127_vm7 = vweird.f32 %v3542_v33 }
 0x1fa   :  { %3543 = vrsqrt.f32 %v204_v34  ;;  %vm128_vm9 = vmor %vm126_vm8, %vm127_vm7  ;;  %vm211_vm11 = vweird.f32 %v204_v34  ;;  %vm366_vm8 = vcmp.lt.s32.totalorder %v3950_v27, 8 }
 0x1fb   :  { %v122_v36 = vmul.f32 %v3542_v33, %v121_v35  ;;  %vm372_vm7 = vmand %vm370_vm4, %vm371_vm6 }
 0x1fd   :  { %v123_v37 = vmul.f32 0.5, %v122_v36  ;;  %v257_v38 = vpop.xlane.xlu2 %256  ;;  %v334_v39 = vpop.xlane.xlu1 %333 }
 0x1fe   :  { %v258_v40 = vmul.f32 %v257_v38, %v3958_v58  ;;  %v335_v41 = vmul.f32 %v334_v39, %v3958_v58 }
 0x1ff   :  { %v124_v42 = vsub.f32 1.5, %v123_v37  ;;  %v3865_v37 = vmov 0.0  }
 0x200   :  { %v3544_v43 = vpop.eup %3543  ;;  %v259_v44 = vadd.f32 1e-12, %v258_v40  ;;  %v336_v45 = vadd.f32 1e-12, %v335_v41  ;;  %v4020_v38 = vsel %vm372_vm7, 1.0, %v3865_v37  ;;  %v4024_v39 = vsel %vm366_vm8, 1.0, %v3865_v37 }
 0x201   :  { %v125_v46 = vmul.f32 %v3542_v33, %v124_v42  ;;  %v206_v47 = vmul.f32 %v3544_v43, %v204_v34  ;;  %vm212_vm10 = vweird.f32 %v3544_v43 }
 0x202   :  { %3545 = vrsqrt.f32 %v259_v44  ;;  %vm213_vm12 = vmor %vm211_vm11, %vm212_vm10  ;;  %vm266_vm15 = vweird.f32 %v259_v44  ;;  %vm343_vm1 = vweird.f32 %v336_v45  ;;  %vm381_vm10 = vcmp.lt.s32.totalorder %v3950_v27, 32 }
 0x203   :  { %v129_v49 = vsel %vm128_vm9, %v3542_v33, %v125_v46  ;;  %v207_v50 = vmul.f32 %v3544_v43, %v206_v47  ;;  %3547 = vrsqrt.f32 %v336_v45  ;;  %vm380_vm9 = vcmp.ge.s32.totalorder %v3950_v27, 24 }
 0x204   :  { %v130_v52 = vmul.f32 %v129_v49, %v3961_v61  ;;  %vm382_vm11 = vmand %vm380_vm9, %vm381_vm10 }
 0x205   :  { %v208_v53 = vmul.f32 0.5, %v207_v50  ;;  %v4034_v46 = vsel %vm382_vm11, 1.0, %v3865_v37 }
 0x206   :  { %v132_v54 = vmul.f32 %v3513_v48, %v130_v52 }
 0x207   :  { %v209_v55 = vsub.f32 1.5, %v208_v53 }
 0x208   :  { %v3546_v56 = vpop.eup %3545  ;;  %v134_v57 = vadd.f32 %v3514_v51, %v132_v54  ;;  %v356_v54 = vld [vmem:[%s5079_s4] sm:$0x3] }
 0x209   :  { %v3548_v59 = vpop.eup %3547  ;;  %v210_v60 = vmul.f32 %v3544_v43, %v209_v55  ;;  %v261_v62 = vmul.f32 %v3546_v56, %v259_v44  ;;  %vm267_vm13 = vweird.f32 %v3546_v56  ;;  %358 = vrot.lane.b32.xlu2 %v356_v54, %s3861_s15 }
 0x20a   :  { %135 = vst.msk [vmem:[#allocation2] sm:$0xff] %vm101_vm5, %v134_v57  ;;  %v338_v0 = vmul.f32 %v3548_v59, %v336_v45  ;;  %vm344_vm14 = vweird.f32 %v3548_v59  ;;  %vm268_vm0 = vmor %vm266_vm15, %vm267_vm13  ;;  %vm376_vm13 = vcmp.lt.s32.totalorder %v3950_v27, 24  ;;  %vm361_vm15 = vcmask 64512  }
 0x20b   :  { %v214_v1 = vsel %vm213_vm12, %v3544_v43, %v210_v60  ;;  %v262_v3 = vmul.f32 %v3546_v56, %v261_v62  ;;  %vm345_vm3 = vmor %vm343_vm1, %vm344_vm14  ;;  %vm375_vm12 = vcmp.ge.s32.totalorder %v3950_v27, 16 }
 0x20c   :  { %v215_v61 = vmul.f32 %v214_v1, %v3967_v2  ;;  %v339_v5 = vmul.f32 %v3548_v59, %v338_v0  ;;  %vm377_vm14 = vmand %vm375_vm12, %vm376_vm13 }
 0x20d   :  { %v263_v6 = vmul.f32 0.5, %v262_v3 }
 0x20e   :  { %v217_v7 = vmul.f32 %v3515_v63, %v215_v61  ;;  %v340_v9 = vmul.f32 0.5, %v339_v5 }
 0x20f   :  { %v264_v11 = vsub.f32 1.5, %v263_v6 }
 0x210   :  { %v219_v12 = vadd.f32 %v3516_v4, %v217_v7  ;;  %v341_v13 = vsub.f32 1.5, %v340_v9 }
 0x211   :  { %v265_v14 = vmul.f32 %v3546_v56, %v264_v11  ;;  %v351_v15 = vld [vmem:[#allocation2] sm:$0xff] }
 0x212   :  { %220 = vst.msk [vmem:[#allocation2 + $0x8] sm:$0xff] %vm101_vm5, %v219_v12  ;;  %v342_v16 = vmul.f32 %v3548_v59, %v341_v13  ;;  %3351 = vmatmul.msk.f32.vlgmr.msra.gmra.mxu2 %vm101_vm5, %v351_v15  ;;  %3355 = vmatmul.msk.f32.vlgmr.msra.gmra.mxu1 %vm101_vm5, %v351_v15 }
 0x213   :  { %v269_v2 = vsel %vm268_vm0, %v3546_v56, %v265_v14  ;;  %3359 = vmatmul.msk.f32.vlgmr.msrb.gmra.mxu0 %vm101_vm5, %v351_v15 }
 0x214   :  { %v270_v17 = vmul.f32 %v269_v2, %v3973_v8  ;;  %v346_v18 = vsel %vm345_vm3, %v3548_v59, %v342_v16 }
 0x215   :  { %v347_v19 = vmul.f32 %v346_v18, %v3976_v10 }
 0x216   :  { %v271_v20 = vmul.f32 %v3513_v48, %v270_v17 }
 0x217   :  { %v348_v21 = vmul.f32 %v3515_v63, %v347_v19  ;;  %v355_v19 = vld [vmem:[%s5077_s2] sm:$0x3] }
 0x218   :  { %v272_v22 = vadd.f32 %v3514_v51, %v271_v20 }
 0x219   :  { %v349_v23 = vadd.f32 %v3516_v4, %v348_v21  ;;  %v352_v24 = vld [vmem:[#allocation2 + $0x8] sm:$0xff]  ;;  %v4076_v4 = vsel %vm377_vm14, 1.0, %v3865_v37 }
 0x21a   :  { %273 = vst.msk [vmem:[#allocation2 + $0x10] sm:$0xff] %vm101_vm5, %v272_v22  ;;  %3352 = vmatmul.msk.f32.gmra.mxu2 %vm101_vm5, %v352_v24  ;;  %3356 = vmatmul.msk.f32.gmra.mxu1 %vm101_vm5, %v352_v24 }
 0x21b   :  { %350 = vst.msk [vmem:[#allocation2 + $0x18] sm:$0xff] %vm101_vm5, %v349_v23  ;;  %3360 = vmatmul.msk.f32.gmra.mxu0 %vm101_vm5, %v352_v24 }
 0x221   :  { %v353_v25 = vld [vmem:[#allocation2 + $0x10] sm:$0xff] }
 0x222   :  { %3353 = vmatmul.msk.f32.gmra.mxu2 %vm101_vm5, %v353_v25  ;;  %3357 = vmatmul.msk.f32.gmra.mxu1 %vm101_vm5, %v353_v25  ;;  %v354_v8 = vld [vmem:[#allocation2 + $0x18] sm:$0xff] }
 0x223   :  { %3361 = vmatmul.msk.f32.gmra.mxu0 %vm101_vm5, %v353_v25 }
 0x22a   :  { %3354 = vmatmul.msk.f32.gmra.mxu2 %vm101_vm5, %v354_v8  ;;  %3358 = vmatmul.msk.f32.gmra.mxu1 %vm101_vm5, %v354_v8 }
 0x22b   :  { %3362 = vmatmul.msk.f32.gmra.mxu0 %vm101_vm5, %v354_v8 }
 0x263   :  { %v359_v20 = vpop.permute.xlu2 %358 }
 0x264   :  { %v362_v21 = vsel %vm361_vm15, %v355_v19, %v359_v20 }
 0x265   :  { %v363_v22 = vsub.f32 1.0, %v362_v21 }
 0x267   :  { %v4116_v23 = vmul.f32 -10000.0, %v363_v22 }
 0x269   :  { %v4119_v24 = vperm.slane %v4116_v23, 0 }
 0x28f   :  { %v483_v10 = vpop.f32.mrf.mxu1 }
 0x290   :  { %v513_v26 = vpop.f32.mrf.mxu0  ;;  %v484_v43 = vadd.f32 %v4010_v29, %v483_v10 }
 0x291   :  { %v4018_v35 = vadd.f32 %v3518_v28, %v513_v26 }
 0x293   :  { %v692_v44 = vmul.f32 %v4020_v38, %v4018_v35  ;;  %v611_v45 = vmul.f32 %v4024_v39, %v4018_v35  ;;  %v883_v53 = vmul.f32 %v4034_v46, %v4018_v35  ;;  %v802_v7 = vmul.f32 %v4076_v4, %v4018_v35 }
 0x295   :  { %v453_v30 = vpop.f32.mrf.mxu2 }
 0x296   :  { %v454_v40 = vadd.f32 %v4012_v31, %v453_v30 }
 0x297   :  { %v486_v32 = vpop.f32.mrf.mxu1 }
 0x298   :  { %v487_v33 = vadd.f32 %v4010_v29, %v486_v32  ;;  %v516_v34 = vpop.f32.mrf.mxu0  ;;  %v525_v49 = vmul.f32 %v4024_v39, %v454_v40  ;;  %v613_v50 = vmul.f32 %v4020_v38, %v454_v40  ;;  %v723_v61 = vmul.f32 %v4076_v4, %v454_v40 }
 0x299   :  { %v517_v36 = vadd.f32 %v3518_v28, %v516_v34  ;;  %v804_v5 = vmul.f32 %v4034_v46, %v454_v40 }
 0x29a   :  { %3363 = vmatpush.xpose.msk.msrb.mxu3 %vm101_vm5, %v487_v33  ;;  %3367 = vmatpush.xpose.msk.msrb.mxu2 %vm101_vm5, %v487_v33 }
 0x29b   :  { %v693_v41 = vmul.f32 %v4020_v38, %v517_v36  ;;  %v612_v42 = vmul.f32 %v4024_v39, %v517_v36  ;;  %v884_v48 = vmul.f32 %v4034_v46, %v517_v36  ;;  %v803_v6 = vmul.f32 %v4076_v4, %v517_v36 }
 0x29d   :  { %714 = vmatpush.msrb.mxu1 %v693_v41  ;;  %934 = vmatpush.msra.mxu0 %v612_v42  ;;  %v456_v51 = vpop.f32.mrf.mxu2 }
 0x29e   :  { %3364 = vmatpush.xpose.msk.msrb.mxu3 %vm101_vm5, %v484_v43  ;;  %3368 = vmatpush.xpose.msk.msrb.mxu2 %vm101_vm5, %v484_v43  ;;  %v457_v55 = vadd.f32 %v4012_v31, %v456_v51 }
 0x29f   :  { %715 = vmatpush.msrb.mxu1 %v692_v44  ;;  %935 = vmatpush.msra.mxu0 %v611_v45  ;;  %v489_v47 = vpop.f32.mrf.mxu1 }
 0x2a0   :  { %v519_v52 = vpop.f32.mrf.mxu0  ;;  %v526_v57 = vmul.f32 %v4024_v39, %v457_v55  ;;  %v614_v60 = vmul.f32 %v4020_v38, %v457_v55  ;;  %v4072_v1 = vadd.f32 %v4010_v29, %v489_v47  ;;  %v724_v11 = vmul.f32 %v4076_v4, %v457_v55 }
 0x2a1   :  { %905 = vmatpush.msra.mxu1 %v884_v48  ;;  %3365 = vmatmul.msk.f32.vlgmr.msrb.gmra.mxu3 %vm101_vm5, %v525_v49  ;;  %v4058_v62 = vadd.f32 %v3518_v28, %v519_v52  ;;  %v805_v12 = vmul.f32 %v4034_v46, %v457_v55 }
 0x2a2   :  { %3373 = vmatpush.xpose.msk.msra.mxu3 %vm101_vm5, %v487_v33  ;;  %3377 = vmatpush.xpose.msk.msra.mxu2 %vm101_vm5, %v487_v33 }
 0x2a3   :  { %3369 = vmatmul.msk.f32.vlgmr.msrb.gmra.mxu2 %vm101_vm5, %v613_v50  ;;  %906 = vmatpush.msra.mxu1 %v883_v53  ;;  %v1141_v3 = vmul.f32 %v4020_v38, %v4058_v62 }
 0x2a5   :  { %v459_v9 = vpop.f32.mrf.mxu2 }
 0x2a6   :  { %3374 = vmatpush.xpose.msk.msra.mxu3 %vm101_vm5, %v484_v43  ;;  %3378 = vmatpush.xpose.msk.msra.mxu2 %vm101_vm5, %v484_v43  ;;  %v4096_v13 = vadd.f32 %v4012_v31, %v459_v9 }
 0x2a7   :  { %v492_v56 = vpop.f32.mrf.mxu1 }
 0x2a8   :  { %v522_v59 = vpop.f32.mrf.mxu0  ;;  %v4061_v63 = vadd.f32 %v4010_v29, %v492_v56  ;;  %v974_v14 = vmul.f32 %v4024_v39, %v4096_v13  ;;  %v1253_v17 = vmul.f32 %v4034_v46, %v4096_v13 }
 0x2a9   :  { %v4063_v0 = vadd.f32 %v3518_v28, %v522_v59  ;;  %3366 = vmatmul.msk.f32.gmra.mxu3 %vm101_vm5, %v526_v57 }
 0x2aa   :  { %3497 = vmatpush.msrb.mxu3 %v612_v42  ;;  %3387 = vmatpush.xpose.msk.msrb.mxu2 %vm101_vm5, %v4061_v63 }
 0x2ab   :  { %3370 = vmatmul.msk.f32.gmra.mxu2 %vm101_vm5, %v614_v60  ;;  %v1142_v27 = vmul.f32 %v4020_v38, %v4063_v0 }
 0x2ac   :  { %3498 = vmatpush.msrb.mxu3 %v611_v45 }
 0x2ad   :  { %1163 = vmatpush.msrb.mxu0 %v1142_v27  ;;  %v462_v15 = vpop.f32.mrf.mxu2 }
 0x2ae   :  { %3388 = vmatpush.xpose.msk.msrb.mxu2 %vm101_vm5, %v4072_v1  ;;  %v4102_v16 = vadd.f32 %v4012_v31, %v462_v15 }
 0x2af   :  { %1164 = vmatpush.msrb.mxu0 %v1141_v3 }
 0x2b0   :  { %v975_v2 = vmul.f32 %v4024_v39, %v4102_v16  ;;  %v1254_v18 = vmul.f32 %v4034_v46, %v4102_v16 }
 0x2b1   :  { %3375 = vmatmul.msk.f32.vlgmr.msra.gmra.mxu3 %vm101_vm5, %v723_v61 }
 0x2b2   :  { %963 = vmatpush.msra.mxu3 %v803_v6 }
 0x2b3   :  { %3379 = vmatmul.msk.f32.vlgmr.msra.gmra.mxu2 %vm101_vm5, %v804_v5 }
 0x2b4   :  { %3401 = vmatpush.xpose.msk.msra.mxu2 %vm101_vm5, %v4061_v63  ;;  %964 = vmatpush.msra.mxu3 %v802_v7 }
 0x2b8   :  { %3402 = vmatpush.xpose.msk.msra.mxu2 %vm101_vm5, %v4072_v1 }
 0x2b9   :  { %3376 = vmatmul.msk.f32.gmra.mxu3 %vm101_vm5, %v724_v11 }
 0x2bb   :  { %3380 = vmatmul.msk.f32.gmra.mxu2 %vm101_vm5, %v805_v12 }
 0x2c3   :  { %3389 = vmatmul.msk.f32.vlgmr.msrb.gmra.mxu2 %vm101_vm5, %v974_v14 }
 0x2cb   :  { %3390 = vmatmul.msk.f32.gmra.mxu2 %vm101_vm5, %v975_v2 }
 0x2d3   :  { %3403 = vmatmul.msk.f32.vlgmr.msra.gmra.mxu2 %vm101_vm5, %v1253_v17 }
 0x2db   :  { %3404 = vmatmul.msk.f32.gmra.mxu2 %vm101_vm5, %v1254_v18 }
 0x324   :  { %v4121_v25 = vpop.f32.mrf.mxu3 }
 0x326   :  { %v638_v8 = vpop.f32.mrf.mxu2 }
 0x327   :  { %v639_v10 = vadd.f32 %v638_v8, %v4119_v24 }
 0x329   :  { %v644_v26 = vsel %vm138_vm2, %v639_v10, -inf }
 0x32a   :  { %645 = vmax.xlane.f32.xlu1 %v644_v26 }
 0x32c   :  { %v560_v28 = vpop.f32.mrf.mxu3 }
 0x32d   :  { %v561_v32 = vadd.f32 %v560_v28, %v4119_v24 }
 0x32e   :  { %v641_v29 = vpop.f32.mrf.mxu2 }
 0x32f   :  { %v642_v30 = vadd.f32 %v641_v29, %v4119_v24  ;;  %v566_v37 = vsel %vm138_vm2, %v561_v32, -inf  ;;  %v4163_v29 = vadd.f32 %v4121_v25, %v4119_v24 }
 0x331   :  { %v647_v31 = vsel %vm138_vm2, %v642_v30, -inf }
 0x332   :  { %648 = vmax.xlane.f32.xlu1 %v647_v31 }
 0x334   :  { %v748_v35 = vpop.f32.mrf.mxu3 }
 0x335   :  { %v749_v40 = vadd.f32 %v748_v35, %v4119_v24 }
 0x336   :  { %v829_v33 = vpop.f32.mrf.mxu2 }
 0x337   :  { %v830_v34 = vadd.f32 %v829_v33, %v4119_v24  ;;  %v754_v44 = vsel %vm138_vm2, %v749_v40, -inf }
 0x339   :  { %v835_v36 = vsel %vm138_vm2, %v830_v34, -inf }
 0x33a   :  { %836 = vmax.xlane.f32.xlu2 %v835_v36  ;;  %567 = vmax.xlane.f32.xlu1 %v566_v37 }
 0x33c   :  { %v751_v45 = vpop.f32.mrf.mxu3 }
 0x33d   :  { %v752_v47 = vadd.f32 %v751_v45, %v4119_v24 }
 0x33e   :  { %v832_v41 = vpop.f32.mrf.mxu2 }
 0x33f   :  { %v833_v42 = vadd.f32 %v832_v41, %v4119_v24  ;;  %v757_v48 = vsel %vm138_vm2, %v752_v47, -inf }
 0x341   :  { %v838_v43 = vsel %vm138_vm2, %v833_v42, -inf }
 0x342   :  { %839 = vmax.xlane.f32.xlu0 %v838_v43  ;;  %755 = vmax.xlane.f32.xlu1 %v754_v44 }
 0x34a   :  { %758 = vmax.xlane.f32.xlu1 %v757_v48 }
 0x39d   :  { %v646_v49 = vpop.xlane.xlu1 %645 }
 0x39e   :  { %v650_v50 = vsub.f32 %v639_v10, %v646_v49 }
 0x3a0   :  { %v652_v51 = vmul.f32 1.442695, %v650_v50 }
 0x3a2   :  { %3549 = vpow2.f32 %v652_v51 }
 0x3a5   :  { %v649_v52 = vpop.xlane.xlu1 %648 }
 0x3a6   :  { %v651_v53 = vsub.f32 %v642_v30, %v649_v52 }
 0x3a8   :  { %v4137_v54 = vpop.eup %3549  ;;  %v654_v55 = vmul.f32 1.442695, %v651_v53 }
 0x3a9   :  { %v656_v56 = vsel %vm138_vm2, %v4137_v54, 0.0 }
 0x3aa   :  { %3551 = vpow2.f32 %v654_v55  ;;  %657 = vadd.xlane.f32.xlu0 %v656_v56 }
 0x3ad   :  { %v837_v57 = vpop.xlane.xlu2 %836  ;;  %v568_v59 = vpop.xlane.xlu1 %567 }
 0x3ae   :  { %v841_v60 = vsub.f32 %v830_v34, %v837_v57  ;;  %v570_v27 = vsub.f32 %v561_v32, %v568_v59  ;;  %v563_v32 = vsel %vm138_vm2, %v4163_v29, -inf }
 0x3b0   :  { %v4141_v3 = vpop.eup %3551  ;;  %v843_v61 = vmul.f32 1.442695, %v841_v60  ;;  %v573_v5 = vmul.f32 1.442695, %v570_v27  ;;  %v1332_v60 = vmul.f32 %v4034_v46, %v4058_v62 }
 0x3b1   :  { %v659_v6 = vsel %vm138_vm2, %v4141_v3, 0.0 }
 0x3b2   :  { %3553 = vpow2.f32 %v843_v61  ;;  %660 = vadd.xlane.f32.xlu1 %v659_v6 }
 0x3b3   :  { %3555 = vpow2.f32 %v573_v5 }
 0x3b5   :  { %v840_v7 = vpop.xlane.xlu0 %839  ;;  %v756_v9 = vpop.xlane.xlu1 %755 }
 0x3b6   :  { %v842_v11 = vsub.f32 %v833_v42, %v840_v7  ;;  %v760_v12 = vsub.f32 %v749_v40, %v756_v9 }
 0x3b8   :  { %v4145_v14 = vpop.eup %3553  ;;  %v845_v15 = vmul.f32 1.442695, %v842_v11  ;;  %v762_v2 = vmul.f32 1.442695, %v760_v12 }
 0x3b9   :  { %v4147_v17 = vpop.eup %3555  ;;  %v847_v18 = vsel %vm138_vm2, %v4145_v14, 0.0 }
 0x3ba   :  { %3557 = vpow2.f32 %v845_v15  ;;  %848 = vadd.xlane.f32.xlu1 %v847_v18  ;;  %v578_v19 = vsel %vm138_vm2, %v4147_v17, 0.0 }
 0x3bb   :  { %3559 = vpow2.f32 %v762_v2  ;;  %579 = vadd.xlane.f32.xlu0 %v578_v19 }
 0x3bd   :  { %v759_v20 = vpop.xlane.xlu1 %758 }
 0x3be   :  { %v761_v21 = vsub.f32 %v752_v47, %v759_v20 }
 0x3c0   :  { %v4153_v22 = vpop.eup %3557  ;;  %v764_v8 = vmul.f32 1.442695, %v761_v21 }
 0x3c1   :  { %v4155_v10 = vpop.eup %3559  ;;  %v850_v26 = vsel %vm138_vm2, %v4153_v22, 0.0 }
 0x3c2   :  { %3561 = vpow2.f32 %v764_v8  ;;  %851 = vadd.xlane.f32.xlu1 %v850_v26  ;;  %v766_v28 = vsel %vm138_vm2, %v4155_v10, 0.0 }
 0x3c3   :  { %767 = vadd.xlane.f32.xlu0 %v766_v28 }
 0x3c8   :  { %v4165_v30 = vpop.eup %3561 }
 0x3c9   :  { %v769_v31 = vsel %vm138_vm2, %v4165_v30, 0.0 }
 0x3ca   :  { %770 = vadd.xlane.f32.xlu2 %v769_v31 }
 0x3cb   :  { %564 = vmax.xlane.f32.xlu0 %v563_v32 }
 0x41d   :  { %v658_v33 = vpop.xlane.xlu0 %657 }
 0x41e   :  { %3563 = vrcp.f32 %v658_v33  ;;  %v673_v40 = vand.u32 2147483648, %v658_v33  ;;  %v671_v41 = vand.u32 2147483647, %v658_v33  ;;  %vm667_vm1 = vweird.f32 %v658_v33 }
 0x420   :  { %v674_v44 = vor.u32 1.1754944e-38, %v673_v40  ;;  %vm672_vm4 = vcmp.eq.f32.partialorder %v671_v41, 8.507059e+37 }
 0x424   :  { %v3564_v34 = vpop.eup %3563 }
 0x425   :  { %v663_v35 = vmul.f32 %v3564_v34, %v658_v33  ;;  %v661_v36 = vpop.xlane.xlu1 %660  ;;  %vm668_vm0 = vweird.f32 %v3564_v34 }
 0x426   :  { %3565 = vrcp.f32 %v661_v36  ;;  %vm669_vm3 = vmor %vm667_vm1, %vm668_vm0  ;;  %v688_v55 = vand.u32 2147483648, %v661_v36  ;;  %vm682_vm7 = vweird.f32 %v661_v36  ;;  %v686_v57 = vand.u32 2147483647, %v661_v36 }
 0x427   :  { %v664_v37 = vsub.f32 1.0, %v663_v35 }
 0x428   :  { %v689_v6 = vor.u32 1.1754944e-38, %v688_v55  ;;  %vm687_vm9 = vcmp.eq.f32.partialorder %v686_v57, 8.507059e+37 }
 0x429   :  { %v665_v25 = vmul.f32 %v3564_v34, %v664_v37 }
 0x42b   :  { %v666_v42 = vadd.f32 %v3564_v34, %v665_v25 }
 0x42c   :  { %v3566_v43 = vpop.eup %3565 }
 0x42d   :  { %v670_v45 = vsel %vm669_vm3, %v3564_v34, %v666_v42  ;;  %v678_v47 = vmul.f32 %v3566_v43, %v661_v36  ;;  %v849_v48 = vpop.xlane.xlu1 %848  ;;  %vm683_vm6 = vweird.f32 %v3566_v43 }
 0x42e   :  { %v675_v49 = vsel %vm672_vm4, %v674_v44, %v670_v45  ;;  %v580_v50 = vpop.xlane.xlu0 %579  ;;  %3567 = vrcp.f32 %v849_v48  ;;  %vm4175_vm8 = vmor %vm682_vm7, %vm683_vm6  ;;  %v862_v12 = vand.u32 2147483647, %v849_v48  ;;  %v864_v18 = vand.u32 2147483648, %v849_v48 }
 0x42f   :  { %v679_v51 = vsub.f32 1.0, %v678_v47  ;;  %3569 = vrcp.f32 %v580_v50  ;;  %v676_v52 = vmul.f32 %v4137_v54, %v675_v49  ;;  %v605_v2 = vand.u32 2147483647, %v580_v50 }
 0x430   :  { %v607_v20 = vand.u32 2147483648, %v580_v50  ;;  %vm858_vm12 = vweird.f32 %v849_v48  ;;  %vm601_vm13 = vweird.f32 %v580_v50  ;;  %vm863_vm15 = vcmp.eq.f32.partialorder %v862_v12, 8.507059e+37 }
 0x431   :  { %v680_v53 = vmul.f32 %v3566_v43, %v679_v51  ;;  %3371 = vmatmul.msk.f32.vlgmr.msrb.gmra.mxu1 %vm138_vm2, %v676_v52  ;;  %v865_v33 = vor.u32 1.1754944e-38, %v864_v18  ;;  %vm606_vm1 = vcmp.eq.f32.partialorder %v605_v2, 8.507059e+37  ;;  %v1252_v18 = vmul.f32 %v4076_v4, %v4063_v0 }
 0x432   :  { %3391 = vmatpush.xpose.msk.msrb.mxu1 %vm101_vm5, %v4061_v63  ;;  %v608_v35 = vor.u32 1.1754944e-38, %v607_v20 }
 0x433   :  { %v681_v56 = vadd.f32 %v3566_v43, %v680_v53 }
 0x434   :  { %v3568_v59 = vpop.eup %3567 }
 0x435   :  { %v3570_v27 = vpop.eup %3569  ;;  %v854_v61 = vmul.f32 %v3568_v59, %v849_v48  ;;  %v4179_v5 = vpop.xlane.xlu1 %851  ;;  %v685_v54 = vsel %vm4175_vm8, %v3566_v43, %v681_v56  ;;  %vm859_vm10 = vweird.f32 %v3568_v59 }
 0x436   :  { %v597_v7 = vmul.f32 %v3570_v27, %v580_v50  ;;  %v4183_v9 = vpop.xlane.xlu0 %767  ;;  %3571 = vrcp.f32 %v4179_v5  ;;  %3392 = vmatpush.xpose.msk.msrb.mxu1 %vm101_vm5, %v4072_v1  ;;  %v690_v19 = vsel %vm687_vm9, %v689_v6, %v685_v54  ;;  %vm602_vm11 = vweird.f32 %v3570_v27  ;;  %vm860_vm14 = vmor %vm858_vm12, %vm859_vm10 }
 0x437   :  { %v855_v11 = vsub.f32 1.0, %v854_v61  ;;  %3573 = vrcp.f32 %v4183_v9  ;;  %v691_v8 = vmul.f32 %v4141_v3, %v690_v19  ;;  %vm603_vm0 = vmor %vm601_vm13, %vm602_vm11  ;;  %v783_v42 = vand.u32 2147483648, %v4183_v9 }
 0x438   :  { %v598_v15 = vsub.f32 1.0, %v597_v7  ;;  %v879_v49 = vand.u32 2147483648, %v4179_v5  ;;  %v877_v51 = vand.u32 2147483647, %v4179_v5  ;;  %v781_v57 = vand.u32 2147483647, %v4183_v9 }
 0x439   :  { %v856_v21 = vmul.f32 %v3568_v59, %v855_v11  ;;  %3372 = vmatmul.msk.f32.gmra.mxu1 %vm138_vm2, %v691_v8  ;;  %vm873_vm6 = vweird.f32 %v4179_v5  ;;  %vm777_vm7 = vweird.f32 %v4183_v9  ;;  %v784_v61 = vor.u32 1.1754944e-38, %v783_v42 }
 0x43a   :  { %v599_v26 = vmul.f32 %v3570_v27, %v598_v15  ;;  %vm878_vm10 = vcmp.eq.f32.partialorder %v877_v51, 8.507059e+37  ;;  %vm782_vm11 = vcmp.eq.f32.partialorder %v781_v57, 8.507059e+37 }
 0x43b   :  { %v857_v28 = vadd.f32 %v3568_v59, %v856_v21 }
 0x43c   :  { %v3572_v31 = vpop.eup %3571  ;;  %v600_v32 = vadd.f32 %v3570_v27, %v599_v26 }
 0x43d   :  { %v3574_v34 = vpop.eup %3573  ;;  %v861_v36 = vsel %vm860_vm14, %v3568_v59, %v857_v28  ;;  %v869_v37 = vmul.f32 %v3572_v31, %v4179_v5  ;;  %v4192_v3 = vpop.xlane.xlu2 %770  ;;  %vm874_vm3 = vweird.f32 %v3572_v31 }
 0x43e   :  { %v604_v40 = vsel %vm603_vm0, %v3570_v27, %v600_v32  ;;  %v866_v25 = vsel %vm863_vm15, %v865_v33, %v861_v36  ;;  %v773_v41 = vmul.f32 %v3574_v34, %v4183_v9  ;;  %v565_v43 = vpop.xlane.xlu0 %564  ;;  %3575 = vrcp.f32 %v4192_v3  ;;  %vm875_vm8 = vmor %vm873_vm6, %vm874_vm3 }
 0x43f   :  { %v609_v44 = vsel %vm606_vm1, %v608_v35, %v604_v40  ;;  %v870_v45 = vsub.f32 1.0, %v869_v37  ;;  %v569_v47 = vsub.f32 %v4163_v29, %v565_v43  ;;  %v867_v50 = vmul.f32 %v4145_v14, %v866_v25 }
 0x440   :  { %v774_v48 = vsub.f32 1.0, %v773_v41  ;;  %v610_v55 = vmul.f32 %v4147_v17, %v609_v44  ;;  %vm778_vm4 = vweird.f32 %v3574_v34  ;;  %v1333_v29 = vmul.f32 %v4034_v46, %v4063_v0 }
 0x441   :  { %v871_v52 = vmul.f32 %v3572_v31, %v870_v45  ;;  %v571_v53 = vmul.f32 1.442695, %v569_v47  ;;  %3381 = vmatmul.msk.f32.vlgmr.msra.gmra.mxu1 %vm138_vm2, %v867_v50  ;;  %v880_v17 = vor.u32 1.1754944e-38, %v879_v49  ;;  %vm779_vm9 = vmor %vm777_vm7, %vm778_vm4  ;;  %v798_v2 = vand.u32 2147483648, %v4192_v3 }
 0x442   :  { %v775_v56 = vmul.f32 %v3574_v34, %v774_v48  ;;  %3384 = vmatmul.msk.f32.vlgmr.msrb.gmra.mxu3 %vm138_vm2, %v610_v55  ;;  %1354 = vmatpush.msra.mxu1 %v1333_v29  ;;  %v796_v21 = vand.u32 2147483647, %v4192_v3  ;;  %vm792_vm13 = vweird.f32 %v4192_v3  ;;  %v1172_v32 = vmul.f32 %v4076_v4, %v4096_v13 }
 0x443   :  { %3577 = vpow2.f32 %v571_v53  ;;  %v872_v14 = vadd.f32 %v3572_v31, %v871_v52  ;;  %3397 = vmatpush.xpose.msk.msrb.mxu3 %vm101_vm5, %v4061_v63  ;;  %v1063_v33 = vmul.f32 %v4020_v38, %v4102_v16  ;;  %v4247_v49 = vperm.slane %v4116_v23, 1 }
 0x444   :  { %v776_v59 = vadd.f32 %v3574_v34, %v775_v56  ;;  %v3576_v27 = vpop.eup %3575  ;;  %1355 = vmatpush.msra.mxu1 %v1332_v60  ;;  %vm797_vm15 = vcmp.eq.f32.partialorder %v796_v21, 8.507059e+37  ;;  %v1061_v29 = vmul.f32 %v4024_v39, %v4063_v0  ;;  %v1060_v23 = vmul.f32 %v4024_v39, %v4058_v62 }
 0x445   :  { %v876_v5 = vsel %vm875_vm8, %v3572_v31, %v872_v14  ;;  %v788_v6 = vmul.f32 %v3576_v27, %v4192_v3  ;;  %vm793_vm12 = vweird.f32 %v3576_v27  ;;  %v1062_v31 = vmul.f32 %v4020_v38, %v4096_v13  ;;  %v1006_v13 = vpop.f32.mrf.mxu2 }
 0x446   :  { %v780_v54 = vsel %vm779_vm9, %v3574_v34, %v776_v59  ;;  %v881_v7 = vsel %vm878_vm10, %v880_v17, %v876_v5  ;;  %vm794_vm14 = vmor %vm792_vm13, %vm793_vm12  ;;  %v1007_v17 = vadd.f32 %v1006_v13, %v4247_v49 }
 0x447   :  { %v785_v9 = vsel %vm782_vm11, %v784_v61, %v780_v54  ;;  %v882_v63 = vmul.f32 %v4153_v22, %v881_v7  ;;  %v789_v11 = vsub.f32 1.0, %v788_v6  ;;  %3398 = vmatpush.xpose.msk.msrb.mxu3 %vm101_vm5, %v4072_v1  ;;  %v1251_v1 = vmul.f32 %v4076_v4, %v4058_v62 }
 0x448   :  { %v786_v12 = vmul.f32 %v4155_v10, %v785_v9  ;;  %v799_v10 = vor.u32 1.1754944e-38, %v798_v2  ;;  %v1012_v6 = vsel %vm138_vm2, %v1007_v17, -inf }
 0x449   :  { %v3578_v15 = vpop.eup %3577  ;;  %v790_v19 = vmul.f32 %v3576_v27, %v789_v11  ;;  %3382 = vmatmul.msk.f32.gmra.mxu1 %vm138_vm2, %v882_v63 }
 0x44a   :  { %v575_v20 = vsel %vm138_vm2, %v3578_v15, 0.0  ;;  %3385 = vmatmul.msk.f32.vlgmr.msra.gmra.mxu3 %vm138_vm2, %v786_v12 }
 0x44b   :  { %1412 = vmatpush.msra.mxu3 %v1252_v18  ;;  %576 = vadd.xlane.f32.xlu1 %v575_v20  ;;  %v791_v22 = vadd.f32 %v3576_v27, %v790_v19 }
 0x44d   :  { %1413 = vmatpush.msra.mxu3 %v1251_v1  ;;  %v795_v8 = vsel %vm794_vm14, %v3576_v27, %v791_v22  ;;  %v1009_v52 = vpop.f32.mrf.mxu2 }
 0x44e   :  { %v800_v26 = vsel %vm797_vm15, %v799_v10, %v795_v8  ;;  %v1010_v62 = vadd.f32 %v1009_v52, %v4247_v49  ;;  %v400_v10 = vld [vmem:[#allocation3 + $0x198] sm:$0xff]  ;;  %v399_v8 = vld [vmem:[#allocation3 + $0x190] sm:$0xff] }
 0x44f   :  { %v801_v28 = vmul.f32 %v4165_v30, %v800_v26  ;;  %v1173_v30 = vmul.f32 %v4076_v4, %v4102_v16  ;;  %1448 = vmatpush.msrb.mxu2 %v400_v10  ;;  %v398_v26 = vld [vmem:[#allocation3 + $0x188] sm:$0xff] }
 0x450   :  { %v1015_v2 = vsel %vm138_vm2, %v1010_v62, -inf }
 0x451   :  { %3393 = vmatmul.msk.f32.vlgmr.msrb.gmra.mxu1 %vm101_vm5, %v1062_v31  ;;  %1449 = vmatpush.msrb.mxu2 %v399_v8 }
 0x452   :  { %3386 = vmatmul.msk.f32.gmra.mxu3 %vm138_vm2, %v801_v28  ;;  %v397_v28 = vld [vmem:[#allocation3 + $0x180] sm:$0xff] }
 0x453   :  { %1450 = vmatpush.msrb.mxu2 %v398_v26 }
 0x455   :  { %v1278_v54 = vpop.f32.mrf.mxu2  ;;  %1451 = vmatpush.msrb.mxu2 %v397_v28 }
 0x456   :  { %v1279_v63 = vadd.f32 %v1278_v54, %v4247_v49 }
 0x459   :  { %3394 = vmatmul.msk.f32.gmra.mxu1 %vm101_vm5, %v1063_v33 }
 0x45a   :  { %3399 = vmatmul.msk.f32.vlgmr.msrb.gmra.mxu3 %vm101_vm5, %v1172_v32 }
 0x45d   :  { %v1281_v18 = vpop.f32.mrf.mxu2 }
 0x45e   :  { %v1282_v20 = vadd.f32 %v1281_v18, %v4247_v49 }
 0x460   :  { %v1287_v22 = vsel %vm138_vm2, %v1282_v20, -inf }
 0x462   :  { %3400 = vmatmul.msk.f32.gmra.mxu3 %vm101_vm5, %v1173_v30 }
 0x4ae   :  { %v4244_v34 = vpop.f32.mrf.mxu1 }
 0x4b6   :  { %v720_v35 = vpop.f32.mrf.mxu1 }
 0x4be   :  { %v577_v36 = vpop.xlane.xlu1 %576  ;;  %v908_v37 = vpop.f32.mrf.mxu1 }
 0x4bf   :  { %3579 = vrcp.f32 %v577_v36  ;;  %v592_v43 = vand.u32 2147483648, %v577_v36  ;;  %v590_v45 = vand.u32 2147483647, %v577_v36  ;;  %vm586_vm1 = vweird.f32 %v577_v36 }
 0x4c1   :  { %v593_v16 = vor.u32 1.1754944e-38, %v592_v43  ;;  %vm591_vm4 = vcmp.eq.f32.partialorder %v590_v45, 8.507059e+37 }
 0x4c5   :  { %v3580_v3 = vpop.eup %3579  ;;  %v940_v40 = vpop.f32.mrf.mxu3 }
 0x4c6   :  { %v582_v25 = vmul.f32 %v3580_v3, %v577_v36  ;;  %v911_v41 = vpop.f32.mrf.mxu1  ;;  %vm587_vm0 = vweird.f32 %v3580_v3  ;;  %v941_v60 = vadd.f32 %v940_v40, %v720_v35 }
 0x4c7   :  { %vm588_vm3 = vmor %vm586_vm1, %vm587_vm0 }
 0x4c8   :  { %v583_v42 = vsub.f32 1.0, %v582_v25 }
 0x4ca   :  { %v584_v44 = vmul.f32 %v3580_v3, %v583_v42 }
 0x4cc   :  { %v585_v47 = vadd.f32 %v3580_v3, %v584_v44 }
 0x4cd   :  { %v966_v48 = vpop.f32.mrf.mxu3 }
 0x4ce   :  { %v589_v50 = vsel %vm588_vm3, %v3580_v3, %v585_v47  ;;  %v4249_v51 = vadd.f32 %v966_v48, %v908_v37  ;;  %v1087_v55 = vpop.f32.mrf.mxu1 }
 0x4cf   :  { %v594_v53 = vsel %vm591_vm4, %v593_v16, %v589_v50  ;;  %v1088_v56 = vadd.f32 %v1087_v55, %v4247_v49 }
 0x4d0   :  { %v595_v57 = vmul.f32 %v3578_v15, %v594_v53  ;;  %v1284_v15 = vsel %vm138_vm2, %v1279_v63, -inf }
 0x4d1   :  { %v1093_v14 = vsel %vm138_vm2, %v1088_v56, -inf }
 0x4d2   :  { %3383 = vmatmul.msk.f32.vlgmr.msra.gmra.mxu0 %vm138_vm2, %v595_v57  ;;  %1094 = vmax.xlane.f32.xlu2 %v1093_v14 }
 0x4d3   :  { %1383 = vmatpush.msra.mxu0 %v1061_v29 }
 0x4d5   :  { %1384 = vmatpush.msra.mxu0 %v1060_v23  ;;  %v969_v59 = vpop.f32.mrf.mxu3 }
 0x4d6   :  { %v970_v27 = vadd.f32 %v969_v59, %v911_v41  ;;  %v1090_v61 = vpop.f32.mrf.mxu1 }
 0x4d7   :  { %v1091_v0 = vadd.f32 %v1090_v61, %v4247_v49 }
 0x4d8   :  { %v4259_v5 = vadd.f32 %v970_v27, %v941_v60 }
 0x4d9   :  { %v1096_v7 = vsel %vm138_vm2, %v1091_v0, -inf }
 0x4da   :  { %1013 = vmax.xlane.f32.xlu2 %v1012_v6  ;;  %1097 = vmax.xlane.f32.xlu0 %v1096_v7 }
 0x4dd   :  { %v1197_v9 = vpop.f32.mrf.mxu3 }
 0x4de   :  { %v1198_v11 = vadd.f32 %v1197_v9, %v4247_v49 }
 0x4e0   :  { %v1203_v12 = vsel %vm138_vm2, %v1198_v11, -inf }
 0x4e1   :  { %1204 = vmax.xlane.f32.xlu1 %v1203_v12 }
 0x4e2   :  { %1285 = vmax.xlane.f32.xlu0 %v1284_v15  ;;  %1016 = vmax.xlane.f32.xlu2 %v1015_v2 }
 0x4e5   :  { %v1200_v19 = vpop.f32.mrf.mxu3 }
 0x4e6   :  { %v1201_v21 = vadd.f32 %v1200_v19, %v4247_v49 }
 0x4e8   :  { %v1206_v1 = vsel %vm138_vm2, %v1201_v21, -inf }
 0x4e9   :  { %1207 = vmax.xlane.f32.xlu1 %v1206_v1 }
 0x4ea   :  { %1288 = vmax.xlane.f32.xlu0 %v1287_v22 }
 0x545   :  { %v1095_v31 = vpop.xlane.xlu2 %1094 }
 0x546   :  { %v1099_v32 = vsub.f32 %v1088_v56, %v1095_v31 }
 0x548   :  { %v1101_v33 = vmul.f32 1.442695, %v1099_v32 }
 0x54a   :  { %3581 = vpow2.f32 %v1101_v33  ;;  %v4326_v33 = vld [vmem:[#allocation3 + $0x203] ss:$0 sm:$0xff] }
 0x54d   :  { %v1014_v30 = vpop.xlane.xlu2 %1013  ;;  %v1098_v35 = vpop.xlane.xlu0 %1097 }
 0x54e   :  { %v1018_v36 = vsub.f32 %v1007_v17, %v1014_v30  ;;  %v1100_v37 = vsub.f32 %v1091_v0, %v1098_v35 }
 0x54f   :  { %v937_v3 = vpop.f32.mrf.mxu0 }
 0x550   :  { %v938_v13 = vadd.f32 %v937_v3, %v4244_v34  ;;  %v4275_v40 = vpop.eup %3581  ;;  %v1020_v25 = vmul.f32 1.442695, %v1018_v36  ;;  %v1103_v41 = vmul.f32 1.442695, %v1100_v37 }
 0x551   :  { %v1105_v43 = vsel %vm138_vm2, %v4275_v40, 0.0 }
 0x552   :  { %v972_v42 = vadd.f32 %v4249_v51, %v938_v13  ;;  %3583 = vpow2.f32 %v1020_v25  ;;  %1106 = vadd.xlane.f32.xlu1 %v1105_v43 }
 0x553   :  { %3585 = vpow2.f32 %v1103_v41 }
 0x554   :  { %v1205_v44 = vpop.xlane.xlu1 %1204  ;;  %3411 = vmatmul.msk.f32.vlgmr.msrb.gmra.mxu2 %vm101_vm5, %v972_v42 }
 0x555   :  { %v1209_v45 = vsub.f32 %v1198_v11, %v1205_v44  ;;  %v1286_v47 = vpop.xlane.xlu0 %1285  ;;  %v1017_v16 = vpop.xlane.xlu2 %1016 }
 0x556   :  { %v1290_v34 = vsub.f32 %v1279_v63, %v1286_v47  ;;  %v1019_v50 = vsub.f32 %v1010_v62, %v1017_v16 }
 0x557   :  { %v1211_v48 = vmul.f32 1.442695, %v1209_v45 }
 0x558   :  { %v4281_v52 = vpop.eup %3583  ;;  %v1292_v53 = vmul.f32 1.442695, %v1290_v34  ;;  %v1022_v51 = vmul.f32 1.442695, %v1019_v50 }
 0x559   :  { %3587 = vpow2.f32 %v1211_v48  ;;  %v4283_v55 = vpop.eup %3585  ;;  %v1024_v56 = vsel %vm138_vm2, %v4281_v52, 0.0 }
 0x55a   :  { %3589 = vpow2.f32 %v1292_v53  ;;  %1025 = vadd.xlane.f32.xlu1 %v1024_v56  ;;  %v1108_v57 = vsel %vm138_vm2, %v4283_v55, 0.0 }
 0x55b   :  { %3591 = vpow2.f32 %v1022_v51  ;;  %1109 = vadd.xlane.f32.xlu2 %v1108_v57 }
 0x55c   :  { %v1208_v29 = vpop.xlane.xlu1 %1207  ;;  %3412 = vmatmul.msk.f32.gmra.mxu2 %vm101_vm5, %v4259_v5 }
 0x55d   :  { %v1210_v14 = vsub.f32 %v1201_v21, %v1208_v29  ;;  %v1289_v23 = vpop.xlane.xlu0 %1288 }
 0x55e   :  { %v1291_v60 = vsub.f32 %v1282_v20, %v1289_v23 }
 0x55f   :  { %v4291_v59 = vpop.eup %3587  ;;  %v1213_v17 = vmul.f32 1.442695, %v1210_v14 }
 0x560   :  { %v1215_v27 = vsel %vm138_vm2, %v4291_v59, 0.0  ;;  %v4295_v61 = vpop.eup %3589  ;;  %v1294_v0 = vmul.f32 1.442695, %v1291_v60 }
 0x561   :  { %3593 = vpow2.f32 %v1213_v17  ;;  %1216 = vadd.xlane.f32.xlu0 %v1215_v27  ;;  %v4297_v54 = vpop.eup %3591  ;;  %v1296_v6 = vsel %vm138_vm2, %v4295_v61, 0.0 }
 0x562   :  { %3595 = vpow2.f32 %v1294_v0  ;;  %v1027_v5 = vsel %vm138_vm2, %v4297_v54, 0.0 }
 0x563   :  { %1297 = vadd.xlane.f32.xlu2 %v1296_v6  ;;  %1028 = vadd.xlane.f32.xlu1 %v1027_v5 }
 0x567   :  { %v4303_v7 = vpop.eup %3593 }
 0x568   :  { %v1218_v9 = vsel %vm138_vm2, %v4303_v7, 0.0  ;;  %v4307_v62 = vpop.eup %3595 }
 0x569   :  { %1219 = vadd.xlane.f32.xlu0 %v1218_v9  ;;  %v1299_v63 = vsel %vm138_vm2, %v4307_v62, 0.0 }
 0x56b   :  { %1300 = vadd.xlane.f32.xlu2 %v1299_v63 }
 0x5c5   :  { %v1107_v11 = vpop.xlane.xlu1 %1106 }
 0x5c6   :  { %3597 = vrcp.f32 %v1107_v11  ;;  %v1122_v21 = vand.u32 2147483648, %v1107_v11  ;;  %v1120_v1 = vand.u32 2147483647, %v1107_v11  ;;  %vm1116_vm7 = vweird.f32 %v1107_v11 }
 0x5c8   :  { %v1123_v31 = vor.u32 1.1754944e-38, %v1122_v21  ;;  %vm1121_vm9 = vcmp.eq.f32.partialorder %v1120_v1, 8.507059e+37 }
 0x5cc   :  { %v3598_v12 = vpop.eup %3597 }
 0x5cd   :  { %v1112_v15 = vmul.f32 %v3598_v12, %v1107_v11  ;;  %v4311_v2 = vpop.xlane.xlu1 %1025  ;;  %vm1117_vm6 = vweird.f32 %v3598_v12 }
 0x5ce   :  { %3599 = vrcp.f32 %v4311_v2  ;;  %v4314_v18 = vpop.xlane.xlu2 %1109  ;;  %vm1118_vm8 = vmor %vm1116_vm7, %vm1117_vm6  ;;  %v1041_v30 = vand.u32 2147483648, %v4311_v2  ;;  %v1039_v44 = vand.u32 2147483647, %v4311_v2  ;;  %vm1035_vm11 = vweird.f32 %v4311_v2 }
 0x5cf   :  { %v1113_v19 = vsub.f32 1.0, %v1112_v15  ;;  %3601 = vrcp.f32 %v4314_v18  ;;  %v1137_v13 = vand.u32 2147483648, %v4314_v18  ;;  %v1135_v41 = vand.u32 2147483647, %v4314_v18 }
 0x5d0   :  { %vm1131_vm10 = vweird.f32 %v4314_v18  ;;  %v4344_v48 = vor.u32 1.1754944e-38, %v1041_v30  ;;  %vm4378_vm1 = vcmp.eq.f32.partialorder %v1039_v44, 8.507059e+37 }
 0x5d1   :  { %v1114_v20 = vmul.f32 %v3598_v12, %v1113_v19  ;;  %v1138_v51 = vor.u32 1.1754944e-38, %v1137_v13  ;;  %vm4353_vm13 = vcmp.eq.f32.partialorder %v1135_v41, 8.507059e+37  ;;  %v3728_v41 = vld [vmem:[#allocation2 + $0x8] sm:$0xff] }
 0x5d3   :  { %v1115_v22 = vadd.f32 %v3598_v12, %v1114_v20 }
 0x5d4   :  { %v4317_v10 = vpop.xlane.xlu0 %1216  ;;  %v4319_v8 = vpop.eup %3599 }
 0x5d5   :  { %3603 = vrcp.f32 %v4317_v10  ;;  %v4322_v26 = vpop.eup %3601  ;;  %v1119_v28 = vsel %vm1118_vm8, %v3598_v12, %v1115_v22  ;;  %v1031_v32 = vmul.f32 %v4319_v8, %v4311_v2  ;;  %v1230_v45 = vand.u32 2147483647, %v4317_v10 }
 0x5d6   :  { %v1127_v35 = vmul.f32 %v4322_v26, %v4314_v18  ;;  %v4331_v36 = vpop.xlane.xlu1 %1028  ;;  %v4333_v37 = vpop.xlane.xlu2 %1297  ;;  %v1124_v3 = vsel %vm1121_vm9, %v1123_v31, %v1119_v28  ;;  %v1232_v50 = vand.u32 2147483648, %v4317_v10  ;;  %vm1226_vm12 = vweird.f32 %v4317_v10 }
 0x5d7   :  { %3605 = vrcp.f32 %v4331_v36  ;;  %v1453_v25 = vpop.f32.mrf.mxu2  ;;  %v1032_v42 = vsub.f32 1.0, %v1031_v32  ;;  %v1125_v53 = vmul.f32 %v4275_v40, %v1124_v3  ;;  %vm1036_vm14 = vweird.f32 %v4319_v8  ;;  %v3727_v40 = vld [vmem:[#allocation2] sm:$0xff] }
 0x5d8   :  { %v1128_v43 = vsub.f32 1.0, %v1127_v35  ;;  %3607 = vrcp.f32 %v4333_v37  ;;  %v1454_v47 = vadd.f32 %v4326_v33, %v1453_v25  ;;  %vm4365_vm15 = vcmp.eq.f32.partialorder %v1230_v45, 8.507059e+37  ;;  %vm4405_vm9 = vmor %vm1035_vm11, %vm1036_vm14 }
 0x5d9   :  { %v1033_v14 = vmul.f32 %v4319_v8, %v1032_v42  ;;  %3395 = vmatmul.msk.f32.vlgmr.msrb.gmra.mxu0 %vm138_vm2, %v1125_v53  ;;  %vm1132_vm0 = vweird.f32 %v4322_v26  ;;  %v1233_v5 = vor.u32 1.1754944e-38, %v1232_v50  ;;  %v1056_v63 = vand.u32 2147483648, %v4331_v36 }
 0x5da   :  { %v1129_v34 = vmul.f32 %v4322_v26, %v1128_v43  ;;  %v4361_v23 = vadd.f32 %v3727_v40, %v1454_v47  ;;  %vm1307_vm4 = vweird.f32 %v4333_v37  ;;  %v1311_v22 = vand.u32 2147483647, %v4333_v37  ;;  %vm1133_vm6 = vmor %vm1131_vm10, %vm1132_vm0 }
 0x5db   :  { %v3604_v16 = vpop.eup %3603  ;;  %v1034_v1 = vadd.f32 %v4319_v8, %v1033_v14  ;;  %v1313_v13 = vand.u32 2147483648, %v4333_v37  ;;  %vm1050_vm10 = vweird.f32 %v4331_v36 }
 0x5dc   :  { %v1222_v56 = vmul.f32 %v3604_v16, %v4317_v10  ;;  %v4351_v57 = vpop.xlane.xlu0 %1219  ;;  %v1130_v0 = vadd.f32 %v4322_v26, %v1129_v34  ;;  %v1469_v11 = vsel %vm101_vm5, %v4361_v23, 0.0  ;;  %vm1227_vm3 = vweird.f32 %v3604_v16 }
 0x5dd   :  { %3609 = vrcp.f32 %v4351_v57  ;;  %v4363_v17 = vpop.eup %3605  ;;  %1470 = vadd.xlane.f32.xlu0 %v1469_v11  ;;  %vm1228_vm7 = vmor %vm1226_vm12, %vm1227_vm3  ;;  %v1038_v45 = vsel %vm4405_vm9, %v4319_v8, %v1034_v1  ;;  %vm4417_vm12 = vcmp.eq.f32.partialorder %v1311_v22, 8.507059e+37  ;;  %v1314_v8 = vor.u32 1.1754944e-38, %v1313_v13 }
 0x5de   :  { %v1223_v60 = vsub.f32 1.0, %v1222_v56  ;;  %v3608_v6 = vpop.eup %3607  ;;  %v1046_v9 = vmul.f32 %v4363_v17, %v4331_v36  ;;  %v4376_v12 = vpop.xlane.xlu2 %1300  ;;  %v1134_v35 = vsel %vm1133_vm6, %v4322_v26, %v1130_v0  ;;  %v1247_v56 = vand.u32 2147483648, %v4351_v57 }
 0x5df   :  { %v1303_v20 = vmul.f32 %v3608_v6, %v4333_v37  ;;  %3611 = vrcp.f32 %v4376_v12  ;;  %v1456_v21 = vpop.f32.mrf.mxu2  ;;  %vm1308_vm8 = vweird.f32 %v3608_v6  ;;  %v1139_v25 = vsel %vm4353_vm13, %v1138_v51, %v1134_v35 }
 0x5e0   :  { %v1224_v19 = vmul.f32 %v3604_v16, %v1223_v60  ;;  %v1457_v28 = vadd.f32 %v4326_v33, %v1456_v21  ;;  %v1047_v32 = vsub.f32 1.0, %v1046_v9  ;;  %v1140_v44 = vmul.f32 %v4283_v55, %v1139_v25  ;;  %vm1309_vm11 = vmor %vm1307_vm4, %vm1308_vm8 }
 0x5e1   :  { %v1304_v30 = vsub.f32 1.0, %v1303_v20  ;;  %vm1241_vm13 = vweird.f32 %v4351_v57  ;;  %v1245_v60 = vand.u32 2147483647, %v4351_v57  ;;  %v1328_v0 = vand.u32 2147483648, %v4376_v12 }
 0x5e2   :  { %v1225_v31 = vadd.f32 %v3604_v16, %v1224_v19  ;;  %v4399_v42 = vadd.f32 %v3728_v41, %v1457_v28  ;;  %v1048_v50 = vmul.f32 %v4363_v17, %v1047_v32  ;;  %3396 = vmatmul.msk.f32.gmra.mxu0 %vm138_vm2, %v1140_v44  ;;  %v1248_v11 = vor.u32 1.1754944e-38, %v1247_v56 }
 0x5e3   :  { %v3610_v3 = vpop.eup %3609  ;;  %v1305_v10 = vmul.f32 %v3608_v6, %v1304_v30  ;;  %vm1322_vm4 = vweird.f32 %v4376_v12 }
 0x5e4   :  { %v1229_v26 = vsel %vm1228_vm7, %v3604_v16, %v1225_v31  ;;  %v1237_v43 = vmul.f32 %v3610_v3, %v4351_v57  ;;  %v1472_v16 = vsel %vm101_vm5, %v4399_v42, 0.0  ;;  %vm1242_vm14 = vweird.f32 %v3610_v3 }
 0x5e5   :  { %v1234_v47 = vsel %vm4365_vm15, %v1233_v5, %v1229_v26  ;;  %v3612_v34 = vpop.eup %3611  ;;  %v1306_v53 = vadd.f32 %v3608_v6, %v1305_v10  ;;  %1473 = vadd.xlane.f32.xlu1 %v1472_v16  ;;  %vm1051_vm15 = vweird.f32 %v4363_v17  ;;  %vm1243_vm0 = vmor %vm1241_vm13, %vm1242_vm14  ;;  %v1329_v57 = vor.u32 1.1754944e-38, %v1328_v0 }
 0x5e6   :  { %v1238_v51 = vsub.f32 1.0, %v1237_v43  ;;  %v1235_v55 = vmul.f32 %v4291_v59, %v1234_v47  ;;  %v1318_v29 = vmul.f32 %v3612_v34, %v4376_v12  ;;  %v1043_v59 = vsel %vm4378_vm1, %v4344_v48, %v1038_v45  ;;  %vm1052_vm6 = vmor %vm1050_vm10, %vm1051_vm15 }
 0x5e7   :  { %v1310_v14 = vsel %vm1309_vm11, %v3608_v6, %v1306_v53  ;;  %v1049_v6 = vadd.f32 %v4363_v17, %v1048_v50  ;;  %vm1323_vm3 = vweird.f32 %v3612_v34  ;;  %v1326_v48 = vand.u32 2147483647, %v4376_v12 }
 0x5e8   :  { %v1239_v40 = vmul.f32 %v3610_v3, %v1238_v51  ;;  %3409 = vmatmul.msk.f32.vlgmr.msra.gmra.mxu3 %vm138_vm2, %v1235_v55  ;;  %v1315_v37 = vsel %vm4417_vm12, %v1314_v8, %v1310_v14  ;;  %v1319_v27 = vsub.f32 1.0, %v1318_v29  ;;  %v1044_v15 = vmul.f32 %v4281_v52, %v1043_v59  ;;  %vm1324_vm7 = vmor %vm1322_vm4, %vm1323_vm3  ;;  %v403_v55 = vld [vmem:[#allocation3 + $0x1b0] sm:$0xff]  ;;  %v402_v8 = vld [vmem:[#allocation3 + $0x1a8] sm:$0xff] }
 0x5e9   :  { %v1316_v5 = vmul.f32 %v4295_v61, %v1315_v37  ;;  %vm1246_vm1 = vcmp.eq.f32.partialorder %v1245_v60, 8.507059e+37  ;;  %v1054_v61 = vand.u32 2147483647, %v4331_v36  ;;  %v1053_v28 = vsel %vm1052_vm6, %v4363_v17, %v1049_v6  ;;  %v401_v29 = vld [vmem:[#allocation3 + $0x1a0] sm:$0xff] }
 0x5ea   :  { %v1240_v9 = vadd.f32 %v3610_v3, %v1239_v40  ;;  %v1320_v19 = vmul.f32 %v3612_v34, %v1319_v27  ;;  %3407 = vmatmul.msk.f32.vlgmr.msra.gmra.mxu0 %vm138_vm2, %v1044_v15  ;;  %v1057_v52 = vor.u32 1.1754944e-38, %v1056_v63  ;;  %vm1327_vm8 = vcmp.eq.f32.partialorder %v1326_v48, 8.507059e+37 }
 0x5eb   :  { %3405 = vmatmul.msk.f32.vlgmr.msra.gmra.mxu1 %vm138_vm2, %v1316_v5  ;;  %vm1055_vm9 = vcmp.eq.f32.partialorder %v1054_v61, 8.507059e+37 }
 0x5ec   :  { %v1244_v20 = vsel %vm1243_vm0, %v3610_v3, %v1240_v9  ;;  %v1321_v1 = vadd.f32 %v3612_v34, %v1320_v19  ;;  %v1058_v30 = vsel %vm1055_vm9, %v1057_v52, %v1053_v28  ;;  %vm1646_vm0 = vcmask 523264  }
 0x5ed   :  { %v1249_v21 = vsel %vm1246_vm1, %v1248_v11, %v1244_v20  ;;  %v1059_v35 = vmul.f32 %v4297_v54, %v1058_v30  ;;  %v4472_v20 = vld [vmem:[#allocation3 + $0x204] ss:$0 sm:$0xff] }
 0x5ee   :  { %v1250_v22 = vmul.f32 %v4303_v7, %v1249_v21  ;;  %v1325_v31 = vsel %vm1324_vm7, %v3612_v34, %v1321_v1 }
 0x5ef   :  { %v1330_v12 = vsel %vm1327_vm8, %v1329_v57, %v1325_v31  ;;  %v4474_v57 = vld [vmem:[#allocation3 + $0x205] ss:$0 sm:$0xff] }
 0x5f0   :  { %3410 = vmatmul.msk.f32.gmra.mxu3 %vm138_vm2, %v1250_v22  ;;  %v1331_v32 = vmul.f32 %v4307_v62, %v1330_v12 }
 0x5f2   :  { %3408 = vmatmul.msk.f32.gmra.mxu0 %vm138_vm2, %v1059_v35 }
 0x5f3   :  { %3406 = vmatmul.msk.f32.gmra.mxu1 %vm138_vm2, %v1331_v32 }
 0x650   :  { %v1471_v7 = vpop.xlane.xlu0 %1470 }
 0x651   :  { %v1481_v17 = vmul.f32 %v1471_v7, %v3958_v58 }
 0x653   :  { %v1485_v36 = vsub.f32 %v4361_v23, %v1481_v17 }
 0x655   :  { %v1489_v63 = vmul.f32 %v1485_v36, %v1485_v36 }
 0x656   :  { %v1166_v13 = vpop.f32.mrf.mxu0 }
 0x657   :  { %v1493_v25 = vsel %vm101_vm5, %v1489_v63, 0.0 }
 0x658   :  { %v1474_v3 = vpop.xlane.xlu1 %1473  ;;  %1494 = vadd.xlane.f32.xlu2 %v1493_v25 }
 0x659   :  { %v1482_v41 = vmul.f32 %v1474_v3, %v3958_v58 }
 0x65b   :  { %v1486_v62 = vsub.f32 %v4399_v42, %v1482_v41  ;;  %v404_v42 = vld [vmem:[#allocation3 + $0x1b8] sm:$0xff] }
 0x65c   :  { %1592 = vmatpush.msrb.mxu1 %v404_v42  ;;  %v3730_v41 = vld [vmem:[#allocation2 + $0x18] sm:$0xff] }
 0x65d   :  { %v1490_v18 = vmul.f32 %v1486_v62, %v1486_v62 }
 0x65e   :  { %1593 = vmatpush.msrb.mxu1 %v403_v55 }
 0x65f   :  { %v1496_v54 = vsel %vm101_vm5, %v1490_v18, 0.0  ;;  %v1169_v26 = vpop.f32.mrf.mxu0 }
 0x660   :  { %1497 = vadd.xlane.f32.xlu0 %v1496_v54  ;;  %1594 = vmatpush.msrb.mxu1 %v402_v8  ;;  %v412_v54 = vld [vmem:[#allocation3 + $0x1f8] sm:$0xff] }
 0x661   :  { %1667 = vmatpush.msrb.mxu0 %v412_v54  ;;  %v4504_v54 = vld [vmem:[#allocation3 + $0x207] ss:$0 sm:$0xff] }
 0x662   :  { %1595 = vmatpush.msrb.mxu1 %v401_v29 }
 0x667   :  { %v1386_v43 = vpop.f32.mrf.mxu0 }
 0x668   :  { %v1357_v10 = vpop.f32.mrf.mxu1  ;;  %v1387_v45 = vadd.f32 %v1386_v43, %v1166_v13  ;;  %v409_v43 = vld [vmem:[#allocation3 + $0x1e0] sm:$0xff] }
 0x66b   :  { %v1415_v44 = vpop.f32.mrf.mxu3 }
 0x66c   :  { %v1416_v23 = vadd.f32 %v1415_v44, %v1357_v10  ;;  %v410_v10 = vld [vmem:[#allocation3 + $0x1e8] sm:$0xff]  ;;  %v408_v44 = vld [vmem:[#allocation3 + $0x1d8] sm:$0xff] }
 0x66e   :  { %v1421_v47 = vadd.f32 %v1416_v23, %v1387_v45  ;;  %v407_v45 = vld [vmem:[#allocation3 + $0x1d0] sm:$0xff]  ;;  %v406_v23 = vld [vmem:[#allocation3 + $0x1c8] sm:$0xff] }
 0x66f   :  { %v1389_v16 = vpop.f32.mrf.mxu0 }
 0x670   :  { %3413 = vmatmul.msk.f32.gmra.mxu2 %vm101_vm5, %v1421_v47  ;;  %v1360_v2 = vpop.f32.mrf.mxu1  ;;  %v1390_v50 = vadd.f32 %v1389_v16, %v1169_v26  ;;  %v411_v26 = vld [vmem:[#allocation3 + $0x1f0] sm:$0xff]  ;;  %v405_v47 = vld [vmem:[#allocation3 + $0x1c0] sm:$0xff] }
 0x671   :  { %1668 = vmatpush.msrb.mxu0 %v411_v26 }
 0x673   :  { %v1418_v34 = vpop.f32.mrf.mxu3  ;;  %1669 = vmatpush.msrb.mxu0 %v410_v10 }
 0x674   :  { %v1419_v53 = vadd.f32 %v1418_v34, %v1360_v2 }
 0x675   :  { %1670 = vmatpush.msrb.mxu0 %v409_v43 }
 0x676   :  { %v1422_v51 = vadd.f32 %v1419_v53, %v1390_v50 }
 0x677   :  { %1671 = vmatpush.msrb.mxu0 %v408_v44 }
 0x678   :  { %3414 = vmatmul.msk.f32.gmra.mxu2 %vm101_vm5, %v1422_v51 }
 0x679   :  { %1672 = vmatpush.msrb.mxu0 %v407_v45 }
 0x67b   :  { %1673 = vmatpush.msrb.mxu0 %v406_v23 }
 0x67d   :  { %1674 = vmatpush.msrb.mxu0 %v405_v47 }
 0x6cb   :  { %v1495_v56 = vpop.xlane.xlu2 %1494 }
 0x6cc   :  { %v1505_v14 = vmul.f32 %v1495_v56, %v3958_v58 }
 0x6ce   :  { %v1509_v40 = vadd.f32 1e-12, %v1505_v14 }
 0x6d0   :  { %3613 = vrsqrt.f32 %v1509_v40  ;;  %vm1519_vm12 = vweird.f32 %v1509_v40 }
 0x6d3   :  { %v1498_v60 = vpop.xlane.xlu0 %1497 }
 0x6d4   :  { %v1506_v59 = vmul.f32 %v1498_v60, %v3958_v58 }
 0x6d6   :  { %v1510_v37 = vadd.f32 1e-12, %v1506_v59  ;;  %v3614_v27 = vpop.eup %3613 }
 0x6d7   :  { %v1514_v0 = vmul.f32 %v3614_v27, %v1509_v40  ;;  %vm1520_vm10 = vweird.f32 %v3614_v27 }
 0x6d8   :  { %3615 = vrsqrt.f32 %v1510_v37  ;;  %vm1521_vm11 = vmor %vm1519_vm12, %vm1520_vm10  ;;  %vm1529_vm14 = vweird.f32 %v1510_v37 }
 0x6d9   :  { %v1515_v5 = vmul.f32 %v3614_v27, %v1514_v0 }
 0x6db   :  { %v1516_v9 = vmul.f32 0.5, %v1515_v5 }
 0x6dd   :  { %v1517_v11 = vsub.f32 1.5, %v1516_v9 }
 0x6de   :  { %v3616_v6 = vpop.eup %3615 }
 0x6df   :  { %v1524_v19 = vmul.f32 %v3616_v6, %v1510_v37  ;;  %v1518_v48 = vmul.f32 %v3614_v27, %v1517_v11  ;;  %vm1530_vm13 = vweird.f32 %v3616_v6 }
 0x6e0   :  { %vm1531_vm15 = vmor %vm1529_vm14, %vm1530_vm13 }
 0x6e1   :  { %v1525_v15 = vmul.f32 %v3616_v6, %v1524_v19  ;;  %v1522_v61 = vsel %vm1521_vm11, %v3614_v27, %v1518_v48 }
 0x6e2   :  { %v1553_v1 = vmul.f32 %v1522_v61, %v1485_v36  ;;  %v3729_v36 = vld [vmem:[#allocation2 + $0x10] sm:$0xff] }
 0x6e3   :  { %v1526_v21 = vmul.f32 0.5, %v1525_v15 }
 0x6e4   :  { %v1558_v28 = vmul.f32 %v4472_v20, %v1553_v1 }
 0x6e5   :  { %v1527_v22 = vsub.f32 1.5, %v1526_v21 }
 0x6e6   :  { %v4478_v31 = vadd.f32 %v4474_v57, %v1558_v28 }
 0x6e7   :  { %v1528_v52 = vmul.f32 %v3616_v6, %v1527_v22 }
 0x6e8   :  { %3415 = vmatmul.msk.f32.vlgmr.msrb.gmra.mxu1 %vm101_vm5, %v4478_v31 }
 0x6e9   :  { %v1532_v12 = vsel %vm1531_vm15, %v3616_v6, %v1528_v52 }
 0x6ea   :  { %v1554_v32 = vmul.f32 %v1532_v12, %v1486_v62 }
 0x6ec   :  { %v1559_v30 = vmul.f32 %v4472_v20, %v1554_v32 }
 0x6ee   :  { %v4484_v35 = vadd.f32 %v4474_v57, %v1559_v30 }
 0x6f0   :  { %3416 = vmatmul.msk.f32.gmra.mxu1 %vm101_vm5, %v4484_v35 }
 0x6f3   :  { %v1459_v7 = vpop.f32.mrf.mxu2 }
 0x6f4   :  { %v1460_v17 = vadd.f32 %v4326_v33, %v1459_v7 }
 0x6f6   :  { %v1467_v63 = vadd.f32 %v3729_v36, %v1460_v17 }
 0x6f8   :  { %v1475_v3 = vsel %vm101_vm5, %v1467_v63, 0.0 }
 0x6f9   :  { %1476 = vadd.xlane.f32.xlu1 %v1475_v3 }
 0x6fb   :  { %v1462_v13 = vpop.f32.mrf.mxu2 }
 0x6fc   :  { %v1463_v25 = vadd.f32 %v4326_v33, %v1462_v13  ;;  %v4492_v33 = vld [vmem:[#allocation3 + $0x206] ss:$0 sm:$0xff] }
 0x6fe   :  { %v1468_v62 = vadd.f32 %v3730_v41, %v1463_v25 }
 0x700   :  { %v1478_v18 = vsel %vm101_vm5, %v1468_v62, 0.0 }
 0x701   :  { %1479 = vadd.xlane.f32.xlu2 %v1478_v18 }
 0x765   :  { %v1597_v2 = vpop.f32.mrf.mxu1 }
 0x766   :  { %v1598_v16 = vadd.f32 %v4492_v33, %v1597_v2 }
 0x768   :  { %v1613_v34 = vmul.f32 0.044715, %v1598_v16  ;;  %v1609_v61 = vmul.f32 0.5, %v1598_v16 }
 0x76a   :  { %v1617_v53 = vmul.f32 %v1613_v34, %v1598_v16 }
 0x76c   :  { %v1477_v50 = vpop.xlane.xlu1 %1476  ;;  %v1621_v42 = vmul.f32 %v1617_v53, %v1598_v16 }
 0x76d   :  { %v1483_v51 = vmul.f32 %v1477_v50, %v3958_v58  ;;  %v1600_v8 = vpop.f32.mrf.mxu1 }
 0x76e   :  { %v1625_v56 = vadd.f32 %v1621_v42, %v1598_v16  ;;  %v1601_v29 = vadd.f32 %v4492_v33, %v1600_v8 }
 0x76f   :  { %v1487_v55 = vsub.f32 %v1467_v63, %v1483_v51 }
 0x770   :  { %v1629_v40 = vmul.f32 0.7978846, %v1625_v56  ;;  %v1614_v60 = vmul.f32 0.044715, %v1601_v29  ;;  %v1610_v28 = vmul.f32 0.5, %v1601_v29 }
 0x771   :  { %v1491_v14 = vmul.f32 %v1487_v55, %v1487_v55 }
 0x772   :  { %3617 = vtanh.f32 %v1629_v40  ;;  %v1618_v0 = vmul.f32 %v1614_v60, %v1601_v29 }
 0x773   :  { %v1499_v59 = vsel %vm101_vm5, %v1491_v14, 0.0 }
 0x774   :  { %1500 = vadd.xlane.f32.xlu0 %v1499_v59  ;;  %v1480_v37 = vpop.xlane.xlu2 %1479  ;;  %v1622_v9 = vmul.f32 %v1618_v0, %v1601_v29 }
 0x775   :  { %v1484_v27 = vmul.f32 %v1480_v37, %v3958_v58 }
 0x776   :  { %v1626_v11 = vadd.f32 %v1622_v9, %v1601_v29 }
 0x777   :  { %v1488_v5 = vsub.f32 %v1468_v62, %v1484_v27 }
 0x778   :  { %v3618_v19 = vpop.eup %3617  ;;  %v1630_v15 = vmul.f32 0.7978846, %v1626_v11 }
 0x779   :  { %v1492_v6 = vmul.f32 %v1488_v5, %v1488_v5  ;;  %v1637_v21 = vadd.f32 1.0, %v3618_v19 }
 0x77a   :  { %3619 = vtanh.f32 %v1630_v15 }
 0x77b   :  { %v1502_v48 = vsel %vm101_vm5, %v1492_v6, 0.0  ;;  %v1641_v1 = vmul.f32 %v1637_v21, %v1609_v61 }
 0x77c   :  { %1503 = vadd.xlane.f32.xlu1 %v1502_v48 }
 0x77d   :  { %3419 = vmatmul.msk.f32.vlgmr.msrb.gmra.mxu0 %vm1646_vm0, %v1641_v1 }
 0x780   :  { %v3620_v22 = vpop.eup %3619 }
 0x781   :  { %v1638_v52 = vadd.f32 1.0, %v3620_v22 }
 0x783   :  { %v1642_v12 = vmul.f32 %v1638_v52, %v1610_v28 }
 0x785   :  { %3420 = vmatmul.msk.f32.gmra.mxu0 %vm1646_vm0, %v1642_v12 }
 0x7e7   :  { %v1501_v32 = vpop.xlane.xlu0 %1500 }
 0x7e8   :  { %v1507_v30 = vmul.f32 %v1501_v32, %v3958_v58 }
 0x7ea   :  { %v1511_v7 = vadd.f32 1e-12, %v1507_v30 }
 0x7ec   :  { %3621 = vrsqrt.f32 %v1511_v7  ;;  %vm1539_vm1 = vweird.f32 %v1511_v7 }
 0x7ef   :  { %v1504_v17 = vpop.xlane.xlu1 %1503 }
 0x7f0   :  { %v1508_v36 = vmul.f32 %v1504_v17, %v3958_v58 }
 0x7f2   :  { %v3622_v63 = vpop.eup %3621  ;;  %v1512_v3 = vadd.f32 1e-12, %v1508_v36 }
 0x7f3   :  { %v1534_v13 = vmul.f32 %v3622_v63, %v1511_v7  ;;  %vm1540_vm3 = vweird.f32 %v3622_v63 }
 0x7f4   :  { %3623 = vrsqrt.f32 %v1512_v3  ;;  %vm1541_vm4 = vmor %vm1539_vm1, %vm1540_vm3  ;;  %vm1549_vm7 = vweird.f32 %v1512_v3 }
 0x7f5   :  { %v1535_v25 = vmul.f32 %v3622_v63, %v1534_v13 }
 0x7f7   :  { %v1536_v41 = vmul.f32 0.5, %v1535_v25 }
 0x7f9   :  { %v1537_v62 = vsub.f32 1.5, %v1536_v41 }
 0x7fa   :  { %v3624_v18 = vpop.eup %3623  ;;  %v1676_v45 = vpop.f32.mrf.mxu0 }
 0x7fb   :  { %v1538_v26 = vmul.f32 %v3622_v63, %v1537_v62  ;;  %v1544_v10 = vmul.f32 %v3624_v18, %v1512_v3  ;;  %v1677_v23 = vadd.f32 %v4504_v54, %v1676_v45  ;;  %vm1550_vm6 = vweird.f32 %v3624_v18  ;;  %v1800_v45 = vld [vmem:[#allocation3 + $0x260] sm:$0xff] }
 0x7fc   :  { %vm1551_vm8 = vmor %vm1549_vm7, %vm1550_vm6 }
 0x7fd   :  { %v1542_v43 = vsel %vm1541_vm4, %v3622_v63, %v1538_v26  ;;  %v1545_v44 = vmul.f32 %v3624_v18, %v1544_v10  ;;  %v1688_v16 = vadd.f32 %v1677_v23, %v4478_v31  ;;  %v1801_v26 = vld [vmem:[#allocation3 + $0x268] sm:$0xff] }
 0x7fe   :  { %v1555_v47 = vmul.f32 %v1542_v43, %v1487_v55  ;;  %v1792_v43 = vld [vmem:[#allocation3 + $0x220] sm:$0xff]  ;;  %1913 = vmatpush.msra.mxu1 %v1801_v26 }
 0x7ff   :  { %v1546_v2 = vmul.f32 0.5, %v1545_v44  ;;  %v1692_v53 = vsel %vm101_vm5, %v1688_v16, 0.0  ;;  %v1796_v44 = vld [vmem:[#allocation3 + $0x240] sm:$0xff] }
 0x800   :  { %v1560_v34 = vmul.f32 %v4472_v20, %v1555_v47  ;;  %1693 = vadd.xlane.f32.xlu2 %v1692_v53  ;;  %v1791_v47 = vld [vmem:[#allocation3 + $0x218] sm:$0xff]  ;;  %1914 = vmatpush.msra.mxu1 %v1800_v45  ;;  %v1794_v53 = vld [vmem:[#allocation3 + $0x230] sm:$0xff] }
 0x801   :  { %v1547_v50 = vsub.f32 1.5, %v1546_v2  ;;  %v1795_v2 = vld [vmem:[#allocation3 + $0x238] sm:$0xff] }
 0x802   :  { %v4511_v51 = vadd.f32 %v4474_v57, %v1560_v34  ;;  %v1679_v8 = vpop.f32.mrf.mxu0 }
 0x803   :  { %v1548_v42 = vmul.f32 %v3624_v18, %v1547_v50  ;;  %v1680_v31 = vadd.f32 %v4504_v54, %v1679_v8  ;;  %v1790_v50 = vld [vmem:[#allocation3 + $0x210] sm:$0xff] }
 0x804   :  { %3417 = vmatmul.msk.f32.gmra.mxu1 %vm101_vm5, %v4511_v51 }
 0x805   :  { %v1552_v55 = vsel %vm1551_vm8, %v3624_v18, %v1548_v42  ;;  %v1689_v29 = vadd.f32 %v1680_v31, %v4484_v35  ;;  %v1797_v18 = vld [vmem:[#allocation3 + $0x248] sm:$0xff]  ;;  %v1798_v42 = vld [vmem:[#allocation3 + $0x250] sm:$0xff] }
 0x806   :  { %v1556_v56 = vmul.f32 %v1552_v55, %v1488_v5  ;;  %1883 = vmatpush.msra.mxu2 %v1797_v18 }
 0x807   :  { %v1695_v40 = vsel %vm101_vm5, %v1689_v29, 0.0 }
 0x808   :  { %v1561_v14 = vmul.f32 %v4472_v20, %v1556_v56  ;;  %1696 = vadd.xlane.f32.xlu0 %v1695_v40  ;;  %1884 = vmatpush.msra.mxu2 %v1796_v44  ;;  %v4590_v44 = vld [vmem:[#allocation3 + $0x2f1] ss:$0 sm:$0xff] }
 0x80a   :  { %v4520_v60 = vadd.f32 %v4474_v57, %v1561_v14  ;;  %1885 = vmatpush.msra.mxu2 %v1795_v2 }
 0x80c   :  { %3418 = vmatmul.msk.f32.gmra.mxu1 %vm101_vm5, %v4520_v60  ;;  %1886 = vmatpush.msra.mxu2 %v1794_v53 }
 0x873   :  { %v1694_v59 = vpop.xlane.xlu2 %1693 }
 0x874   :  { %v1704_v37 = vmul.f32 %v1694_v59, %v3958_v58 }
 0x876   :  { %v4525_v27 = vsub.f32 %v1688_v16, %v1704_v37  ;;  %v1799_v16 = vld [vmem:[#allocation3 + $0x258] sm:$0xff] }
 0x877   :  { %1915 = vmatpush.msra.mxu1 %v1799_v16 }
 0x878   :  { %v1712_v0 = vmul.f32 %v4525_v27, %v4525_v27 }
 0x879   :  { %1916 = vmatpush.msra.mxu1 %v1798_v42 }
 0x87a   :  { %v1716_v35 = vsel %vm101_vm5, %v1712_v0, 0.0 }
 0x87b   :  { %v1697_v20 = vpop.xlane.xlu0 %1696  ;;  %1717 = vadd.xlane.f32.xlu1 %v1716_v35 }
 0x87c   :  { %v1705_v5 = vmul.f32 %v1697_v20, %v3958_v58  ;;  %v4542_v20 = vld [vmem:[#allocation3 + $0x208] ss:$0 sm:$0xff] }
 0x87e   :  { %v4531_v57 = vsub.f32 %v1689_v29, %v1705_v5 }
 0x880   :  { %v1713_v11 = vmul.f32 %v4531_v57, %v4531_v57 }
 0x881   :  { %v1603_v9 = vpop.f32.mrf.mxu1 }
 0x882   :  { %v1604_v6 = vadd.f32 %v4492_v33, %v1603_v9  ;;  %v1719_v48 = vsel %vm101_vm5, %v1713_v11, 0.0  ;;  %v4545_v11 = vld [vmem:[#allocation3 + $0x209] ss:$0 sm:$0xff] }
 0x883   :  { %1720 = vadd.xlane.f32.xlu2 %v1719_v48 }
 0x884   :  { %v1615_v19 = vmul.f32 0.044715, %v1604_v6  ;;  %v1611_v36 = vmul.f32 0.5, %v1604_v6 }
 0x886   :  { %v1619_v15 = vmul.f32 %v1615_v19, %v1604_v6 }
 0x888   :  { %v1623_v61 = vmul.f32 %v1619_v15, %v1604_v6 }
 0x889   :  { %v1606_v21 = vpop.f32.mrf.mxu1 }
 0x88a   :  { %v1607_v1 = vadd.f32 %v4492_v33, %v1606_v21  ;;  %v1627_v22 = vadd.f32 %v1623_v61, %v1604_v6  ;;  %v1793_v33 = vld [vmem:[#allocation3 + $0x228] sm:$0xff] }
 0x88b   :  { %1853 = vmatpush.msrb.mxu3 %v1793_v33 }
 0x88c   :  { %v1616_v28 = vmul.f32 0.044715, %v1607_v1  ;;  %v1631_v52 = vmul.f32 0.7978846, %v1627_v22  ;;  %v1612_v25 = vmul.f32 0.5, %v1607_v1 }
 0x88d   :  { %1854 = vmatpush.msrb.mxu3 %v1792_v43 }
 0x88e   :  { %3625 = vtanh.f32 %v1631_v52  ;;  %v1620_v12 = vmul.f32 %v1616_v28, %v1607_v1 }
 0x88f   :  { %1855 = vmatpush.msrb.mxu3 %v1791_v47 }
 0x890   :  { %v1624_v32 = vmul.f32 %v1620_v12, %v1607_v1 }
 0x891   :  { %1856 = vmatpush.msrb.mxu3 %v1790_v50 }
 0x892   :  { %v1628_v30 = vadd.f32 %v1624_v32, %v1607_v1 }
 0x894   :  { %v3626_v7 = vpop.eup %3625  ;;  %v1632_v17 = vmul.f32 0.7978846, %v1628_v30 }
 0x895   :  { %v1639_v63 = vadd.f32 1.0, %v3626_v7 }
 0x896   :  { %3627 = vtanh.f32 %v1632_v17 }
 0x897   :  { %v1643_v3 = vmul.f32 %v1639_v63, %v1611_v36 }
 0x899   :  { %3421 = vmatmul.msk.f32.gmra.mxu0 %vm1646_vm0, %v1643_v3 }
 0x89c   :  { %v3628_v13 = vpop.eup %3627 }
 0x89d   :  { %v1640_v41 = vadd.f32 1.0, %v3628_v13 }
 0x89f   :  { %v1644_v62 = vmul.f32 %v1640_v41, %v1612_v25  ;;  %v4575_v25 = vld [vmem:[#allocation3 + $0x2f2] ss:$0 sm:$0xff] }
 0x8a1   :  { %3422 = vmatmul.msk.f32.gmra.mxu0 %vm1646_vm0, %v1644_v62 }
 0x8ee   :  { %v1718_v10 = vpop.xlane.xlu1 %1717 }
 0x8ef   :  { %v1728_v23 = vmul.f32 %v1718_v10, %v3958_v58 }
 0x8f1   :  { %v1732_v34 = vadd.f32 1e-12, %v1728_v23  ;;  %v4593_v23 = vld [vmem:[#allocation3 + $0x2f0] ss:$0 sm:$0xff] }
 0x8f3   :  { %3629 = vrsqrt.f32 %v1732_v34  ;;  %vm1742_vm10 = vweird.f32 %v1732_v34 }
 0x8f6   :  { %v1721_v55 = vpop.xlane.xlu2 %1720 }
 0x8f7   :  { %v1729_v8 = vmul.f32 %v1721_v55, %v3958_v58 }
 0x8f9   :  { %v3630_v31 = vpop.eup %3629  ;;  %v1733_v56 = vadd.f32 1e-12, %v1729_v8 }
 0x8fa   :  { %v1737_v29 = vmul.f32 %v3630_v31, %v1732_v34  ;;  %vm1743_vm9 = vweird.f32 %v3630_v31 }
 0x8fb   :  { %3631 = vrsqrt.f32 %v1733_v56  ;;  %vm1744_vm12 = vmor %vm1742_vm10, %vm1743_vm9  ;;  %vm1752_vm13 = vweird.f32 %v1733_v56 }
 0x8fc   :  { %v1738_v14 = vmul.f32 %v3630_v31, %v1737_v29 }
 0x8fe   :  { %v1739_v40 = vmul.f32 0.5, %v1738_v14 }
 0x900   :  { %v1740_v59 = vsub.f32 1.5, %v1739_v40 }
 0x901   :  { %v3632_v37 = vpop.eup %3631 }
 0x902   :  { %v1741_v0 = vmul.f32 %v3630_v31, %v1740_v59  ;;  %v1747_v35 = vmul.f32 %v3632_v37, %v1733_v56  ;;  %vm1753_vm11 = vweird.f32 %v3632_v37 }
 0x903   :  { %vm1754_vm14 = vmor %vm1752_vm13, %vm1753_vm11 }
 0x904   :  { %v1745_v5 = vsel %vm1744_vm12, %v3630_v31, %v1741_v0  ;;  %v1748_v9 = vmul.f32 %v3632_v37, %v1747_v35 }
 0x905   :  { %v1776_v6 = vmul.f32 %v1745_v5, %v4525_v27 }
 0x906   :  { %v1749_v19 = vmul.f32 0.5, %v1748_v9 }
 0x907   :  { %v1781_v48 = vmul.f32 %v4542_v20, %v1776_v6 }
 0x908   :  { %v1750_v15 = vsub.f32 1.5, %v1749_v19 }
 0x909   :  { %v4549_v61 = vadd.f32 %v4545_v11, %v1781_v48 }
 0x90a   :  { %v1751_v21 = vmul.f32 %v3632_v37, %v1750_v15 }
 0x90b   :  { %3423 = vmatmul.msk.f32.vlgmr.msrb.gmra.mxu3 %vm101_vm5, %v4549_v61  ;;  %3427 = vmatmul.msk.f32.vlgmr.msra.gmra.mxu2 %vm101_vm5, %v4549_v61 }
 0x90c   :  { %v1755_v27 = vsel %vm1754_vm14, %v3632_v37, %v1751_v21  ;;  %3431 = vmatmul.msk.f32.vlgmr.msra.gmra.mxu1 %vm101_vm5, %v4549_v61 }
 0x90d   :  { %v1777_v1 = vmul.f32 %v1755_v27, %v4531_v57 }
 0x90f   :  { %v1782_v22 = vmul.f32 %v4542_v20, %v1777_v1 }
 0x911   :  { %v4560_v28 = vadd.f32 %v4545_v11, %v1782_v22 }
 0x913   :  { %3424 = vmatmul.msk.f32.gmra.mxu3 %vm101_vm5, %v4560_v28  ;;  %3428 = vmatmul.msk.f32.gmra.mxu2 %vm101_vm5, %v4560_v28 }
 0x914   :  { %3432 = vmatmul.msk.f32.gmra.mxu1 %vm101_vm5, %v4560_v28 }
 0x916   :  { %v1682_v52 = vpop.f32.mrf.mxu0 }
 0x917   :  { %v1683_v12 = vadd.f32 %v4504_v54, %v1682_v52 }
 0x919   :  { %v1690_v32 = vadd.f32 %v1683_v12, %v4511_v51 }
 0x91b   :  { %v1698_v57 = vsel %vm101_vm5, %v1690_v32, 0.0 }
 0x91c   :  { %1699 = vadd.xlane.f32.xlu0 %v1698_v57 }
 0x91e   :  { %v1685_v30 = vpop.f32.mrf.mxu0 }
 0x91f   :  { %v1686_v7 = vadd.f32 %v4504_v54, %v1685_v30 }
 0x921   :  { %v1691_v17 = vadd.f32 %v1686_v7, %v4520_v60 }
 0x923   :  { %v1701_v36 = vsel %vm101_vm5, %v1691_v17, 0.0 }
 0x924   :  { %1702 = vadd.xlane.f32.xlu1 %v1701_v36 }
 0x989   :  { %v1918_v63 = vpop.f32.mrf.mxu1 }
 0x98a   :  { %v4580_v33 = vadd.f32 %v4575_v25, %v1918_v63 }
 0x98c   :  { %v2287_v2 = vmul.f32 %v4034_v46, %v4580_v33  ;;  %v2096_v29 = vmul.f32 %v4020_v38, %v4580_v33  ;;  %v2015_v59 = vmul.f32 %v4024_v39, %v4580_v33 }
 0x98e   :  { %v1888_v41 = vpop.f32.mrf.mxu2  ;;  %v1858_v43 = vpop.f32.mrf.mxu3 }
 0x98f   :  { %v1700_v3 = vpop.xlane.xlu0 %1699  ;;  %v4601_v53 = vadd.f32 %v4593_v23, %v1858_v43  ;;  %v1889_v42 = vadd.f32 %v4590_v44, %v1888_v41 }
 0x990   :  { %v1706_v13 = vmul.f32 %v1700_v3, %v3958_v58 }
 0x991   :  { %v1921_v51 = vpop.f32.mrf.mxu1  ;;  %v1930_v31 = vmul.f32 %v4024_v39, %v4601_v53 }
 0x992   :  { %v4577_v62 = vsub.f32 %v1690_v32, %v1706_v13  ;;  %v4583_v54 = vadd.f32 %v4575_v25, %v1921_v51 }
 0x994   :  { %v1714_v60 = vmul.f32 %v4577_v62, %v4577_v62  ;;  %v2288_v18 = vmul.f32 %v4034_v46, %v4583_v54  ;;  %v2097_v8 = vmul.f32 %v4020_v38, %v4583_v54  ;;  %v2016_v14 = vmul.f32 %v4024_v39, %v4583_v54 }
 0x996   :  { %v1722_v26 = vsel %vm101_vm5, %v1714_v60, 0.0  ;;  %2309 = vmatpush.msrb.mxu1 %v2288_v18  ;;  %v1891_v47 = vpop.f32.mrf.mxu2  ;;  %v1861_v56 = vpop.f32.mrf.mxu3  ;;  %v2017_v60 = vmul.f32 %v4020_v38, %v4601_v53  ;;  %v2208_v18 = vmul.f32 %v4034_v46, %v4601_v53 }
 0x997   :  { %v1703_v10 = vpop.xlane.xlu1 %1702  ;;  %1723 = vadd.xlane.f32.xlu2 %v1722_v26  ;;  %v1892_v16 = vadd.f32 %v4590_v44, %v1891_v47  ;;  %v1862_v40 = vadd.f32 %v4593_v23, %v1861_v56 }
 0x998   :  { %v1707_v45 = vmul.f32 %v1703_v10, %v3958_v58  ;;  %2310 = vmatpush.msrb.mxu1 %v2287_v2 }
 0x999   :  { %3435 = vmatpush.xpose.msk.msra.mxu0 %vm101_vm5, %v1892_v16  ;;  %3439 = vmatpush.xpose.msk.msra.mxu3 %vm101_vm5, %v1892_v16  ;;  %v1931_v37 = vmul.f32 %v4024_v39, %v1862_v40  ;;  %v2018_v26 = vmul.f32 %v4020_v38, %v1862_v40  ;;  %v2209_v10 = vmul.f32 %v4034_v46, %v1862_v40 }
 0x99a   :  { %v1711_v34 = vsub.f32 %v1691_v17, %v1707_v45  ;;  %3449 = vmatpush.xpose.msk.msrb.mxu2 %vm101_vm5, %v1892_v16  ;;  %v2128_v43 = vmul.f32 %v4076_v4, %v1862_v40 }
 0x99c   :  { %v1715_v50 = vmul.f32 %v1711_v34, %v1711_v34 }
 0x99d   :  { %3436 = vmatpush.xpose.msk.msra.mxu0 %vm101_vm5, %v1889_v42  ;;  %3440 = vmatpush.xpose.msk.msra.mxu3 %vm101_vm5, %v1889_v42 }
 0x99e   :  { %v1725_v55 = vsel %vm101_vm5, %v1715_v50, 0.0  ;;  %3450 = vmatpush.xpose.msk.msrb.mxu2 %vm101_vm5, %v1889_v42 }
 0x99f   :  { %1726 = vadd.xlane.f32.xlu0 %v1725_v55 }
 0x9a0   :  { %3437 = vmatmul.msk.f32.vlgmr.msra.gmra.mxu0 %vm101_vm5, %v1930_v31 }
 0x9a1   :  { %2118 = vmatpush.msrb.mxu0 %v2097_v8  ;;  %3445 = vmatpush.xpose.msk.msrb.mxu3 %vm101_vm5, %v1892_v16 }
 0x9a3   :  { %2119 = vmatpush.msrb.mxu0 %v2096_v29 }
 0x9a5   :  { %2338 = vmatpush.msra.mxu0 %v2016_v14  ;;  %3446 = vmatpush.xpose.msk.msrb.mxu3 %vm101_vm5, %v1889_v42 }
 0x9a7   :  { %2339 = vmatpush.msra.mxu0 %v2015_v59 }
 0x9a8   :  { %3438 = vmatmul.msk.f32.gmra.mxu0 %vm101_vm5, %v1931_v37 }
 0xa0a   :  { %v1724_v0 = vpop.xlane.xlu2 %1723 }
 0xa0b   :  { %v1730_v35 = vmul.f32 %v1724_v0, %v3958_v58 }
 0xa0d   :  { %v1734_v5 = vadd.f32 1e-12, %v1730_v35 }
 0xa0f   :  { %3633 = vrsqrt.f32 %v1734_v5  ;;  %vm1762_vm3 = vweird.f32 %v1734_v5 }
 0xa12   :  { %v1727_v9 = vpop.xlane.xlu0 %1726 }
 0xa13   :  { %v1731_v6 = vmul.f32 %v1727_v9, %v3958_v58 }
 0xa15   :  { %v1735_v19 = vadd.f32 1e-12, %v1731_v6  ;;  %v3634_v48 = vpop.eup %3633 }
 0xa16   :  { %v1757_v15 = vmul.f32 %v3634_v48, %v1734_v5  ;;  %vm1763_vm15 = vweird.f32 %v3634_v48 }
 0xa17   :  { %3635 = vrsqrt.f32 %v1735_v19  ;;  %vm1764_vm1 = vmor %vm1762_vm3, %vm1763_vm15  ;;  %vm1772_vm6 = vweird.f32 %v1735_v19 }
 0xa18   :  { %v1758_v21 = vmul.f32 %v3634_v48, %v1757_v15 }
 0xa1a   :  { %v1759_v27 = vmul.f32 0.5, %v1758_v21 }
 0xa1c   :  { %v1760_v22 = vsub.f32 1.5, %v1759_v27 }
 0xa1d   :  { %v3636_v1 = vpop.eup %3635 }
 0xa1e   :  { %v1767_v52 = vmul.f32 %v3636_v1, %v1735_v19  ;;  %v1761_v12 = vmul.f32 %v3634_v48, %v1760_v22  ;;  %vm1773_vm4 = vweird.f32 %v3636_v1 }
 0xa1f   :  { %vm1774_vm7 = vmor %vm1772_vm6, %vm1773_vm4 }
 0xa20   :  { %v1768_v32 = vmul.f32 %v3636_v1, %v1767_v52  ;;  %v1765_v57 = vsel %vm1764_vm1, %v3634_v48, %v1761_v12 }
 0xa21   :  { %v1778_v30 = vmul.f32 %v1765_v57, %v4577_v62 }
 0xa22   :  { %v1769_v7 = vmul.f32 0.5, %v1768_v32 }
 0xa23   :  { %v1783_v36 = vmul.f32 %v4542_v20, %v1778_v30 }
 0xa24   :  { %v1770_v17 = vsub.f32 1.5, %v1769_v7 }
 0xa25   :  { %v4630_v3 = vadd.f32 %v4545_v11, %v1783_v36 }
 0xa26   :  { %v1771_v63 = vmul.f32 %v3636_v1, %v1770_v17 }
 0xa27   :  { %3425 = vmatmul.msk.f32.gmra.mxu3 %vm101_vm5, %v4630_v3  ;;  %3429 = vmatmul.msk.f32.gmra.mxu2 %vm101_vm5, %v4630_v3 }
 0xa28   :  { %v1775_v13 = vsel %vm1774_vm7, %v3636_v1, %v1771_v63  ;;  %3433 = vmatmul.msk.f32.gmra.mxu1 %vm101_vm5, %v4630_v3 }
 0xa29   :  { %v1779_v41 = vmul.f32 %v1775_v13, %v1711_v34 }
 0xa2b   :  { %v1784_v62 = vmul.f32 %v4542_v20, %v1779_v41  ;;  %v2207_v20 = vmul.f32 %v4076_v4, %v4583_v54  ;;  %v2127_v54 = vmul.f32 %v4076_v4, %v4601_v53 }
 0xa2d   :  { %v4640_v51 = vadd.f32 %v4545_v11, %v1784_v62  ;;  %v2206_v11 = vmul.f32 %v4076_v4, %v4580_v33  ;;  %v1961_v62 = vpop.f32.mrf.mxu0 }
 0xa2f   :  { %3426 = vmatmul.msk.f32.gmra.mxu3 %vm101_vm5, %v4640_v51  ;;  %3430 = vmatmul.msk.f32.gmra.mxu2 %vm101_vm5, %v4640_v51 }
 0xa30   :  { %3434 = vmatmul.msk.f32.gmra.mxu1 %vm101_vm5, %v4640_v51 }
 0xa37   :  { %3441 = vmatmul.msk.f32.vlgmr.msra.gmra.mxu3 %vm101_vm5, %v2017_v60  ;;  %3451 = vmatmul.msk.f32.vlgmr.msrb.gmra.mxu2 %vm101_vm5, %v2208_v18 }
 0xa38   :  { %2367 = vmatpush.msra.mxu3 %v2207_v20 }
 0xa3a   :  { %2368 = vmatpush.msra.mxu3 %v2206_v11 }
 0xa3f   :  { %3442 = vmatmul.msk.f32.gmra.mxu3 %vm101_vm5, %v2018_v26  ;;  %3452 = vmatmul.msk.f32.gmra.mxu2 %vm101_vm5, %v2209_v10 }
 0xa47   :  { %3447 = vmatmul.msk.f32.vlgmr.msrb.gmra.mxu3 %vm101_vm5, %v2127_v54 }
 0xa4f   :  { %3448 = vmatmul.msk.f32.gmra.mxu3 %vm101_vm5, %v2128_v43  ;;  %v1964_v43 = vpop.f32.mrf.mxu0 }
 0xaaa   :  { %v1864_v45 = vpop.f32.mrf.mxu3  ;;  %v1894_v33 = vpop.f32.mrf.mxu2 }
 0xaab   :  { %v4671_v34 = vadd.f32 %v4593_v23, %v1864_v45  ;;  %v1895_v50 = vadd.f32 %v4590_v44, %v1894_v33  ;;  %v4730_v45 = vadd.f32 %v1961_v62, %v4119_v24  ;;  %v4733_v33 = vadd.f32 %v1964_v43, %v4119_v24 }
 0xaad   :  { %v2378_v53 = vmul.f32 %v4024_v39, %v4671_v34  ;;  %v2656_v37 = vmul.f32 %v4034_v46, %v4671_v34 }
 0xab2   :  { %v1867_v47 = vpop.f32.mrf.mxu3  ;;  %v1897_v2 = vpop.f32.mrf.mxu2 }
 0xab3   :  { %v1898_v16 = vadd.f32 %v4590_v44, %v1897_v2  ;;  %v4685_v44 = vadd.f32 %v4593_v23, %v1867_v47  ;;  %v1967_v47 = vsel %vm138_vm2, %v4730_v45, -inf  ;;  %v1970_v2 = vsel %vm138_vm2, %v4733_v33, -inf }
 0xab5   :  { %3459 = vmatpush.xpose.msk.msra.mxu2 %vm101_vm5, %v1898_v16  ;;  %3463 = vmatpush.xpose.msk.msra.mxu1 %vm101_vm5, %v1898_v16  ;;  %v2379_v14 = vmul.f32 %v4024_v39, %v4685_v44  ;;  %v2657_v9 = vmul.f32 %v4034_v46, %v4685_v44 }
 0xab6   :  { %3469 = vmatpush.xpose.msk.msrb.mxu3 %vm101_vm5, %v1898_v16 }
 0xab9   :  { %3460 = vmatpush.xpose.msk.msra.mxu2 %vm101_vm5, %v1895_v50  ;;  %3464 = vmatpush.xpose.msk.msra.mxu1 %vm101_vm5, %v1895_v50 }
 0xaba   :  { %3470 = vmatpush.xpose.msk.msrb.mxu3 %vm101_vm5, %v1895_v50  ;;  %v2042_v42 = vpop.f32.mrf.mxu3  ;;  %v2233_v55 = vpop.f32.mrf.mxu2 }
 0xabb   :  { %v2234_v8 = vadd.f32 %v2233_v55, %v4119_v24  ;;  %v4721_v11 = vadd.f32 %v2042_v42, %v4119_v24 }
 0xabc   :  { %3461 = vmatmul.msk.f32.vlgmr.msra.gmra.mxu2 %vm101_vm5, %v2378_v53 }
 0xabd   :  { %3473 = vmatpush.xpose.msk.msrb.mxu2 %vm101_vm5, %v1898_v16  ;;  %v2239_v31 = vsel %vm138_vm2, %v2234_v8, -inf  ;;  %v2048_v54 = vsel %vm138_vm2, %v4721_v11, -inf }
 0xabe   :  { %2240 = vmax.xlane.f32.xlu1 %v2239_v31 }
 0xac1   :  { %3474 = vmatpush.xpose.msk.msrb.mxu2 %vm101_vm5, %v1895_v50  ;;  %v1924_v50 = vpop.f32.mrf.mxu1 }
 0xac2   :  { %v2045_v56 = vpop.f32.mrf.mxu3  ;;  %v2236_v29 = vpop.f32.mrf.mxu2 }
 0xac3   :  { %v2237_v40 = vadd.f32 %v2236_v29, %v4119_v24  ;;  %v4712_v36 = vadd.f32 %v2045_v56, %v4119_v24 }
 0xac4   :  { %3462 = vmatmul.msk.f32.gmra.mxu2 %vm101_vm5, %v2379_v14 }
 0xac5   :  { %v2242_v59 = vsel %vm138_vm2, %v2237_v40, -inf  ;;  %v2051_v20 = vsel %vm138_vm2, %v4712_v36, -inf }
 0xac6   :  { %2243 = vmax.xlane.f32.xlu0 %v2242_v59 }
 0xac9   :  { %v1927_v56 = vpop.f32.mrf.mxu1 }
 0xaca   :  { %v2152_v23 = vpop.f32.mrf.mxu3  ;;  %v4740_v59 = vadd.f32 %v4575_v25, %v1927_v56 }
 0xacb   :  { %v2153_v0 = vadd.f32 %v2152_v23, %v4119_v24 }
 0xacc   :  { %3475 = vmatmul.msk.f32.vlgmr.msrb.gmra.mxu2 %vm101_vm5, %v2656_v37 }
 0xacd   :  { %v2158_v35 = vsel %vm138_vm2, %v2153_v0, -inf }
 0xace   :  { %2159 = vmax.xlane.f32.xlu2 %v2158_v35 }
 0xad2   :  { %v2155_v5 = vpop.f32.mrf.mxu3 }
 0xad3   :  { %v2156_v6 = vadd.f32 %v2155_v5, %v4119_v24  ;;  %v4743_v5 = vadd.f32 %v4575_v25, %v1924_v50  ;;  %v2655_v50 = vmul.f32 %v4076_v4, %v4740_v59 }
 0xad4   :  { %3476 = vmatmul.msk.f32.gmra.mxu2 %vm101_vm5, %v2657_v9 }
 0xad5   :  { %v2161_v19 = vsel %vm138_vm2, %v2156_v6, -inf }
 0xad6   :  { %2162 = vmax.xlane.f32.xlu1 %v2161_v19 }
 0xb31   :  { %v2241_v48 = vpop.xlane.xlu1 %2240 }
 0xb32   :  { %v2245_v15 = vsub.f32 %v2234_v8, %v2241_v48  ;;  %v2736_v48 = vmul.f32 %v4034_v46, %v4740_v59 }
 0xb34   :  { %v2247_v21 = vmul.f32 1.442695, %v2245_v15 }
 0xb36   :  { %3637 = vpow2.f32 %v2247_v21 }
 0xb39   :  { %v2244_v27 = vpop.xlane.xlu0 %2243 }
 0xb3a   :  { %v2246_v1 = vsub.f32 %v2237_v40, %v2244_v27  ;;  %v2735_v27 = vmul.f32 %v4034_v46, %v4743_v5 }
 0xb3c   :  { %v4703_v22 = vpop.eup %3637  ;;  %v2249_v52 = vmul.f32 1.442695, %v2246_v1 }
 0xb3d   :  { %v2251_v12 = vsel %vm138_vm2, %v4703_v22, 0.0 }
 0xb3e   :  { %3639 = vpow2.f32 %v2249_v52  ;;  %2252 = vadd.xlane.f32.xlu2 %v2251_v12 }
 0xb41   :  { %v2160_v32 = vpop.xlane.xlu2 %2159 }
 0xb42   :  { %v2164_v57 = vsub.f32 %v2153_v0, %v2160_v32 }
 0xb44   :  { %v4707_v30 = vpop.eup %3639  ;;  %v2166_v7 = vmul.f32 1.442695, %v2164_v57 }
 0xb45   :  { %v2254_v17 = vsel %vm138_vm2, %v4707_v30, 0.0 }
 0xb46   :  { %3641 = vpow2.f32 %v2166_v7  ;;  %2255 = vadd.xlane.f32.xlu1 %v2254_v17 }
 0xb49   :  { %v2163_v63 = vpop.xlane.xlu1 %2162 }
 0xb4a   :  { %v2165_v13 = vsub.f32 %v2156_v6, %v2163_v63 }
 0xb4c   :  { %v4714_v41 = vpop.eup %3641  ;;  %v2168_v60 = vmul.f32 1.442695, %v2165_v13 }
 0xb4d   :  { %v2170_v18 = vsel %vm138_vm2, %v4714_v41, 0.0 }
 0xb4e   :  { %3643 = vpow2.f32 %v2168_v60  ;;  %2171 = vadd.xlane.f32.xlu0 %v2170_v18  ;;  %2052 = vmax.xlane.f32.xlu1 %v2051_v20 }
 0xb54   :  { %v4723_v26 = vpop.eup %3643 }
 0xb55   :  { %v2173_v10 = vsel %vm138_vm2, %v4723_v26, 0.0 }
 0xb56   :  { %2174 = vadd.xlane.f32.xlu2 %v2173_v10  ;;  %2049 = vmax.xlane.f32.xlu0 %v2048_v54 }
 0xb5e   :  { %1968 = vmax.xlane.f32.xlu2 %v1967_v47  ;;  %1971 = vmax.xlane.f32.xlu0 %v1970_v2 }
 0xbb1   :  { %v2253_v16 = vpop.xlane.xlu2 %2252 }
 0xbb2   :  { %3645 = vrcp.f32 %v2253_v16  ;;  %v2268_v31 = vand.u32 2147483648, %v2253_v16  ;;  %v2266_v29 = vand.u32 2147483647, %v2253_v16  ;;  %vm2262_vm9 = vweird.f32 %v2253_v16 }
 0xbb4   :  { %v2269_v37 = vor.u32 1.1754944e-38, %v2268_v31  ;;  %vm2267_vm12 = vcmp.eq.f32.partialorder %v2266_v29, 8.507059e+37  ;;  %v2466_v29 = vmul.f32 %v4020_v38, %v4685_v44 }
 0xbb8   :  { %v3646_v53 = vpop.eup %3645 }
 0xbb9   :  { %v2258_v42 = vmul.f32 %v3646_v53, %v2253_v16  ;;  %v2256_v55 = vpop.xlane.xlu1 %2255  ;;  %vm2263_vm8 = vweird.f32 %v3646_v53 }
 0xbba   :  { %3647 = vrcp.f32 %v2256_v55  ;;  %vm2264_vm10 = vmor %vm2262_vm9, %vm2263_vm8  ;;  %v2283_v21 = vand.u32 2147483648, %v2256_v55  ;;  %v2281_v1 = vand.u32 2147483647, %v2256_v55  ;;  %vm2277_vm13 = vweird.f32 %v2256_v55 }
 0xbbb   :  { %v2259_v8 = vsub.f32 1.0, %v2258_v42 }
 0xbbc   :  { %v2284_v12 = vor.u32 1.1754944e-38, %v2283_v21  ;;  %vm2282_vm15 = vcmp.eq.f32.partialorder %v2281_v1, 8.507059e+37 }
 0xbbd   :  { %v2260_v24 = vmul.f32 %v3646_v53, %v2259_v8 }
 0xbbf   :  { %v2261_v14 = vadd.f32 %v3646_v53, %v2260_v24 }
 0xbc0   :  { %v3648_v40 = vpop.eup %3647 }
 0xbc1   :  { %v2265_v23 = vsel %vm2264_vm10, %v3646_v53, %v2261_v14  ;;  %v2273_v0 = vmul.f32 %v3648_v40, %v2256_v55  ;;  %v2172_v35 = vpop.xlane.xlu0 %2171  ;;  %vm2278_vm11 = vweird.f32 %v3648_v40  ;;  %v2654_v55 = vmul.f32 %v4076_v4, %v4743_v5 }
 0xbc2   :  { %v2270_v9 = vsel %vm2267_vm12, %v2269_v37, %v2265_v23  ;;  %3649 = vrcp.f32 %v2172_v35  ;;  %vm2279_vm14 = vmor %vm2277_vm13, %vm2278_vm11  ;;  %v2187_v63 = vand.u32 2147483648, %v2172_v35  ;;  %v2185_v46 = vand.u32 2147483647, %v2172_v35  ;;  %v2409_v23 = vpop.f32.mrf.mxu2 }
 0xbc3   :  { %v2274_v6 = vsub.f32 1.0, %v2273_v0  ;;  %v2271_v19 = vmul.f32 %v4703_v22, %v2270_v9  ;;  %vm2181_vm1 = vweird.f32 %v2172_v35  ;;  %v2575_v14 = vmul.f32 %v4076_v4, %v4671_v34  ;;  %v2053_v0 = vpop.xlane.xlu1 %2052 }
 0xbc4   :  { %v2188_v20 = vor.u32 1.1754944e-38, %v2187_v63  ;;  %vm2186_vm6 = vcmp.eq.f32.partialorder %v2185_v46, 8.507059e+37 }
 0xbc5   :  { %v2275_v15 = vmul.f32 %v3648_v40, %v2274_v6  ;;  %3453 = vmatmul.msk.f32.vlgmr.msrb.gmra.mxu1 %vm138_vm2, %v2271_v19  ;;  %v2055_v19 = vsub.f32 %v4712_v36, %v2053_v0 }
 0xbc6   :  { %2757 = vmatpush.msrb.mxu1 %v2736_v48 }
 0xbc7   :  { %v2276_v25 = vadd.f32 %v3648_v40, %v2275_v15  ;;  %v2058_v15 = vmul.f32 1.442695, %v2055_v19 }
 0xbc8   :  { %v3650_v52 = vpop.eup %3649  ;;  %2758 = vmatpush.msrb.mxu1 %v2735_v27 }
 0xbc9   :  { %v2177_v22 = vmul.f32 %v3650_v52, %v2172_v35  ;;  %v2175_v32 = vpop.xlane.xlu2 %2174  ;;  %v2280_v57 = vsel %vm2279_vm14, %v3648_v40, %v2276_v25  ;;  %vm2182_vm3 = vweird.f32 %v3650_v52  ;;  %v2576_v40 = vmul.f32 %v4076_v4, %v4685_v44  ;;  %v2050_v25 = vpop.xlane.xlu0 %2049 }
 0xbca   :  { %3651 = vrcp.f32 %v2175_v32  ;;  %v2285_v17 = vsel %vm2282_vm15, %v2284_v12, %v2280_v57  ;;  %vm2183_vm4 = vmor %vm2181_vm1, %vm2182_vm3  ;;  %v2202_v16 = vand.u32 2147483648, %v2175_v32  ;;  %v2200_v42 = vand.u32 2147483647, %v2175_v32  ;;  %v4774_v6 = vpop.f32.mrf.mxu2 }
 0xbcb   :  { %v2178_v7 = vsub.f32 1.0, %v2177_v22  ;;  %v2286_v13 = vmul.f32 %v4707_v30, %v2285_v17  ;;  %v2465_v30 = vmul.f32 %v4020_v38, %v4671_v34  ;;  %vm2196_vm8 = vweird.f32 %v2175_v32 }
 0xbcc   :  { %v2203_v8 = vor.u32 1.1754944e-38, %v2202_v16  ;;  %vm2201_vm10 = vcmp.eq.f32.partialorder %v2200_v42, 8.507059e+37  ;;  %v2410_v4 = vadd.f32 %v2409_v23, %v4247_v49  ;;  %3653 = vpow2.f32 %v2058_v15 }
 0xbcd   :  { %v2179_v62 = vmul.f32 %v3650_v52, %v2178_v7  ;;  %3454 = vmatmul.msk.f32.gmra.mxu1 %vm138_vm2, %v2286_v13  ;;  %v2054_v63 = vsub.f32 %v4721_v11, %v2050_v25 }
 0xbce   :  { %v2415_v36 = vsel %vm138_vm2, %v2410_v4, -inf }
 0xbcf   :  { %v2180_v60 = vadd.f32 %v3650_v52, %v2179_v62  ;;  %v2056_v62 = vmul.f32 1.442695, %v2054_v63 }
 0xbd0   :  { %v3652_v18 = vpop.eup %3651 }
 0xbd1   :  { %v2184_v10 = vsel %vm2183_vm4, %v3650_v52, %v2180_v60  ;;  %v2192_v54 = vmul.f32 %v3652_v18, %v2175_v32  ;;  %vm2197_vm7 = vweird.f32 %v3652_v18  ;;  %v1969_v44 = vpop.xlane.xlu2 %1968  ;;  %v1972_v60 = vpop.xlane.xlu0 %1971 }
 0xbd2   :  { %v2189_v43 = vsel %vm2186_vm6, %v2188_v20, %v2184_v10  ;;  %vm2198_vm9 = vmor %vm2196_vm8, %vm2197_vm7  ;;  %v1973_v52 = vsub.f32 %v4730_v45, %v1969_v44  ;;  %v2681_v22 = vpop.f32.mrf.mxu2  ;;  %v4789_v13 = vpop.eup %3653  ;;  %v1974_v10 = vsub.f32 %v4733_v33, %v1972_v60 }
 0xbd3   :  { %v2193_v47 = vsub.f32 1.0, %v2192_v54  ;;  %v2190_v2 = vmul.f32 %v4714_v41, %v2189_v43  ;;  %v2682_v17 = vadd.f32 %v2681_v22, %v4247_v49  ;;  %v2063_v46 = vsel %vm138_vm2, %v4789_v13, 0.0 }
 0xbd4   :  { %v1975_v57 = vmul.f32 1.442695, %v1973_v52  ;;  %v1977_v43 = vmul.f32 1.442695, %v1974_v10 }
 0xbd5   :  { %v2194_v53 = vmul.f32 %v3652_v18, %v2193_v47  ;;  %3457 = vmatmul.msk.f32.vlgmr.msra.gmra.mxu3 %vm138_vm2, %v2190_v2  ;;  %3465 = vmatmul.msk.f32.vlgmr.msra.gmra.mxu1 %vm101_vm5, %v2465_v30  ;;  %v2687_v45 = vsel %vm138_vm2, %v2682_v17, -inf }
 0xbd6   :  { %2815 = vmatpush.msra.mxu3 %v2655_v50  ;;  %3655 = vpow2.f32 %v1975_v57 }
 0xbd7   :  { %v2195_v41 = vadd.f32 %v3652_v18, %v2194_v53  ;;  %3657 = vpow2.f32 %v2056_v62 }
 0xbd8   :  { %2816 = vmatpush.msra.mxu3 %v2654_v55  ;;  %3659 = vpow2.f32 %v1977_v43 }
 0xbd9   :  { %v2199_v31 = vsel %vm2198_vm9, %v3652_v18, %v2195_v41 }
 0xbda   :  { %v2204_v56 = vsel %vm2201_vm10, %v2203_v8, %v2199_v31 }
 0xbdb   :  { %v2205_v24 = vmul.f32 %v4723_v26, %v2204_v56 }
 0xbdc   :  { %v4796_v54 = vpop.eup %3655 }
 0xbdd   :  { %3458 = vmatmul.msk.f32.gmra.mxu3 %vm138_vm2, %v2205_v24  ;;  %3466 = vmatmul.msk.f32.gmra.mxu1 %vm101_vm5, %v2466_v29  ;;  %v1979_v47 = vsel %vm138_vm2, %v4796_v54, 0.0  ;;  %v4801_v2 = vpop.eup %3657 }
 0xbde   :  { %v2060_v30 = vsel %vm138_vm2, %v4801_v2, 0.0  ;;  %v4805_v16 = vpop.eup %3659 }
 0xbdf   :  { %v1982_v33 = vsel %vm138_vm2, %v4805_v16, 0.0 }
 0xbe5   :  { %3471 = vmatmul.msk.f32.vlgmr.msrb.gmra.mxu3 %vm101_vm5, %v2575_v14 }
 0xbed   :  { %3472 = vmatmul.msk.f32.gmra.mxu3 %vm101_vm5, %v2576_v40 }
 0xc42   :  { %v2312_v37 = vpop.f32.mrf.mxu1 }
 0xc4a   :  { %v2315_v26 = vpop.f32.mrf.mxu1 }
 0xc52   :  { %v2490_v35 = vpop.f32.mrf.mxu1 }
 0xc53   :  { %v2491_v9 = vadd.f32 %v2490_v35, %v4247_v49 }
 0xc55   :  { %v2496_v34 = vsel %vm138_vm2, %v2491_v9, -inf }
 0xc56   :  { %2497 = vmax.xlane.f32.xlu1 %v2496_v34 }
 0xc58   :  { %v2370_v48 = vpop.f32.mrf.mxu3 }
 0xc59   :  { %v4778_v21 = vadd.f32 %v2370_v48, %v2312_v37 }
 0xc5a   :  { %v2493_v27 = vpop.f32.mrf.mxu1 }
 0xc5b   :  { %v2494_v1 = vadd.f32 %v2493_v27, %v4247_v49  ;;  %v2684_v27 = vpop.f32.mrf.mxu2 }
 0xc5d   :  { %v2499_v12 = vsel %vm138_vm2, %v2494_v1, -inf }
 0xc5e   :  { %2500 = vmax.xlane.f32.xlu2 %v2499_v12  ;;  %2416 = vmax.xlane.f32.xlu1 %v2415_v36 }
 0xc60   :  { %v2373_v32 = vpop.f32.mrf.mxu3 }
 0xc61   :  { %v4785_v7 = vadd.f32 %v2373_v32, %v2315_v26 }
 0xc66   :  { %2688 = vmax.xlane.f32.xlu2 %v2687_v45  ;;  %2064 = vadd.xlane.f32.xlu1 %v2063_v46 }
 0xc68   :  { %v2600_v18 = vpop.f32.mrf.mxu3 }
 0xc69   :  { %v2601_v20 = vadd.f32 %v2600_v18, %v4247_v49 }
 0xc6b   :  { %v2606_v11 = vsel %vm138_vm2, %v2601_v20, -inf }
 0xc6c   :  { %2607 = vmax.xlane.f32.xlu0 %v2606_v11 }
 0xc6e   :  { %1980 = vadd.xlane.f32.xlu2 %v1979_v47 }
 0xc70   :  { %v2603_v57 = vpop.f32.mrf.mxu3 }
 0xc71   :  { %v4846_v62 = vadd.f32 %v2603_v57, %v4247_v49 }
 0xc73   :  { %v2609_v47 = vsel %vm138_vm2, %v4846_v62, -inf }
 0xc74   :  { %2061 = vadd.xlane.f32.xlu0 %v2060_v30 }
 0xc7c   :  { %1983 = vadd.xlane.f32.xlu0 %v1982_v33 }
 0xcc9   :  { %v2498_v50 = vpop.xlane.xlu1 %2497 }
 0xcca   :  { %v2502_v53 = vsub.f32 %v2491_v9, %v2498_v50 }
 0xccc   :  { %v2504_v42 = vmul.f32 1.442695, %v2502_v53 }
 0xcce   :  { %3661 = vpow2.f32 %v2504_v42 }
 0xcd1   :  { %v2501_v55 = vpop.xlane.xlu2 %2500  ;;  %v2417_v41 = vpop.xlane.xlu1 %2416 }
 0xcd2   :  { %v2503_v8 = vsub.f32 %v2494_v1, %v2501_v55  ;;  %v2421_v31 = vsub.f32 %v2410_v4, %v2417_v41  ;;  %v4826_v4 = vadd.f32 %v4774_v6, %v4247_v49  ;;  %v4839_v6 = vadd.f32 %v2684_v27, %v4247_v49 }
 0xcd4   :  { %v4809_v56 = vpop.eup %3661  ;;  %v2506_v24 = vmul.f32 1.442695, %v2503_v8  ;;  %v2423_v29 = vmul.f32 1.442695, %v2421_v31  ;;  %v2418_v12 = vsel %vm138_vm2, %v4826_v4, -inf  ;;  %v2690_v46 = vsel %vm138_vm2, %v4839_v6, -inf }
 0xcd5   :  { %v2508_v14 = vsel %vm138_vm2, %v4809_v56, 0.0 }
 0xcd6   :  { %3663 = vpow2.f32 %v2506_v24  ;;  %2509 = vadd.xlane.f32.xlu1 %v2508_v14 }
 0xcd7   :  { %3665 = vpow2.f32 %v2423_v29 }
 0xcd9   :  { %v2689_v40 = vpop.xlane.xlu2 %2688  ;;  %v4817_v35 = vpop.xlane.xlu1 %2064 }
 0xcda   :  { %v2693_v37 = vsub.f32 %v2682_v17, %v2689_v40  ;;  %v2092_v31 = vand.u32 2147483648, %v4817_v35  ;;  %vm2086_vm3 = vweird.f32 %v4817_v35  ;;  %v2090_v14 = vand.u32 2147483647, %v4817_v35 }
 0xcdb   :  { %v2545_v40 = vmul.f32 %v4020_v38, %v4740_v59 }
 0xcdc   :  { %v4813_v23 = vpop.eup %3663  ;;  %v2695_v26 = vmul.f32 1.442695, %v2693_v37  ;;  %vm2091_vm4 = vcmp.eq.f32.partialorder %v2090_v14, 8.507059e+37 }
 0xcdd   :  { %v4815_v0 = vpop.eup %3665  ;;  %v2511_v9 = vsel %vm138_vm2, %v4813_v23, 0.0 }
 0xcde   :  { %3667 = vpow2.f32 %v2695_v26  ;;  %2512 = vadd.xlane.f32.xlu2 %v2511_v9  ;;  %v2427_v19 = vsel %vm138_vm2, %v4815_v0, 0.0 }
 0xcdf   :  { %v2608_v34 = vpop.xlane.xlu0 %2607  ;;  %2428 = vadd.xlane.f32.xlu1 %v2427_v19  ;;  %3669 = vrcp.f32 %v4817_v35  ;;  %v2093_v19 = vor.u32 1.1754944e-38, %v2092_v31 }
 0xce0   :  { %v2612_v48 = vsub.f32 %v2601_v20, %v2608_v34  ;;  %v2544_v34 = vmul.f32 %v4020_v38, %v4743_v5 }
 0xce1   :  { %v4832_v52 = vpop.xlane.xlu2 %1980 }
 0xce2   :  { %v2614_v15 = vmul.f32 1.442695, %v2612_v48  ;;  %vm1990_vm7 = vweird.f32 %v4832_v52  ;;  %v1994_v27 = vand.u32 2147483647, %v4832_v52 }
 0xce4   :  { %3671 = vpow2.f32 %v2614_v15  ;;  %v4828_v44 = vpop.eup %3667  ;;  %v1996_v15 = vand.u32 2147483648, %v4832_v52  ;;  %vm1995_vm9 = vcmp.eq.f32.partialorder %v1994_v27, 8.507059e+37 }
 0xce5   :  { %v2699_v1 = vsel %vm138_vm2, %v4828_v44, 0.0  ;;  %v3670_v25 = vpop.eup %3669 }
 0xce6   :  { %2700 = vadd.xlane.f32.xlu2 %v2699_v1  ;;  %v2082_v32 = vmul.f32 %v3670_v25, %v4817_v35  ;;  %vm2087_vm14 = vweird.f32 %v3670_v25  ;;  %v1997_v38 = vor.u32 1.1754944e-38, %v1996_v15 }
 0xce7   :  { %v2062_v36 = vpop.xlane.xlu0 %2061  ;;  %2419 = vmax.xlane.f32.xlu1 %v2418_v12  ;;  %vm2088_vm1 = vmor %vm2086_vm3, %vm2087_vm14 }
 0xce8   :  { %3673 = vrcp.f32 %v2062_v36  ;;  %v2083_v45 = vsub.f32 1.0, %v2082_v32  ;;  %v2077_v43 = vand.u32 2147483648, %v2062_v36  ;;  %v2075_v33 = vand.u32 2147483647, %v2062_v36 }
 0xce9   :  { %3675 = vrcp.f32 %v4832_v52  ;;  %vm2071_vm11 = vweird.f32 %v2062_v36 }
 0xcea   :  { %v4836_v22 = vpop.eup %3671  ;;  %v2084_v11 = vmul.f32 %v3670_v25, %v2083_v45  ;;  %v2078_v53 = vor.u32 1.1754944e-38, %v2077_v43  ;;  %vm2076_vm15 = vcmp.eq.f32.partialorder %v2075_v33, 8.507059e+37 }
 0xceb   :  { %v2618_v17 = vsel %vm138_vm2, %v4836_v22, 0.0 }
 0xcec   :  { %2619 = vadd.xlane.f32.xlu0 %v2618_v17  ;;  %v2085_v41 = vadd.f32 %v3670_v25, %v2084_v11 }
 0xcee   :  { %v3674_v63 = vpop.eup %3673  ;;  %2691 = vmax.xlane.f32.xlu2 %v2690_v46  ;;  %v2089_v9 = vsel %vm2088_vm1, %v3670_v25, %v2085_v41  ;;  %v2463_v46 = vmul.f32 %v4024_v39, %v4743_v5 }
 0xcef   :  { %v2067_v60 = vmul.f32 %v3674_v63, %v2062_v36  ;;  %v4850_v18 = vpop.xlane.xlu0 %1983  ;;  %v3676_v20 = vpop.eup %3675  ;;  %vm2072_vm12 = vweird.f32 %v3674_v63 }
 0xcf0   :  { %3677 = vrcp.f32 %v4850_v18  ;;  %v1986_v49 = vmul.f32 %v3676_v20, %v4832_v52  ;;  %vm2073_vm13 = vmor %vm2071_vm11, %vm2072_vm12  ;;  %vm1991_vm6 = vweird.f32 %v3676_v20  ;;  %v2011_v57 = vand.u32 2147483648, %v4850_v18 }
 0xcf1   :  { %v2068_v10 = vsub.f32 1.0, %v2067_v60  ;;  %vm1992_vm8 = vmor %vm1990_vm7, %vm1991_vm6  ;;  %vm2005_vm12 = vweird.f32 %v4850_v18  ;;  %v2009_v52 = vand.u32 2147483647, %v4850_v18 }
 0xcf2   :  { %v1987_v42 = vsub.f32 1.0, %v1986_v49  ;;  %v2012_v45 = vor.u32 1.1754944e-38, %v2011_v57 }
 0xcf3   :  { %v2069_v30 = vmul.f32 %v3674_v63, %v2068_v10 }
 0xcf4   :  { %2610 = vmax.xlane.f32.xlu0 %v2609_v47  ;;  %v1988_v37 = vmul.f32 %v3676_v20, %v1987_v42 }
 0xcf5   :  { %v2070_v50 = vadd.f32 %v3674_v63, %v2069_v30 }
 0xcf6   :  { %v3678_v8 = vpop.eup %3677  ;;  %v1989_v48 = vadd.f32 %v3676_v20, %v1988_v37 }
 0xcf7   :  { %v2074_v55 = vsel %vm2073_vm13, %v3674_v63, %v2070_v50  ;;  %v2001_v26 = vmul.f32 %v3678_v8, %v4850_v18  ;;  %vm2006_vm10 = vweird.f32 %v3678_v8  ;;  %vm2010_vm13 = vcmp.eq.f32.partialorder %v2009_v52, 8.507059e+37 }
 0xcf8   :  { %v2079_v24 = vsel %vm2076_vm15, %v2078_v53, %v2074_v55  ;;  %v1993_v25 = vsel %vm1992_vm8, %v3676_v20, %v1989_v48  ;;  %vm2007_vm11 = vmor %vm2005_vm12, %vm2006_vm10 }
 0xcf9   :  { %v2080_v29 = vmul.f32 %v4801_v2, %v2079_v24  ;;  %v2094_v2 = vsel %vm2091_vm4, %v2093_v19, %v2089_v9  ;;  %v2002_v35 = vsub.f32 1.0, %v2001_v26  ;;  %v1998_v36 = vsel %vm1995_vm9, %v1997_v38, %v1993_v25 }
 0xcfa   :  { %v2095_v1 = vmul.f32 %v4789_v13, %v2094_v2  ;;  %v1999_v17 = vmul.f32 %v4796_v54, %v1998_v36  ;;  %v2464_v13 = vmul.f32 %v4024_v39, %v4740_v59  ;;  %v1805_v2 = vld [vmem:[#allocation3 + $0x288] sm:$0xff] }
 0xcfb   :  { %3443 = vmatmul.msk.f32.vlgmr.msrb.gmra.mxu0 %vm138_vm2, %v2080_v29  ;;  %v2003_v12 = vmul.f32 %v3678_v8, %v2002_v35  ;;  %2851 = vmatpush.msra.mxu2 %v1805_v2 }
 0xcfc   :  { %2566 = vmatpush.msrb.mxu0 %v2545_v40 }
 0xcfd   :  { %v2004_v32 = vadd.f32 %v3678_v8, %v2003_v12 }
 0xcfe   :  { %2567 = vmatpush.msrb.mxu0 %v2544_v34 }
 0xcff   :  { %v2008_v63 = vsel %vm2007_vm11, %v3678_v8, %v2004_v32 }
 0xd00   :  { %v2013_v60 = vsel %vm2010_vm13, %v2012_v45, %v2008_v63 }
 0xd01   :  { %v2014_v20 = vmul.f32 %v4805_v16, %v2013_v60 }
 0xd03   :  { %3444 = vmatmul.msk.f32.gmra.mxu0 %vm138_vm2, %v2095_v1 }
 0xd0b   :  { %3455 = vmatmul.msk.f32.vlgmr.msra.gmra.mxu0 %vm138_vm2, %v1999_v17 }
 0xd0c   :  { %2786 = vmatpush.msra.mxu0 %v2464_v13 }
 0xd0e   :  { %2787 = vmatpush.msra.mxu0 %v2463_v46 }
 0xd13   :  { %3456 = vmatmul.msk.f32.gmra.mxu0 %vm138_vm2, %v2014_v20 }
 0xd49   :  { %v2510_v54 = vpop.xlane.xlu1 %2509 }
 0xd4a   :  { %3679 = vrcp.f32 %v2510_v54  ;;  %v2525_v47 = vand.u32 2147483648, %v2510_v54  ;;  %v2523_v5 = vand.u32 2147483647, %v2510_v54  ;;  %vm2519_vm15 = vweird.f32 %v2510_v54 }
 0xd4c   :  { %v2526_v30 = vor.u32 1.1754944e-38, %v2525_v47  ;;  %vm2524_vm1 = vcmp.eq.f32.partialorder %v2523_v5, 8.507059e+37 }
 0xd50   :  { %v3680_v18 = vpop.eup %3679 }
 0xd51   :  { %v2515_v59 = vmul.f32 %v3680_v18, %v2510_v54  ;;  %v2513_v10 = vpop.xlane.xlu2 %2512  ;;  %vm2520_vm14 = vweird.f32 %v3680_v18 }
 0xd52   :  { %3681 = vrcp.f32 %v2513_v10  ;;  %v4882_v11 = vpop.xlane.xlu1 %2428  ;;  %vm2521_vm3 = vmor %vm2519_vm15, %vm2520_vm14  ;;  %v2540_v37 = vand.u32 2147483648, %v2513_v10  ;;  %v2538_v26 = vand.u32 2147483647, %v2513_v10  ;;  %vm2534_vm6 = vweird.f32 %v2513_v10 }
 0xd53   :  { %v2516_v43 = vsub.f32 1.0, %v2515_v59  ;;  %3683 = vrcp.f32 %v4882_v11  ;;  %v2444_v35 = vand.u32 2147483648, %v4882_v11  ;;  %vm2438_vm10 = vweird.f32 %v4882_v11 }
 0xd54   :  { %vm2539_vm8 = vcmp.eq.f32.partialorder %v2538_v26, 8.507059e+37  ;;  %v2442_v38 = vand.u32 2147483647, %v4882_v11 }
 0xd55   :  { %v2517_v39 = vmul.f32 %v3680_v18, %v2516_v43  ;;  %v2445_v20 = vor.u32 1.1754944e-38, %v2444_v35 }
 0xd56   :  { %vm2443_vm14 = vcmp.eq.f32.partialorder %v2442_v38, 8.507059e+37 }
 0xd57   :  { %v2518_v49 = vadd.f32 %v3680_v18, %v2517_v39 }
 0xd58   :  { %v3682_v16 = vpop.eup %3681 }
 0xd59   :  { %v4885_v33 = vpop.eup %3683  ;;  %v2522_v50 = vsel %vm2521_vm3, %v3680_v18, %v2518_v49  ;;  %v2530_v53 = vmul.f32 %v3682_v16, %v2513_v10  ;;  %v2701_v42 = vpop.xlane.xlu2 %2700  ;;  %vm2535_vm4 = vweird.f32 %v3682_v16 }
 0xd5a   :  { %v2527_v55 = vsel %vm2524_vm1, %v2526_v30, %v2522_v50  ;;  %v2434_v41 = vmul.f32 %v4885_v33, %v4882_v11  ;;  %3685 = vrcp.f32 %v2701_v42  ;;  %v2420_v8 = vpop.xlane.xlu1 %2419  ;;  %vm2536_vm7 = vmor %vm2534_vm6, %vm2535_vm4  ;;  %vm2439_vm9 = vweird.f32 %v4885_v33  ;;  %v1804_v50 = vld [vmem:[#allocation3 + $0x280] sm:$0xff] }
 0xd5b   :  { %v2531_v31 = vsub.f32 1.0, %v2530_v53  ;;  %v2422_v29 = vsub.f32 %v4826_v4, %v2420_v8  ;;  %v2528_v14 = vmul.f32 %v4809_v56, %v2527_v55  ;;  %v2541_v56 = vor.u32 1.1754944e-38, %v2540_v37  ;;  %vm4903_vm12 = vmor %vm2438_vm10, %vm2439_vm9  ;;  %v1803_v53 = vld [vmem:[#allocation3 + $0x278] sm:$0xff]  ;;  %2852 = vmatpush.msra.mxu2 %v1804_v50  ;;  %v1802_v8 = vld [vmem:[#allocation3 + $0x270] sm:$0xff] }
 0xd5c   :  { %v2435_v24 = vsub.f32 1.0, %v2434_v41  ;;  %v2714_v57 = vand.u32 2147483647, %v2701_v42  ;;  %v2716_v17 = vand.u32 2147483648, %v2701_v42  ;;  %vm2710_vm13 = vweird.f32 %v2701_v42 }
 0xd5d   :  { %v2532_v40 = vmul.f32 %v3682_v16, %v2531_v31  ;;  %v2425_v19 = vmul.f32 1.442695, %v2422_v29  ;;  %3467 = vmatmul.msk.f32.vlgmr.msrb.gmra.mxu0 %vm138_vm2, %v2528_v14  ;;  %2853 = vmatpush.msra.mxu2 %v1803_v53 }
 0xd5e   :  { %v2436_v9 = vmul.f32 %v4885_v33, %v2435_v24  ;;  %vm2715_vm3 = vcmp.eq.f32.partialorder %v2714_v57, 8.507059e+37  ;;  %v2717_v11 = vor.u32 1.1754944e-38, %v2716_v17 }
 0xd5f   :  { %v4893_v34 = vpop.xlane.xlu0 %2619  ;;  %v2533_v4 = vadd.f32 %v3682_v16, %v2532_v40  ;;  %2854 = vmatpush.msra.mxu2 %v1802_v8 }
 0xd60   :  { %3687 = vrcp.f32 %v4893_v34  ;;  %v3686_v48 = vpop.eup %3685  ;;  %v2437_v1 = vadd.f32 %v4885_v33, %v2436_v9  ;;  %v2635_v5 = vand.u32 2147483648, %v4893_v34  ;;  %vm2629_vm4 = vweird.f32 %v4893_v34 }
 0xd61   :  { %3689 = vpow2.f32 %v2425_v19  ;;  %v2706_v15 = vmul.f32 %v3686_v48, %v2701_v42  ;;  %v2692_v27 = vpop.xlane.xlu2 %2691  ;;  %v2537_v12 = vsel %vm2536_vm7, %v3682_v16, %v2533_v4  ;;  %vm2711_vm11 = vweird.f32 %v3686_v48 }
 0xd62   :  { %v2694_v25 = vsub.f32 %v4839_v6, %v2692_v27  ;;  %v2542_v32 = vsel %vm2539_vm8, %v2541_v56, %v2537_v12  ;;  %v2441_v60 = vsel %vm4903_vm12, %v4885_v33, %v2437_v1  ;;  %vm2712_vm15 = vmor %vm2710_vm13, %vm2711_vm11  ;;  %v2633_v33 = vand.u32 2147483647, %v4893_v34 }
 0xd63   :  { %v2707_v36 = vsub.f32 1.0, %v2706_v15  ;;  %v2543_v13 = vmul.f32 %v4813_v23, %v2542_v32  ;;  %v2446_v47 = vsel %vm2443_vm14, %v2445_v20, %v2441_v60  ;;  %v2636_v31 = vor.u32 1.1754944e-38, %v2635_v5 }
 0xd64   :  { %v2697_v52 = vmul.f32 1.442695, %v2694_v25  ;;  %v2447_v41 = vmul.f32 %v4815_v0, %v2446_v47  ;;  %vm2634_vm7 = vcmp.eq.f32.partialorder %v2633_v33, 8.507059e+37 }
 0xd65   :  { %v2708_v46 = vmul.f32 %v3686_v48, %v2707_v36  ;;  %3468 = vmatmul.msk.f32.gmra.mxu0 %vm138_vm2, %v2543_v13 }
 0xd66   :  { %v3688_v63 = vpop.eup %3687  ;;  %3691 = vpow2.f32 %v2697_v52 }
 0xd67   :  { %v4907_v6 = vpop.eup %3689  ;;  %v2625_v54 = vmul.f32 %v3688_v63, %v4893_v34  ;;  %v2611_v23 = vpop.xlane.xlu0 %2610  ;;  %v2709_v18 = vadd.f32 %v3686_v48, %v2708_v46  ;;  %vm2630_vm1 = vweird.f32 %v3688_v63 }
 0xd68   :  { %v2430_v59 = vsel %vm138_vm2, %v4907_v6, 0.0  ;;  %v2613_v10 = vsub.f32 %v4846_v62, %v2611_v23  ;;  %vm2631_vm6 = vmor %vm2629_vm4, %vm2630_vm1 }
 0xd69   :  { %v2626_v43 = vsub.f32 1.0, %v2625_v54  ;;  %2431 = vadd.xlane.f32.xlu1 %v2430_v59  ;;  %v2713_v39 = vsel %vm2712_vm15, %v3686_v48, %v2709_v18 }
 0xd6a   :  { %v2616_v49 = vmul.f32 1.442695, %v2613_v10  ;;  %v2718_v16 = vsel %vm2715_vm3, %v2717_v11, %v2713_v39 }
 0xd6b   :  { %v2627_v30 = vmul.f32 %v3688_v63, %v2626_v43  ;;  %v2719_v62 = vmul.f32 %v4828_v44, %v2718_v16 }
 0xd6c   :  { %3693 = vpow2.f32 %v2616_v49  ;;  %v4920_v42 = vpop.eup %3691 }
 0xd6d   :  { %v2628_v55 = vadd.f32 %v3688_v63, %v2627_v30  ;;  %3477 = vmatmul.msk.f32.vlgmr.msrb.gmra.mxu1 %vm138_vm2, %v2719_v62  ;;  %v2702_v24 = vsel %vm138_vm2, %v4920_v42, 0.0  ;;  %3479 = vmatmul.msk.f32.vlgmr.msra.gmra.mxu0 %vm138_vm2, %v2447_v41 }
 0xd6e   :  { %2703 = vadd.xlane.f32.xlu2 %v2702_v24 }
 0xd6f   :  { %v2632_v29 = vsel %vm2631_vm6, %v3688_v63, %v2628_v55 }
 0xd70   :  { %v2637_v44 = vsel %vm2634_vm7, %v2636_v31, %v2632_v29 }
 0xd71   :  { %v2638_v14 = vmul.f32 %v4836_v22, %v2637_v44 }
 0xd72   :  { %v4929_v40 = vpop.eup %3693 }
 0xd73   :  { %3481 = vmatmul.msk.f32.vlgmr.msra.gmra.mxu3 %vm138_vm2, %v2638_v14  ;;  %v2621_v0 = vsel %vm138_vm2, %v4929_v40, 0.0 }
 0xd74   :  { %2622 = vadd.xlane.f32.xlu0 %v2621_v0 }
 0xd78   :  { %v2121_v37 = vpop.f32.mrf.mxu0 }
 0xd80   :  { %v2124_v26 = vpop.f32.mrf.mxu0 }
 0xd88   :  { %v2341_v9 = vpop.f32.mrf.mxu0 }
 0xd89   :  { %v2342_v19 = vadd.f32 %v2341_v9, %v2121_v37 }
 0xd8b   :  { %v2376_v34 = vadd.f32 %v4778_v21, %v2342_v19 }
 0xd8d   :  { %3483 = vmatmul.msk.f32.vlgmr.msra.gmra.mxu2 %vm101_vm5, %v2376_v34 }
 0xd90   :  { %v2344_v2 = vpop.f32.mrf.mxu0 }
 0xd91   :  { %v2345_v48 = vadd.f32 %v2344_v2, %v2124_v26 }
 0xd93   :  { %v2377_v22 = vadd.f32 %v4785_v7, %v2345_v48 }
 0xd95   :  { %3484 = vmatmul.msk.f32.gmra.mxu2 %vm101_vm5, %v2377_v22 }
 0xdda   :  { %v2569_v56 = vpop.f32.mrf.mxu0 }
 0xddc   :  { %v2432_v4 = vpop.xlane.xlu1 %2431 }
 0xddd   :  { %3695 = vrcp.f32 %v2432_v4  ;;  %v2459_v25 = vand.u32 2147483648, %v2432_v4  ;;  %v2457_v21 = vand.u32 2147483647, %v2432_v4  ;;  %vm2453_vm9 = vweird.f32 %v2432_v4 }
 0xddf   :  { %v2460_v17 = vor.u32 1.1754944e-38, %v2459_v25  ;;  %vm2458_vm12 = vcmp.eq.f32.partialorder %v2457_v21, 8.507059e+37 }
 0xde1   :  { %v2704_v35 = vpop.xlane.xlu2 %2703 }
 0xde2   :  { %3697 = vrcp.f32 %v2704_v35  ;;  %v2572_v7 = vpop.f32.mrf.mxu0  ;;  %v2731_v63 = vand.u32 2147483648, %v2704_v35  ;;  %v2729_v20 = vand.u32 2147483647, %v2704_v35  ;;  %vm2725_vm13 = vweird.f32 %v2704_v35 }
 0xde3   :  { %v3696_v15 = vpop.eup %3695 }
 0xde4   :  { %v2449_v27 = vmul.f32 %v3696_v15, %v2432_v4  ;;  %vm2454_vm8 = vweird.f32 %v3696_v15  ;;  %v2732_v59 = vor.u32 1.1754944e-38, %v2731_v63  ;;  %vm2730_vm15 = vcmp.eq.f32.partialorder %v2729_v20, 8.507059e+37  ;;  %v1808_v63 = vld [vmem:[#allocation3 + $0x2a0] sm:$0xff] }
 0xde5   :  { %vm2455_vm10 = vmor %vm2453_vm9, %vm2454_vm8 }
 0xde6   :  { %v2450_v1 = vsub.f32 1.0, %v2449_v27 }
 0xde7   :  { %v2623_v12 = vpop.xlane.xlu0 %2622 }
 0xde8   :  { %v2451_v38 = vmul.f32 %v3696_v15, %v2450_v1  ;;  %3699 = vrcp.f32 %v2623_v12  ;;  %v3698_v36 = vpop.eup %3697  ;;  %v2650_v11 = vand.u32 2147483648, %v2623_v12  ;;  %v2648_v39 = vand.u32 2147483647, %v2623_v12 }
 0xde9   :  { %v2721_v32 = vmul.f32 %v3698_v36, %v2704_v35  ;;  %vm2726_vm11 = vweird.f32 %v3698_v36  ;;  %vm2644_vm1 = vweird.f32 %v2623_v12 }
 0xdea   :  { %v2452_v57 = vadd.f32 %v3696_v15, %v2451_v38  ;;  %vm2727_vm14 = vmor %vm2725_vm13, %vm2726_vm11  ;;  %v2789_v49 = vpop.f32.mrf.mxu0  ;;  %v2760_v33 = vpop.f32.mrf.mxu1  ;;  %vm2649_vm6 = vcmp.eq.f32.partialorder %v2648_v39, 8.507059e+37 }
 0xdeb   :  { %v2722_v52 = vsub.f32 1.0, %v2721_v32  ;;  %v2790_v53 = vadd.f32 %v2789_v49, %v2569_v56 }
 0xdec   :  { %v2456_v13 = vsel %vm2455_vm10, %v3696_v15, %v2452_v57 }
 0xded   :  { %v2461_v45 = vsel %vm2458_vm12, %v2460_v17, %v2456_v13  ;;  %v2723_v60 = vmul.f32 %v3698_v36, %v2722_v52  ;;  %v1809_v13 = vld [vmem:[#allocation3 + $0x2a8] sm:$0xff] }
 0xdee   :  { %v3700_v46 = vpop.eup %3699  ;;  %v2462_v54 = vmul.f32 %v4907_v6, %v2461_v45  ;;  %v2651_v6 = vor.u32 1.1754944e-38, %v2650_v11  ;;  %2995 = vmatpush.msra.mxu1 %v1809_v13 }
 0xdef   :  { %v2640_v23 = vmul.f32 %v3700_v46, %v2623_v12  ;;  %v2724_v18 = vadd.f32 %v3698_v36, %v2723_v60  ;;  %vm2645_vm3 = vweird.f32 %v3700_v46  ;;  %v1807_v60 = vld [vmem:[#allocation3 + $0x298] sm:$0xff] }
 0xdf0   :  { %3480 = vmatmul.msk.f32.gmra.mxu0 %vm138_vm2, %v2462_v54  ;;  %vm2646_vm4 = vmor %vm2644_vm1, %vm2645_vm3  ;;  %2996 = vmatpush.msra.mxu1 %v1808_v63  ;;  %v1810_v63 = vld [vmem:[#allocation3 + $0x2b0] sm:$0xff] }
 0xdf1   :  { %v2641_v10 = vsub.f32 1.0, %v2640_v23  ;;  %v2728_v43 = vsel %vm2727_vm14, %v3698_v36, %v2724_v18  ;;  %v1806_v18 = vld [vmem:[#allocation3 + $0x290] sm:$0xff] }
 0xdf2   :  { %v2733_v5 = vsel %vm2730_vm15, %v2732_v59, %v2728_v43  ;;  %2997 = vmatpush.msra.mxu1 %v1807_v60 }
 0xdf3   :  { %v2642_v47 = vmul.f32 %v3700_v46, %v2641_v10  ;;  %v2734_v16 = vmul.f32 %v4920_v42, %v2733_v5  ;;  %v3530_v42 = vld [vmem:[#allocation3 + $0x2f3] ss:$0 sm:$0xff] }
 0xdf4   :  { %2998 = vmatpush.msra.mxu1 %v1806_v18 }
 0xdf5   :  { %v2643_v30 = vadd.f32 %v3700_v46, %v2642_v47  ;;  %3478 = vmatmul.msk.f32.gmra.mxu1 %vm138_vm2, %v2734_v16 }
 0xdf6   :  { %v2818_v50 = vpop.f32.mrf.mxu3 }
 0xdf7   :  { %v2819_v62 = vadd.f32 %v2818_v50, %v2760_v33  ;;  %v2647_v55 = vsel %vm2646_vm4, %v3700_v46, %v2643_v30 }
 0xdf8   :  { %v2652_v41 = vsel %vm2649_vm6, %v2651_v6, %v2647_v55  ;;  %v4968_v55 = vld [vmem:[#allocation3 + $0x2f5] ss:$0 sm:$0xff] }
 0xdf9   :  { %v2824_v8 = vadd.f32 %v2819_v62, %v2790_v53  ;;  %v2653_v31 = vmul.f32 %v4929_v40, %v2652_v41 }
 0xdfb   :  { %3482 = vmatmul.msk.f32.gmra.mxu3 %vm138_vm2, %v2653_v31  ;;  %3485 = vmatmul.msk.f32.gmra.mxu2 %vm101_vm5, %v2824_v8 }
 0xe10   :  { %v2856_v24 = vpop.f32.mrf.mxu2 }
 0xe11   :  { %v2857_v29 = vadd.f32 %v3530_v42, %v2856_v24 }
 0xe13   :  { %v2868_v44 = vadd.f32 %v2857_v29, %v4549_v61 }
 0xe15   :  { %v2872_v14 = vsel %vm101_vm5, %v2868_v44, 0.0 }
 0xe16   :  { %2873 = vadd.xlane.f32.xlu0 %v2872_v14 }
 0xe18   :  { %v2859_v0 = vpop.f32.mrf.mxu2 }
 0xe19   :  { %v2860_v37 = vadd.f32 %v3530_v42, %v2859_v0 }
 0xe1b   :  { %v2869_v26 = vadd.f32 %v2860_v37, %v4560_v28 }
 0xe1d   :  { %v2875_v9 = vsel %vm101_vm5, %v2869_v26, 0.0 }
 0xe1e   :  { %2876 = vadd.xlane.f32.xlu1 %v2875_v9 }
 0xe6d   :  { %v2792_v40 = vpop.f32.mrf.mxu0 }
 0xe6e   :  { %v2793_v48 = vadd.f32 %v2792_v40, %v2572_v7 }
 0xe72   :  { %v2763_v19 = vpop.f32.mrf.mxu1 }
 0xe7e   :  { %v2821_v34 = vpop.f32.mrf.mxu3  ;;  %v2862_v2 = vpop.f32.mrf.mxu2 }
 0xe7f   :  { %v2822_v22 = vadd.f32 %v2821_v34, %v2763_v19  ;;  %v2863_v4 = vadd.f32 %v3530_v42, %v2862_v2 }
 0xe81   :  { %v2825_v56 = vadd.f32 %v2822_v22, %v2793_v48  ;;  %v2870_v61 = vadd.f32 %v2863_v4, %v4630_v3 }
 0xe83   :  { %3486 = vmatmul.msk.f32.gmra.mxu2 %vm101_vm5, %v2825_v56  ;;  %v2878_v35 = vsel %vm101_vm5, %v2870_v61, 0.0 }
 0xe84   :  { %2879 = vadd.xlane.f32.xlu2 %v2878_v35 }
 0xe89   :  { %v2874_v15 = vpop.xlane.xlu0 %2873 }
 0xe8a   :  { %v2884_v28 = vmul.f32 %v2874_v15, %v3958_v58 }
 0xe8c   :  { %v2888_v27 = vsub.f32 %v2868_v44, %v2884_v28 }
 0xe8e   :  { %v2892_v1 = vmul.f32 %v2888_v27, %v2888_v27 }
 0xe90   :  { %v2896_v25 = vsel %vm101_vm5, %v2892_v1, 0.0 }
 0xe91   :  { %2897 = vadd.xlane.f32.xlu0 %v2896_v25  ;;  %v2877_v12 = vpop.xlane.xlu1 %2876 }
 0xe92   :  { %v2885_v38 = vmul.f32 %v2877_v12, %v3958_v58 }
 0xe94   :  { %v2889_v21 = vsub.f32 %v2869_v26, %v2885_v38  ;;  %v1817_v38 = vld [vmem:[#allocation3 + $0x2e8] sm:$0xff] }
 0xe95   :  { %3069 = vmatpush.msrb.mxu0 %v1817_v38 }
 0xe96   :  { %v2893_v36 = vmul.f32 %v2889_v21, %v2889_v21 }
 0xe98   :  { %v2899_v3 = vsel %vm101_vm5, %v2893_v36, 0.0  ;;  %v1815_v36 = vld [vmem:[#allocation3 + $0x2d8] sm:$0xff] }
 0xe99   :  { %2900 = vadd.xlane.f32.xlu1 %v2899_v3  ;;  %v1814_v3 = vld [vmem:[#allocation3 + $0x2d0] sm:$0xff] }
 0xef7   :  { %v2880_v32 = vpop.xlane.xlu2 %2879 }
 0xef8   :  { %v2886_v7 = vmul.f32 %v2880_v32, %v3958_v58  ;;  %v1813_v32 = vld [vmem:[#allocation3 + $0x2c8] sm:$0xff] }
 0xefa   :  { %v4957_v57 = vsub.f32 %v2870_v61, %v2886_v7  ;;  %v4996_v7 = vld [vmem:[#allocation3 + $0x2f6] ss:$0 sm:$0xff] }
 0xefc   :  { %v2894_v17 = vmul.f32 %v4957_v57, %v4957_v57 }
 0xefe   :  { %v2902_v52 = vsel %vm101_vm5, %v2894_v17, 0.0 }
 0xeff   :  { %2903 = vadd.xlane.f32.xlu2 %v2902_v52  ;;  %v1811_v52 = vld [vmem:[#allocation3 + $0x2b8] sm:$0xff] }
 0xf04   :  { %v2898_v45 = vpop.xlane.xlu0 %2897 }
 0xf05   :  { %v2908_v46 = vmul.f32 %v2898_v45, %v3958_v58 }
 0xf06   :  { %v2865_v20 = vpop.f32.mrf.mxu2 }
 0xf07   :  { %v2912_v54 = vadd.f32 1e-12, %v2908_v46  ;;  %v2866_v23 = vadd.f32 %v3530_v42, %v2865_v20 }
 0xf09   :  { %3701 = vrsqrt.f32 %v2912_v54  ;;  %v2871_v59 = vadd.f32 %v2866_v23, %v4640_v51  ;;  %vm2922_vm7 = vweird.f32 %v2912_v54  ;;  %v4966_v51 = vld [vmem:[#allocation3 + $0x2f4] ss:$0 sm:$0xff] }
 0xf0b   :  { %v2881_v10 = vsel %vm101_vm5, %v2871_v59, 0.0 }
 0xf0c   :  { %2882 = vadd.xlane.f32.xlu0 %v2881_v10  ;;  %v2901_v11 = vpop.xlane.xlu1 %2900 }
 0xf0d   :  { %v2909_v43 = vmul.f32 %v2901_v11, %v3958_v58 }
 0xf0f   :  { %v3702_v47 = vpop.eup %3701  ;;  %v2913_v39 = vadd.f32 1e-12, %v2909_v43 }
 0xf10   :  { %v2917_v5 = vmul.f32 %v3702_v47, %v2912_v54  ;;  %vm2923_vm2 = vweird.f32 %v3702_v47 }
 0xf11   :  { %3703 = vrsqrt.f32 %v2913_v39  ;;  %vm2924_vm8 = vmor %vm2922_vm7, %vm2923_vm2  ;;  %vm2932_vm10 = vweird.f32 %v2913_v39 }
 0xf12   :  { %v2918_v49 = vmul.f32 %v3702_v47, %v2917_v5 }
 0xf14   :  { %v2919_v16 = vmul.f32 0.5, %v2918_v49 }
 0xf16   :  { %v2920_v30 = vsub.f32 1.5, %v2919_v16 }
 0xf17   :  { %v3704_v6 = vpop.eup %3703 }
 0xf18   :  { %v2921_v33 = vmul.f32 %v3702_v47, %v2920_v30  ;;  %v2927_v50 = vmul.f32 %v3704_v6, %v2913_v39  ;;  %vm2933_vm9 = vweird.f32 %v3704_v6 }
 0xf19   :  { %vm2934_vm12 = vmor %vm2932_vm10, %vm2933_vm9 }
 0xf1a   :  { %v2925_v53 = vsel %vm2924_vm8, %v3702_v47, %v2921_v33  ;;  %v2928_v62 = vmul.f32 %v3704_v6, %v2927_v50 }
 0xf1b   :  { %v2956_v41 = vmul.f32 %v2925_v53, %v2888_v27 }
 0xf1c   :  { %v2929_v8 = vmul.f32 0.5, %v2928_v62 }
 0xf1d   :  { %v2961_v31 = vmul.f32 %v4966_v51, %v2956_v41 }
 0xf1e   :  { %v2930_v42 = vsub.f32 1.5, %v2929_v8 }
 0xf1f   :  { %v4972_v24 = vadd.f32 %v4968_v55, %v2961_v31 }
 0xf20   :  { %v2931_v29 = vmul.f32 %v3704_v6, %v2930_v42 }
 0xf21   :  { %3487 = vmatmul.msk.f32.vlgmr.msra.gmra.mxu1 %vm101_vm5, %v4972_v24 }
 0xf22   :  { %v2935_v44 = vsel %vm2934_vm12, %v3704_v6, %v2931_v29 }
 0xf23   :  { %v2957_v14 = vmul.f32 %v2935_v44, %v2889_v21  ;;  %v1816_v21 = vld [vmem:[#allocation3 + $0x2e0] sm:$0xff] }
 0xf24   :  { %3070 = vmatpush.msrb.mxu0 %v1816_v21 }
 0xf25   :  { %v2962_v0 = vmul.f32 %v4966_v51, %v2957_v14 }
 0xf26   :  { %3071 = vmatpush.msrb.mxu0 %v1815_v36 }
 0xf27   :  { %v4978_v37 = vadd.f32 %v4968_v55, %v2962_v0 }
 0xf28   :  { %3072 = vmatpush.msrb.mxu0 %v1814_v3 }
 0xf29   :  { %3488 = vmatmul.msk.f32.gmra.mxu1 %vm101_vm5, %v4978_v37 }
 0xf2a   :  { %3073 = vmatpush.msrb.mxu0 %v1813_v32 }
 0xf72   :  { %v2904_v26 = vpop.xlane.xlu2 %2903 }
 0xf73   :  { %v2910_v9 = vmul.f32 %v2904_v26, %v3958_v58 }
 0xf75   :  { %v2914_v40 = vadd.f32 1e-12, %v2910_v9 }
 0xf77   :  { %3705 = vrsqrt.f32 %v2914_v40  ;;  %vm2942_vm13 = vweird.f32 %v2914_v40 }
 0xf7d   :  { %v3706_v19 = vpop.eup %3705 }
 0xf7e   :  { %v2937_v34 = vmul.f32 %v3706_v19, %v2914_v40  ;;  %vm2943_vm11 = vweird.f32 %v3706_v19 }
 0xf7f   :  { %v2883_v2 = vpop.xlane.xlu0 %2882  ;;  %vm2944_vm14 = vmor %vm2942_vm13, %vm2943_vm11  ;;  %vm3201_vm11 = vcmask 1040384  }
 0xf80   :  { %v2938_v48 = vmul.f32 %v3706_v19, %v2937_v34  ;;  %v2887_v22 = vmul.f32 %v2883_v2, %v3958_v58 }
 0xf82   :  { %v2939_v4 = vmul.f32 0.5, %v2938_v48  ;;  %v4984_v56 = vsub.f32 %v2871_v59, %v2887_v22 }
 0xf84   :  { %v2940_v61 = vsub.f32 1.5, %v2939_v4  ;;  %v2895_v35 = vmul.f32 %v4984_v56, %v4984_v56 }
 0xf86   :  { %v2941_v15 = vmul.f32 %v3706_v19, %v2940_v61  ;;  %v2905_v28 = vsel %vm101_vm5, %v2895_v35, 0.0 }
 0xf87   :  { %2906 = vadd.xlane.f32.xlu1 %v2905_v28 }
 0xf88   :  { %v2945_v27 = vsel %vm2944_vm14, %v3706_v19, %v2941_v15 }
 0xf89   :  { %v2958_v1 = vmul.f32 %v2945_v27, %v4957_v57  ;;  %v1812_v57 = vld [vmem:[#allocation3 + $0x2c0] sm:$0xff] }
 0xf8a   :  { %3074 = vmatpush.msrb.mxu0 %v1812_v57 }
 0xf8b   :  { %v2963_v25 = vmul.f32 %v4966_v51, %v2958_v1 }
 0xf8c   :  { %3075 = vmatpush.msrb.mxu0 %v1811_v52 }
 0xf8d   :  { %v4992_v12 = vadd.f32 %v4968_v55, %v2963_v25 }
 0xf8e   :  { %3076 = vmatpush.msrb.mxu0 %v1810_v63 }
 0xf8f   :  { %3489 = vmatmul.msk.f32.gmra.mxu1 %vm101_vm5, %v4992_v12 }
 0xf9e   :  { %v3000_v17 = vpop.f32.mrf.mxu1 }
 0xf9f   :  { %v3001_v13 = vadd.f32 %v4996_v7, %v3000_v17 }
 0xfa1   :  { %v3016_v45 = vmul.f32 0.044715, %v3001_v13  ;;  %v3012_v5 = vmul.f32 0.5, %v3001_v13 }
 0xfa3   :  { %v3020_v46 = vmul.f32 %v3016_v45, %v3001_v13 }
 0xfa5   :  { %v3024_v60 = vmul.f32 %v3020_v46, %v3001_v13 }
 0xfa6   :  { %v3003_v20 = vpop.f32.mrf.mxu1 }
 0xfa7   :  { %v3028_v54 = vadd.f32 %v3024_v60, %v3001_v13  ;;  %v3004_v23 = vadd.f32 %v4996_v7, %v3003_v20 }
 0xfa9   :  { %v3032_v18 = vmul.f32 0.7978846, %v3028_v54  ;;  %v3017_v59 = vmul.f32 0.044715, %v3004_v23  ;;  %v3013_v6 = vmul.f32 0.5, %v3004_v23 }
 0xfab   :  { %3707 = vtanh.f32 %v3032_v18  ;;  %v3021_v10 = vmul.f32 %v3017_v59, %v3004_v23 }
 0xfad   :  { %v3025_v11 = vmul.f32 %v3021_v10, %v3004_v23 }
 0xfaf   :  { %v3029_v43 = vadd.f32 %v3025_v11, %v3004_v23 }
 0xfb1   :  { %v3708_v47 = vpop.eup %3707  ;;  %v3033_v39 = vmul.f32 0.7978846, %v3029_v43 }
 0xfb2   :  { %v3040_v49 = vadd.f32 1.0, %v3708_v47 }
 0xfb3   :  { %3709 = vtanh.f32 %v3033_v39 }
 0xfb4   :  { %v3044_v16 = vmul.f32 %v3040_v49, %v3012_v5 }
 0xfb6   :  { %3491 = vmatmul.msk.f32.vlgmr.msrb.gmra.mxu0 %vm1646_vm0, %v3044_v16 }
 0xfb9   :  { %v3710_v30 = vpop.eup %3709 }
 0xfba   :  { %v3041_v33 = vadd.f32 1.0, %v3710_v30 }
 0xfbc   :  { %v3045_v50 = vmul.f32 %v3041_v33, %v3013_v6 }
 0xfbe   :  { %3492 = vmatmul.msk.f32.gmra.mxu0 %vm1646_vm0, %v3045_v50 }
 0xffa   :  { %v2907_v53 = vpop.xlane.xlu1 %2906 }
 0xffb   :  { %v2911_v62 = vmul.f32 %v2907_v53, %v3958_v58 }
 0xffd   :  { %v2915_v41 = vadd.f32 1e-12, %v2911_v62 }
 0xfff   :  { %3711 = vrsqrt.f32 %v2915_v41  ;;  %vm2952_vm3 = vweird.f32 %v2915_v41 }
0x1005   :  { %v3712_v8 = vpop.eup %3711 }
0x1006   :  { %v2947_v31 = vmul.f32 %v3712_v8, %v2915_v41  ;;  %vm2953_vm15 = vweird.f32 %v3712_v8 }
0x1007   :  { %vm2954_vm1 = vmor %vm2952_vm3, %vm2953_vm15  ;;  %vm3233_vm3 = vcmask 254976  }
0x1008   :  { %v2948_v42 = vmul.f32 %v3712_v8, %v2947_v31 }
0x100a   :  { %v2949_v29 = vmul.f32 0.5, %v2948_v42 }
0x100c   :  { %v2950_v44 = vsub.f32 1.5, %v2949_v29  ;;  %v3006_v14 = vpop.f32.mrf.mxu1 }
0x100d   :  { %v3007_v0 = vadd.f32 %v4996_v7, %v3006_v14 }
0x100e   :  { %v2951_v26 = vmul.f32 %v3712_v8, %v2950_v44 }
0x100f   :  { %v3018_v9 = vmul.f32 0.044715, %v3007_v0  ;;  %v3014_v15 = vmul.f32 0.5, %v3007_v0 }
0x1010   :  { %v2955_v40 = vsel %vm2954_vm1, %v3712_v8, %v2951_v26 }
0x1011   :  { %v2959_v19 = vmul.f32 %v2955_v40, %v4984_v56  ;;  %v3022_v34 = vmul.f32 %v3018_v9, %v3007_v0  ;;  %v3534_v56 = vld [vmem:[#allocation3 + $0x2f7] ss:$0 sm:$0xff] }
0x1013   :  { %v3026_v2 = vmul.f32 %v3022_v34, %v3007_v0  ;;  %v2964_v48 = vmul.f32 %v4966_v51, %v2959_v19 }
0x1015   :  { %v5007_v22 = vadd.f32 %v4968_v55, %v2964_v48  ;;  %v3030_v4 = vadd.f32 %v3026_v2, %v3007_v0 }
0x1017   :  { %3490 = vmatmul.msk.f32.gmra.mxu1 %vm101_vm5, %v5007_v22  ;;  %v3034_v61 = vmul.f32 0.7978846, %v3030_v4 }
0x1019   :  { %3713 = vtanh.f32 %v3034_v61  ;;  %v5034_v61 = vld [vmem:[#allocation3 + $0x2f8] ss:$0 sm:$0xff] }
0x101f   :  { %v3714_v35 = vpop.eup %3713 }
0x1020   :  { %v3042_v28 = vadd.f32 1.0, %v3714_v35 }
0x1022   :  { %v3046_v27 = vmul.f32 %v3042_v28, %v3014_v15  ;;  %v5036_v28 = vld [vmem:[#allocation3 + $0x2f9] ss:$0 sm:$0xff] }
0x1024   :  { %3493 = vmatmul.msk.f32.gmra.mxu0 %vm1646_vm0, %v3046_v27 }
0x1033   :  { %v3078_v1 = vpop.f32.mrf.mxu0 }
0x1034   :  { %v3079_v25 = vadd.f32 %v3534_v56, %v3078_v1 }
0x1036   :  { %v3090_v51 = vadd.f32 %v3079_v25, %v4972_v24 }
0x1038   :  { %v3094_v55 = vsel %vm101_vm5, %v3090_v51, 0.0 }
0x1039   :  { %3095 = vadd.xlane.f32.xlu0 %v3094_v55 }
0x103b   :  { %v3081_v38 = vpop.f32.mrf.mxu0 }
0x103c   :  { %v3082_v21 = vadd.f32 %v3534_v56, %v3081_v38 }
0x103e   :  { %v3091_v36 = vadd.f32 %v3082_v21, %v4978_v37 }
0x1040   :  { %v3097_v3 = vsel %vm101_vm5, %v3091_v36, 0.0 }
0x1041   :  { %3098 = vadd.xlane.f32.xlu0 %v3097_v3  ;;  %v3206_v3 = vld [vmem:[#allocation3 + $0xf8] sm:$0xff] }
0x1042   :  { %3224 = vmatpush.msrb.mxu3 %v3206_v3 }
0x1094   :  { %v3009_v32 = vpop.f32.mrf.mxu1 }
0x1095   :  { %v3010_v57 = vadd.f32 %v4996_v7, %v3009_v32  ;;  %v3205_v32 = vld [vmem:[#allocation3 + $0xf0] sm:$0xff] }
0x1096   :  { %3225 = vmatpush.msrb.mxu3 %v3205_v32 }
0x1097   :  { %v3019_v17 = vmul.f32 0.044715, %v3010_v57  ;;  %v3015_v37 = vmul.f32 0.5, %v3010_v57 }
0x1099   :  { %v3023_v52 = vmul.f32 %v3019_v17, %v3010_v57 }
0x109b   :  { %v3027_v13 = vmul.f32 %v3023_v52, %v3010_v57 }
0x109d   :  { %v3031_v63 = vadd.f32 %v3027_v13, %v3010_v57  ;;  %v3204_v57 = vld [vmem:[#allocation3 + $0xe8] sm:$0xff]  ;;  %v3203_v13 = vld [vmem:[#allocation3 + $0xe0] sm:$0xff] }
0x109e   :  { %3226 = vmatpush.msrb.mxu3 %v3204_v57 }
0x109f   :  { %v3035_v45 = vmul.f32 0.7978846, %v3031_v63 }
0x10a0   :  { %3227 = vmatpush.msrb.mxu3 %v3203_v13 }
0x10a1   :  { %v3084_v46 = vpop.f32.mrf.mxu0  ;;  %3715 = vtanh.f32 %v3035_v45 }
0x10a2   :  { %v3085_v24 = vadd.f32 %v3534_v56, %v3084_v46 }
0x10a4   :  { %v3092_v60 = vadd.f32 %v3085_v24, %v4992_v12 }
0x10a6   :  { %v3100_v20 = vsel %vm101_vm5, %v3092_v60, 0.0 }
0x10a7   :  { %v3716_v54 = vpop.eup %3715  ;;  %3101 = vadd.xlane.f32.xlu2 %v3100_v20 }
0x10a8   :  { %v3043_v23 = vadd.f32 1.0, %v3716_v54 }
0x10aa   :  { %v3047_v18 = vmul.f32 %v3043_v23, %v3015_v37 }
0x10ac   :  { %v3096_v59 = vpop.xlane.xlu0 %3095  ;;  %3494 = vmatmul.msk.f32.gmra.mxu0 %vm1646_vm0, %v3047_v18 }
0x10ad   :  { %v3106_v7 = vmul.f32 %v3096_v59, %v3958_v58 }
0x10af   :  { %v3110_v10 = vsub.f32 %v3090_v51, %v3106_v7 }
0x10b1   :  { %v3114_v11 = vmul.f32 %v3110_v10, %v3110_v10 }
0x10b3   :  { %v3118_v43 = vsel %vm101_vm5, %v3114_v11, 0.0 }
0x10b4   :  { %3119 = vadd.xlane.f32.xlu2 %v3118_v43  ;;  %v3099_v47 = vpop.xlane.xlu0 %3098 }
0x10b5   :  { %v3107_v12 = vmul.f32 %v3099_v47, %v3958_v58 }
0x10b7   :  { %v3111_v39 = vsub.f32 %v3091_v36, %v3107_v12 }
0x10b9   :  { %v3115_v5 = vmul.f32 %v3111_v39, %v3111_v39 }
0x10bb   :  { %v3121_v49 = vsel %vm101_vm5, %v3115_v5, 0.0  ;;  %v3238_v5 = vld [vmem:[#allocation3 + $0x118] sm:$0xff] }
0x10bc   :  { %3122 = vadd.xlane.f32.xlu2 %v3121_v49  ;;  %v3237_v49 = vld [vmem:[#allocation3 + $0x110] sm:$0xff]  ;;  %3256 = vmatpush.msra.mxu3 %v3238_v5 }
0x10be   :  { %3257 = vmatpush.msra.mxu3 %v3237_v49 }
0x111a   :  { %v3102_v16 = vpop.xlane.xlu2 %3101 }
0x111b   :  { %v3108_v30 = vmul.f32 %v3102_v16, %v3958_v58 }
0x111d   :  { %v5025_v6 = vsub.f32 %v3092_v60, %v3108_v30  ;;  %v3236_v30 = vld [vmem:[#allocation3 + $0x108] sm:$0xff] }
0x111e   :  { %3258 = vmatpush.msra.mxu3 %v3236_v30 }
0x111f   :  { %v3116_v33 = vmul.f32 %v5025_v6, %v5025_v6 }
0x1121   :  { %v3124_v50 = vsel %vm101_vm5, %v3116_v33, 0.0 }
0x1122   :  { %3125 = vadd.xlane.f32.xlu1 %v3124_v50 }
0x1127   :  { %v3120_v53 = vpop.xlane.xlu2 %3119 }
0x1128   :  { %v3130_v62 = vmul.f32 %v3120_v53, %v3958_v58 }
0x1129   :  { %v3087_v41 = vpop.f32.mrf.mxu0 }
0x112a   :  { %v3134_v8 = vadd.f32 1e-12, %v3130_v62  ;;  %v3088_v31 = vadd.f32 %v3534_v56, %v3087_v41 }
0x112c   :  { %3717 = vrsqrt.f32 %v3134_v8  ;;  %v3093_v42 = vadd.f32 %v3088_v31, %v5007_v22  ;;  %vm3144_vm4 = vweird.f32 %v3134_v8 }
0x112e   :  { %v3103_v29 = vsel %vm101_vm5, %v3093_v42, 0.0 }
0x112f   :  { %v3123_v44 = vpop.xlane.xlu2 %3122  ;;  %3104 = vadd.xlane.f32.xlu1 %v3103_v29 }
0x1130   :  { %v3131_v14 = vmul.f32 %v3123_v44, %v3958_v58 }
0x1132   :  { %v3718_v0 = vpop.eup %3717  ;;  %v3135_v26 = vadd.f32 1e-12, %v3131_v14  ;;  %v3537_v14 = vld [vmem:[#allocation3 + $0xde] ss:$0 sm:$0xff] }
0x1133   :  { %v3139_v9 = vmul.f32 %v3718_v0, %v3134_v8  ;;  %vm3145_vm0 = vweird.f32 %v3718_v0 }
0x1134   :  { %3719 = vrsqrt.f32 %v3135_v26  ;;  %vm3146_vm6 = vmor %vm3144_vm4, %vm3145_vm0  ;;  %vm3154_vm7 = vweird.f32 %v3135_v26 }
0x1135   :  { %v3140_v40 = vmul.f32 %v3718_v0, %v3139_v9 }
0x1137   :  { %v3141_v19 = vmul.f32 0.5, %v3140_v40 }
0x1139   :  { %v3142_v34 = vsub.f32 1.5, %v3141_v19  ;;  %v3538_v19 = vld [vmem:[#allocation3 + $0xdf] ss:$0 sm:$0xff] }
0x113a   :  { %v3720_v2 = vpop.eup %3719 }
0x113b   :  { %v3143_v48 = vmul.f32 %v3718_v0, %v3142_v34  ;;  %v3149_v4 = vmul.f32 %v3720_v2, %v3135_v26  ;;  %vm3155_vm2 = vweird.f32 %v3720_v2 }
0x113c   :  { %vm3156_vm8 = vmor %vm3154_vm7, %vm3155_vm2 }
0x113d   :  { %v3147_v22 = vsel %vm3146_vm6, %v3718_v0, %v3143_v48  ;;  %v3150_v35 = vmul.f32 %v3720_v2, %v3149_v4 }
0x113e   :  { %v3178_v15 = vmul.f32 %v3147_v22, %v3110_v10 }
0x113f   :  { %v3151_v27 = vmul.f32 0.5, %v3150_v35 }
0x1140   :  { %v3183_v56 = vmul.f32 %v5034_v61, %v3178_v15 }
0x1141   :  { %v3152_v1 = vsub.f32 1.5, %v3151_v27 }
0x1142   :  { %v3188_v25 = vadd.f32 %v5036_v28, %v3183_v56 }
0x1143   :  { %v3153_v51 = vmul.f32 %v3720_v2, %v3152_v1 }
0x1144   :  { %3192 = vst.msk [vmem:[#allocation7] sm:$0xff] %vm101_vm5, %v3188_v25 }
0x1145   :  { %v3157_v55 = vsel %vm3156_vm8, %v3720_v2, %v3153_v51 }
0x1146   :  { %v3179_v38 = vmul.f32 %v3157_v55, %v3111_v39 }
0x1148   :  { %v3184_v21 = vmul.f32 %v5034_v61, %v3179_v38 }
0x114a   :  { %v3189_v36 = vadd.f32 %v5036_v28, %v3184_v21 }
0x114c   :  { %3193 = vst.msk [vmem:[#allocation9] sm:$0xff] %vm101_vm5, %v3189_v36 }
0x1195   :  { %v3126_v17 = vpop.xlane.xlu1 %3125 }
0x1196   :  { %v3132_v52 = vmul.f32 %v3126_v17, %v3958_v58 }
0x1198   :  { %v3136_v63 = vadd.f32 1e-12, %v3132_v52 }
0x119a   :  { %3721 = vrsqrt.f32 %v3136_v63  ;;  %vm3164_vm10 = vweird.f32 %v3136_v63 }
0x11a0   :  { %v3722_v45 = vpop.eup %3721 }
0x11a1   :  { %v3159_v46 = vmul.f32 %v3722_v45, %v3136_v63  ;;  %vm3165_vm9 = vweird.f32 %v3722_v45 }
0x11a2   :  { %v3105_v24 = vpop.xlane.xlu1 %3104  ;;  %vm3166_vm12 = vmor %vm3164_vm10, %vm3165_vm9 }
0x11a3   :  { %v3160_v60 = vmul.f32 %v3722_v45, %v3159_v46  ;;  %v3109_v20 = vmul.f32 %v3105_v24, %v3958_v58 }
0x11a5   :  { %v3161_v54 = vmul.f32 0.5, %v3160_v60  ;;  %v3113_v37 = vsub.f32 %v3093_v42, %v3109_v20 }
0x11a7   :  { %v3162_v23 = vsub.f32 1.5, %v3161_v54  ;;  %v3117_v18 = vmul.f32 %v3113_v37, %v3113_v37 }
0x11a9   :  { %v3163_v59 = vmul.f32 %v3722_v45, %v3162_v23  ;;  %v3127_v7 = vsel %vm101_vm5, %v3117_v18, 0.0 }
0x11aa   :  { %3128 = vadd.xlane.f32.xlu0 %v3127_v7 }
0x11ab   :  { %v3167_v10 = vsel %vm3166_vm12, %v3722_v45, %v3163_v59 }
0x11ac   :  { %v3180_v11 = vmul.f32 %v3167_v10, %v5025_v6  ;;  %v3235_v6 = vld [vmem:[#allocation3 + $0x100] sm:$0xff] }
0x11ad   :  { %3259 = vmatpush.msra.mxu3 %v3235_v6 }
0x11ae   :  { %v3185_v43 = vmul.f32 %v5034_v61, %v3180_v11 }
0x11b0   :  { %v3190_v47 = vadd.f32 %v5036_v28, %v3185_v43 }
0x11b2   :  { %3195 = vst.msk [vmem:[#allocation7 + $0x8] sm:$0xff] %vm101_vm5, %v3190_v47  ;;  %v3199_v12 = vrot.slane %v3190_v47, 7 }
0x11b3   :  { %3289 = dma.vmem_to_hbm [thread:$0]  %s3282_s30, 256, %s3284_s28, [#allocation8], %s3860_s14, %s3860_s14, %s3861_s15  }
0x11b4   :  { %v3202_v39 = vsel %vm3201_vm11, %v3188_v25, %v3199_v12 }
0x11b5   :  { %3495 = vmatmul.msk.f32.vlgmr.msrb.gmra.mxu3 %vm101_vm5, %v3202_v39 }
0x121d   :  { %v3129_v16 = vpop.xlane.xlu0 %3128 }
0x121e   :  { %v3133_v33 = vmul.f32 %v3129_v16, %v3958_v58 }
0x1220   :  { %v3137_v50 = vadd.f32 1e-12, %v3133_v33 }
0x1222   :  { %3723 = vrsqrt.f32 %v3137_v50  ;;  %vm3174_vm14 = vweird.f32 %v3137_v50 }
0x1228   :  { %v3724_v53 = vpop.eup %3723 }
0x1229   :  { %v3169_v62 = vmul.f32 %v3724_v53, %v3137_v50  ;;  %vm3175_vm13 = vweird.f32 %v3724_v53 }
0x122a   :  { %vm3176_vm15 = vmor %vm3174_vm14, %vm3175_vm13 }
0x122b   :  { %v3170_v41 = vmul.f32 %v3724_v53, %v3169_v62 }
0x122d   :  { %v3171_v8 = vmul.f32 0.5, %v3170_v41 }
0x122f   :  { %v3172_v31 = vsub.f32 1.5, %v3171_v8 }
0x1231   :  { %v3173_v42 = vmul.f32 %v3724_v53, %v3172_v31 }
0x1233   :  { %v3177_v29 = vsel %vm3176_vm15, %v3724_v53, %v3173_v42 }
0x1234   :  { %v3181_v44 = vmul.f32 %v3177_v29, %v3113_v37 }
0x1236   :  { %v3186_v58 = vmul.f32 %v5034_v61, %v3181_v44 }
0x1238   :  { %v3229_v0 = vpop.f32.mrf.mxu3  ;;  %v3191_v26 = vadd.f32 %v5036_v28, %v3186_v58 }
0x1239   :  { %v3230_v9 = vadd.f32 %v3537_v14, %v3229_v0 }
0x123a   :  { %3197 = vst.msk [vmem:[#allocation9 + $0x8] sm:$0xff] %vm101_vm5, %v3191_v26 }
0x123b   :  { %3725 = vtanh.f32 %v3230_v9  ;;  %3302 = dma.vmem_to_hbm [thread:$0]  %s3295_s1, 256, %s3297_s7, [#allocation8], %s3860_s14, %s3860_s14, %s3861_s15  }
0x1241   :  { %v3726_v40 = vpop.eup %3725 }
0x1242   :  { %3496 = vmatmul.msk.f32.vlgmr.msra.gmra.mxu3 %vm101_vm5, %v3726_v40  ;;  %3234 = vst.msk [vmem:[#allocation6] sm:$0x3] %vm3233_vm3, %v3726_v40  ;;  %vm3264_vm5 = vcmask 9216  }
0x1243   :  { %3276 = dma.vmem_to_hbm [thread:$0]  %s3272_s11, 32, %s3274_s16, [#allocation5]  }
0x12c5   :  { %v3261_v34 = vpop.f32.mrf.mxu3 }
0x12c6   :  { %v3262_v2 = vadd.f32 %v3538_v19, %v3261_v34 }
0x12c8   :  { %3265 = vst.msk [vmem:[#allocation10] sm:$0x3] %vm3264_vm5, %v3262_v2 }
0x12c9   :  { %3313 = dma.vmem_to_hbm [thread:$0]  %s3309_s20, 32, %s3311_s22, [#allocation11]  }
0x12ca   :  { %3853 = dma.done.wait [#allocation5], 32  }
0x12cb   :  { %3854 = vsyncadd [#allocation5], 4294967264 }
0x12cc   :  { %3855 = dma.done.wait [#allocation8], 512  }
0x12cd   :  { %3856 = vsyncadd [#allocation8], 4294966784 }
0x12ce   :  { %3857 = dma.done.wait [#allocation11], 32  }
0x12cf   :  { %3858 = vsyncadd [#allocation11], 4294967264 }
0x12d0   :  { %3330 = vsyncpa [#allocation4], 1 }
0x12d1   :  { %3331 = vsyncpa [#allocation5], 1 }
0x12d2   :  { %3332 = vsyncpa [#allocation8], 1 }
0x12d3   :  { %3333 = vsyncpa [#allocation11], 1 }

</bundles_post_ra>
